<compile_context>
chip_gen: v7x
topology: tpu7x:2x2x1
jax: 0.10.0
libtpu: 0.0.40
codegen_flags: <defaults>
</compile_context>

<pallas_src>
import functools

import jax
import jax.numpy as jnp
from jax import lax
from jax.experimental import pallas as pl
from jax.experimental.pallas import tpu as pltpu


ACT_DTYPE = jnp.bfloat16          # intermediate activation dtype (MXU-native)

_TM_LANE = 256    # lane-axis (M) tile: >=2 parallel blocks when M=512 (v7x megacore)
_TM_LANE_BIG = 512
_TK_SINGLE = 1024                 # use a single K block up to this size (always, here)
_TP_VQ = 256                      # VQ point tile (lane axis)


def _round_up(x, m):
    return ((x + m - 1) // m) * m


# ----------------------------------------------------------------------------
# Pallas kernel 1: lane-dense conv matmul  out(Cout, M) = W(Cout, K) @ X(K, M).
# ----------------------------------------------------------------------------
def _wxt_kernel(w_ref, x_ref, b_ref, o_ref, *, relu):
    out = jnp.dot(w_ref[...], x_ref[...], preferred_element_type=jnp.float32)
    out = out + b_ref[...]
    if relu:
        out = jnp.maximum(out, 0.0)
    o_ref[...] = out.astype(o_ref.dtype)


def _wxt_kacc_kernel(w_ref, x_ref, b_ref, o_ref, acc_ref, *, relu):
    @pl.when(pl.program_id(1) == 0)
    def _():
        acc_ref[...] = jnp.zeros_like(acc_ref)

    acc_ref[...] += jnp.dot(w_ref[...], x_ref[...],
                            preferred_element_type=jnp.float32)

    @pl.when(pl.program_id(1) == pl.num_programs(1) - 1)
    def _():
        out = acc_ref[...] + b_ref[...]
        if relu:
            out = jnp.maximum(out, 0.0)
        o_ref[...] = out.astype(o_ref.dtype)


def pallas_matmul_t(wT, xT, bias, relu=False, out_dtype=ACT_DTYPE):
    """Lane-dense conv matmul: (Cout, K) @ (K, M) + bias, optional ReLU."""
    Cout, K = wT.shape
    K2, M = xT.shape
    assert K == K2
    wT = wT.astype(jnp.bfloat16)
    xT = xT.astype(jnp.bfloat16)
    b2 = bias.reshape(Cout, 1).astype(jnp.float32)

    # Lane (M) tiling: full block if small, otherwise 128-multiple tiles so the
    # "parallel" axis has >=2 blocks (v7x has 2 TensorCores).
    if M <= _TM_LANE:
        tm, Mp = M, M
    else:
        tm = _TM_LANE if M <= 2048 else _TM_LANE_BIG
        Mp = _round_up(M, tm)
        if Mp != M:
            xT = jnp.pad(xT, ((0, 0), (0, Mp - M)))
    grid_m = Mp // tm

    if K <= _TK_SINGLE:
        out = pl.pallas_call(
            functools.partial(_wxt_kernel, relu=relu),
            out_shape=jax.ShapeDtypeStruct((Cout, Mp), out_dtype),
            grid_spec=pltpu.PrefetchScalarGridSpec(
                num_scalar_prefetch=0,
                grid=(grid_m,),
                in_specs=[
                    pl.BlockSpec((Cout, K), lambda i: (0, 0)),   # weights resident
                    pl.BlockSpec((K, tm), lambda i: (0, i)),
                    pl.BlockSpec((Cout, 1), lambda i: (0, 0)),
                ],
                out_specs=pl.BlockSpec((Cout, tm), lambda i: (0, i)),
            ),
            compiler_params=pltpu.CompilerParams(
                dimension_semantics=("parallel",)),
        )(wT, xT, b2)
    else:
        # Large-K fallback (never triggered at this model's sizes).
        tk = 512
        Kp = _round_up(K, tk)
        if Kp != K:
            # TODO(synk): mask the ragged K tail in-kernel instead of padding in HBM.
            wT = jnp.pad(wT, ((0, 0), (0, Kp - K)))
            xT = jnp.pad(xT, ((0, Kp - K), (0, 0)))
        out = pl.pallas_call(
            functools.partial(_wxt_kacc_kernel, relu=relu),
            out_shape=jax.ShapeDtypeStruct((Cout, Mp), out_dtype),
            grid_spec=pltpu.PrefetchScalarGridSpec(
                num_scalar_prefetch=0,
                grid=(grid_m, Kp // tk),
                in_specs=[
                    pl.BlockSpec((Cout, tk), lambda i, k: (0, k)),
                    pl.BlockSpec((tk, tm), lambda i, k: (k, i)),
                    pl.BlockSpec((Cout, 1), lambda i, k: (0, 0)),
                ],
                out_specs=pl.BlockSpec((Cout, tm), lambda i, k: (0, i)),
                scratch_shapes=[pltpu.VMEM((Cout, tm), jnp.float32)],
            ),
            compiler_params=pltpu.CompilerParams(
                dimension_semantics=("parallel", "arbitrary")),
        )(wT, xT, b2)

    return out[:, :M] if Mp != M else out


# ----------------------------------------------------------------------------
# Pallas kernel 2: fused ResBlock  out = x + W2 @ relu(W1 @ A + b1) + b2.
# ----------------------------------------------------------------------------
def _resblock_kernel(w1_ref, a_ref, b1_ref, w2_ref, b2_ref, x_ref, o_ref):
    h = jnp.dot(w1_ref[...], a_ref[...], preferred_element_type=jnp.float32)
    h = jnp.maximum(h + b1_ref[...], 0.0)
    y = jnp.dot(w2_ref[...], h.astype(jnp.bfloat16),
                preferred_element_type=jnp.float32)
    y = y + b2_ref[...] + x_ref[...].astype(jnp.float32)
    o_ref[...] = y.astype(o_ref.dtype)


def pallas_resblock(w1T, aT, b1, w2, b2, xT, out_dtype=ACT_DTYPE):
    """Fused residual block in channel-major layout.

    w1T: (C, 9C) 3x3 weights, aT: (9C, M) im2col, w2: (C, C) 1x1 weights,
    xT: (C, M) residual input.  Returns (C, M).
    """
    C, K9 = w1T.shape
    K9b, M = aT.shape
    assert K9 == K9b
    w1T = w1T.astype(jnp.bfloat16)
    w2 = w2.astype(jnp.bfloat16)
    aT = aT.astype(jnp.bfloat16)
    xTb = xT.astype(jnp.bfloat16)
    b1v = b1.reshape(C, 1).astype(jnp.float32)
    b2v = b2.reshape(C, 1).astype(jnp.float32)

    if M <= _TM_LANE:
        tm, Mp = M, M
    else:
        tm = _TM_LANE
        Mp = _round_up(M, tm)
        if Mp != M:
            aT = jnp.pad(aT, ((0, 0), (0, Mp - M)))
            xTb = jnp.pad(xTb, ((0, 0), (0, Mp - M)))
    grid_m = Mp // tm

    out = pl.pallas_call(
        _resblock_kernel,
        out_shape=jax.ShapeDtypeStruct((C, Mp), out_dtype),
        grid_spec=pltpu.PrefetchScalarGridSpec(
            num_scalar_prefetch=0,
            grid=(grid_m,),
            in_specs=[
                pl.BlockSpec((C, K9), lambda i: (0, 0)),    # 3x3 weights resident
                pl.BlockSpec((K9, tm), lambda i: (0, i)),   # im2col tile
                pl.BlockSpec((C, 1), lambda i: (0, 0)),
                pl.BlockSpec((C, C), lambda i: (0, 0)),     # 1x1 weights resident
                pl.BlockSpec((C, 1), lambda i: (0, 0)),
                pl.BlockSpec((C, tm), lambda i: (0, i)),    # residual tile
            ],
            out_specs=pl.BlockSpec((C, tm), lambda i: (0, i)),
        ),
        compiler_params=pltpu.CompilerParams(
            dimension_semantics=("parallel",)),
    )(w1T, aT, b1v, w2, b2v, xTb)

    return out[:, :M] if Mp != M else out


# ----------------------------------------------------------------------------
# Pallas kernel 3: vector quantization in channel-major layout (D, P).
# ----------------------------------------------------------------------------
def _vq_kernel_t(z_ref, e_ref, q_ref, loss_ref, *, num_points, tp):
    i = pl.program_id(0)

    @pl.when(i == 0)
    def _():
        loss_ref[...] = jnp.zeros_like(loss_ref)

    z = z_ref[...]                                 # (D, tp) bf16
    e = e_ref[...]                                 # (Cc, D) bf16 codebook (resident)
    zf = z.astype(jnp.float32)
    ef = e.astype(jnp.float32)

    z2 = jnp.sum(zf * zf, axis=0, keepdims=True)   # (1, tp)
    e2 = jnp.sum(ef * ef, axis=1, keepdims=True)   # (Cc, 1)
    # bf16 MXU operands, f32 accumulation (distance fidelity kept in f32).
    ez = jnp.dot(e, z, preferred_element_type=jnp.float32)   # (Cc, tp)
    d = e2 - 2.0 * ez + z2                                    # (Cc, tp)

    codes = lax.broadcasted_iota(jnp.int32, d.shape, 0)
    dmin = jnp.min(d, axis=0, keepdims=True)                  # (1, tp)
    cand = jnp.where(d <= dmin, codes, jnp.int32(2 ** 30))    # lowest-index tie-break
    idx = jnp.min(cand, axis=0, keepdims=True)                # (1, tp)
    onehot = (codes == idx).astype(jnp.bfloat16)              # (Cc, tp)

    q = lax.dot_general(e, onehot, (((0,), (0,)), ((), ())),
                        preferred_element_type=jnp.float32)   # (D, tp)
    q_ref[...] = q.astype(q_ref.dtype)

    # Squared-error loss reduced in-kernel (padded point columns masked out).
    col = i * tp + lax.broadcasted_iota(jnp.int32, q.shape, 1)
    diff = q - zf
    sq = jnp.where(col < num_points, diff * diff, 0.0)
    loss_ref[...] += jnp.sum(sq, keepdims=True)               # (1, 1) accumulator


def pallas_vector_quantize_t(zT, codebook, out_dtype=ACT_DTYPE):
    """zT: (D, P) channel-major points, codebook: (Ccodes, D).

    Returns (quantized (D, P), scalar sum of squared error).
    """
    D, P = zT.shape
    Cc, D2 = codebook.shape
    assert D == D2

    if P <= _TP_VQ:
        tp, Pp = P, P
    else:
        tp = _TP_VQ
        Pp = _round_up(P, tp)
        zT = jnp.pad(zT, ((0, 0), (0, Pp - P)))
    n_tiles = Pp // tp

    qT, loss = pl.pallas_call(
        functools.partial(_vq_kernel_t, num_points=P, tp=tp),
        out_shape=(
            jax.ShapeDtypeStruct((D, Pp), out_dtype),
            jax.ShapeDtypeStruct((1, 1), jnp.float32),
        ),
        grid_spec=pltpu.PrefetchScalarGridSpec(
            num_scalar_prefetch=0,
            grid=(n_tiles,),
            in_specs=[
                pl.BlockSpec((D, tp), lambda i: (0, i)),    # point tile
                pl.BlockSpec((Cc, D), lambda i: (0, 0)),    # codebook resident
            ],
            out_specs=[
                pl.BlockSpec((D, tp), lambda i: (0, i)),
                pl.BlockSpec((1, 1), lambda i: (0, 0)),     # resident loss accumulator
            ],
        ),
        compiler_params=pltpu.CompilerParams(
            dimension_semantics=("arbitrary",)),            # loss block is revisited
    )(zT.astype(jnp.bfloat16), codebook.astype(jnp.bfloat16))

    if Pp != P:
        qT = qT[:, :P]
    return qT, loss[0, 0]


# ----------------------------------------------------------------------------
# Convolution helpers (channel-major (C, N, H, W) layout; matmuls in Pallas).
# ----------------------------------------------------------------------------
def _im2col_T(x, kh, kw, stride, padding):
    """x: (C, N, H, W) -> (kh*kw*C, N*Ho*Wo) patch matrix (tap-major, channel-minor)."""
    C, N, H, W = x.shape
    xp = jnp.pad(x, ((0, 0), (0, 0), (padding, padding), (padding, padding)))
    Ho = (H + 2 * padding - kh) // stride + 1
    Wo = (W + 2 * padding - kw) // stride + 1
    rows = []
    for i in range(kh):
        for j in range(kw):
            v = xp[:, :, i:i + (Ho - 1) * stride + 1:stride,
                   j:j + (Wo - 1) * stride + 1:stride]       # (C, N, Ho, Wo)
            rows.append(v.reshape(C, N * Ho * Wo))
    # TODO(synk): stream the kh*kw taps through the Pallas grid instead of
    # materializing this matrix (negligible bytes at these tiny shapes).
    return jnp.concatenate(rows, axis=0), Ho, Wo


def conv2d_cm(x, w, b, stride=1, padding=0, relu=False, out_dtype=ACT_DTYPE):
    """x: (C, N, H, W), w: PyTorch Conv2d layout (Cout, Cin, kh, kw), b: (Cout,)."""
    Cin, N, H, W = x.shape
    Cout, Cin2, kh, kw = w.shape
    assert Cin == Cin2
    aT, Ho, Wo = _im2col_T(x, kh, kw, stride, padding)               # (K, M)
    wT = jnp.transpose(w, (0, 2, 3, 1)).reshape(Cout, kh * kw * Cin)  # (Cout, K)
    oT = pallas_matmul_t(wT, aT, b, relu=relu, out_dtype=out_dtype)   # (Cout, M)
    return oT.reshape(Cout, N, Ho, Wo)


def conv_transpose2d_cm(x, w, b, stride, padding, output_padding, relu=False,
                        out_dtype=ACT_DTYPE):
    """x: (C, N, H, W), w: PyTorch ConvTranspose2d layout (Cin, Cout, kh, kw)."""
    Cin, N, H, W = x.shape
    Cin2, Cout, kh, kw = w.shape
    assert Cin == Cin2
    Hd = (H - 1) * stride + 1
    Wd = (W - 1) * stride + 1
    xd = jnp.zeros((Cin, N, Hd, Wd), x.dtype).at[:, :, ::stride, ::stride].set(x)
    ph = kh - 1 - padding
    pw = kw - 1 - padding
    xd = jnp.pad(xd, ((0, 0), (0, 0),
                      (ph, ph + output_padding), (pw, pw + output_padding)))
    w_flip = w[:, :, ::-1, ::-1]                       # (Cin, Cout, kh, kw)
    w_conv = jnp.transpose(w_flip, (1, 0, 2, 3))       # (Cout, Cin, kh, kw)
    # TODO(synk): subpixel (stride^2 sub-kernel) decomposition would avoid the
    # MACs on the stuffed zeros; kept zero-stuffed for correctness at tiny sizes.
    return conv2d_cm(xd, w_conv, b, stride=1, padding=0, relu=relu,
                     out_dtype=out_dtype)


def _down_pad(k):
    return k // 2 - 1 if k % 2 == 0 else k // 2


def resblock_cm(p, x):
    """Fused x + conv1x1(relu(conv3x3(x))) in a single pallas_call."""
    C, N, H, W = x.shape
    aT, Ho, Wo = _im2col_T(x, 3, 3, 1, 1)                      # (9C, M), Ho=H, Wo=W
    w1T = jnp.transpose(p["w1"], (0, 2, 3, 1)).reshape(C, 9 * C)
    w2 = p["w2"].reshape(C, C)
    xT = x.reshape(C, N * H * W)
    oT = pallas_resblock(w1T, aT, p["b1"], w2, p["b2"], xT)
    return oT.reshape(C, N, H, W)


def encoder_forward(params, x, kernel_sizes, res_layers):
    for i, k in enumerate(kernel_sizes):
        p = params[f"down{i}"]
        x = conv2d_cm(x, p["w"], p["b"], stride=2, padding=_down_pad(k), relu=True)
    for r in range(res_layers):
        x = resblock_cm(params[f"res{r}"], x)
    return x


def decoder_forward(params, x, kernel_sizes, res_layers, final_dtype=ACT_DTYPE):
    for r in range(res_layers):
        x = resblock_cm(params[f"res{r}"], x)
    ks = list(kernel_sizes)[::-1]
    n = len(ks)
    for i, k in enumerate(ks):
        p = params[f"up{i}"]
        op = 0 if k % 2 == 0 else 1
        last = (i == n - 1)
        x = conv_transpose2d_cm(x, p["w"], p["b"], stride=2, padding=_down_pad(k),
                                output_padding=op, relu=not last,
                                out_dtype=final_dtype if last else ACT_DTYPE)
    return x


def quantize(codebook, x_cm, lower_bound_factor):
    C, N, H, W = x_cm.shape
    zT = x_cm.reshape(C, N * H * W)
    qT, sq_sum = pallas_vector_quantize_t(zT, codebook)
    mse = sq_sum / (N * H * W * C)
    # codebook loss + lower_bound_factor * commitment loss (value-identical forward)
    loss = (1.0 + lower_bound_factor) * mse
    return qT.reshape(C, N, H, W), loss


# ----------------------------------------------------------------------------
# Parameter init (deterministic, synthetic).
# ----------------------------------------------------------------------------
def _nrm(key, shape, scale=0.1):
    return scale * jax.random.normal(key, shape, dtype=jnp.float32)


class _KeyGen:
    def __init__(self, key):
        self.key = key
        self.i = 0

    def __call__(self):
        self.i += 1
        return jax.random.fold_in(self.key, self.i)


def _init_encoder(kg, in_c, out_c, kernel_sizes, res_layers):
    p = {}
    c = in_c
    for i, k in enumerate(kernel_sizes):
        p[f"down{i}"] = {"w": _nrm(kg(), (out_c, c, k, k)), "b": _nrm(kg(), (out_c,), 0.01)}
        c = out_c
    for r in range(res_layers):
        p[f"res{r}"] = {
            "w1": _nrm(kg(), (out_c, out_c, 3, 3)), "b1": _nrm(kg(), (out_c,), 0.01),
            "w2": _nrm(kg(), (out_c, out_c, 1, 1)), "b2": _nrm(kg(), (out_c,), 0.01),
        }
    return p


def _init_decoder(kg, in_c, out_c, kernel_sizes, res_layers):
    p = {}
    for r in range(res_layers):
        p[f"res{r}"] = {
            "w1": _nrm(kg(), (in_c, in_c, 3, 3)), "b1": _nrm(kg(), (in_c,), 0.01),
            "w2": _nrm(kg(), (in_c, in_c, 1, 1)), "b2": _nrm(kg(), (in_c,), 0.01),
        }
    ks = list(kernel_sizes)[::-1]
    c = in_c
    for i, k in enumerate(ks):
        co = out_c if i == len(ks) - 1 else in_c
        # ConvTranspose2d weight layout: (Cin, Cout, k, k)
        p[f"up{i}"] = {"w": _nrm(kg(), (c, co, k, k)), "b": _nrm(kg(), (co,), 0.01)}
        c = co
    return p


def init_vqvae2_params(key, in_channels, latent, kernel_sizes, res_layers, code_book_size):
    kg = _KeyGen(key)
    half = latent // 2
    return {
        "enc_bottom": _init_encoder(kg, in_channels, latent, kernel_sizes[:-1], res_layers),
        "enc_top": _init_encoder(kg, latent, latent, kernel_sizes[-1:], res_layers),
        "quat_cov_bottom": {"w": _nrm(kg(), (half, latent, 1, 1)), "b": _nrm(kg(), (half,), 0.01)},
        "quat_cov_top": {"w": _nrm(kg(), (half, latent, 1, 1)), "b": _nrm(kg(), (half,), 0.01)},
        "codebook_top": _nrm(kg(), (code_book_size, half), 0.5),
        "codebook_bottom": _nrm(kg(), (code_book_size, latent), 0.5),
        "upsample_top": {"w": _nrm(kg(), (half, half, 3, 3)), "b": _nrm(kg(), (half,), 0.01)},
        "dec_top": _init_decoder(kg, half, half, kernel_sizes[-1:], res_layers),
        "dec_bottom": _init_decoder(kg, latent + half, in_channels, kernel_sizes[:-1], res_layers),
    }


# ----------------------------------------------------------------------------
# VQ_VAE2 forward (mirrors the PyTorch encode / decode / forward).
# ----------------------------------------------------------------------------
def vqvae2_forward(params, x_nchw, kernel_sizes, res_layers, lower_bound_factor):
    x = jnp.transpose(x_nchw, (1, 0, 2, 3)).astype(ACT_DTYPE)   # NCHW -> CNHW

    b_enc = encoder_forward(params["enc_bottom"], x, kernel_sizes[:-1], res_layers)
    t_enc = encoder_forward(params["enc_top"], b_enc, kernel_sizes[-1:], res_layers)

    # TODO(synk): the 1x1 quant convs could be fused into the preceding
    # resblock / VQ kernels; kept as separate lane-dense Pallas matmuls here.
    b_enc_q = conv2d_cm(b_enc, params["quat_cov_bottom"]["w"], params["quat_cov_bottom"]["b"])
    t_enc_q = conv2d_cm(t_enc, params["quat_cov_top"]["w"], params["quat_cov_top"]["b"])

    t_quant, t_loss = quantize(params["codebook_top"], t_enc_q, lower_bound_factor)
    t_up = conv_transpose2d_cm(t_quant, params["upsample_top"]["w"], params["upsample_top"]["b"],
                               stride=2, padding=1, output_padding=1)
    t_dec = decoder_forward(params["dec_top"], t_quant, kernel_sizes[-1:], res_layers)

    b_cat = jnp.concatenate([b_enc_q, t_dec], axis=0)           # channel concat (axis 0)
    b_quant, b_loss = quantize(params["codebook_bottom"], b_cat, lower_bound_factor)
    quant_loss = b_loss + t_loss

    dec_in = jnp.concatenate([b_quant, t_up], axis=0)
    x_hat = decoder_forward(params["dec_bottom"], dec_in, kernel_sizes[:-1], res_layers,
                            final_dtype=jnp.float32)

    return jnp.transpose(x_hat, (1, 0, 2, 3)), quant_loss        # CNHW -> NCHW


if __name__ == "__main__":
    # Small, forward-consistent config.
    in_channels = 3
    latent_dimension = 8
    kernel_sizes = [4, 4, 3]     # bottom encoder: [4,4] (16->4); top encoder: [3] (4->2)
    res_layers = 1
    code_book_size = 32
    lower_bound_factor = 0.25

    key = jax.random.PRNGKey(0)
    pkey, xkey = jax.random.split(key)
    params = init_vqvae2_params(pkey, in_channels, latent_dimension,
                                kernel_sizes, res_layers, code_book_size)

    x = jax.random.normal(xkey, (2, in_channels, 16, 16), dtype=jnp.float32)  # NCHW

    fwd = jax.jit(functools.partial(vqvae2_forward,
                                    kernel_sizes=tuple(kernel_sizes),
                                    res_layers=res_layers,
                                    lower_bound_factor=lower_bound_factor))
    x_hat, quant_loss = fwd(params, x)
    x_hat = jax.block_until_ready(x_hat)
    quant_loss = jax.block_until_ready(quant_loss)

    assert x_hat.shape == (2, in_channels, 16, 16), x_hat.shape
    assert quant_loss.shape == (), quant_loss.shape
    assert jnp.all(jnp.isfinite(x_hat)) and jnp.isfinite(quant_loss)
    print("KERNEL_OK")
</pallas_src>

<mosaic_0001>
module attributes {stable_mosaic.version = 11 : i64} {
  func.func @_wxt_kernel(%arg0: i32, %arg1: memref<8x48xbf16, #tpu.memory_space<vmem>>, %arg2: memref<48x128xbf16, #tpu.memory_space<vmem>>, %arg3: memref<8x1xf32, #tpu.memory_space<vmem>>, %arg4: memref<8x128xbf16, #tpu.memory_space<vmem>>) attributes {dimension_semantics = [#tpu.dimension_semantics<parallel>], iteration_bounds = array<i64: 1>, scalar_prefetch = 0 : i64, scratch_operands = 0 : i64, tpu.core_type = #tpu.core_type<tc>, window_params = [{pipeline_mode = #tpu.pipeline_mode<synchronous>, transform_indices = @transform_0, window_bounds = array<i64: 8, 48>}, {transform_indices = @transform_1, window_bounds = array<i64: 48, 128>}, {pipeline_mode = #tpu.pipeline_mode<synchronous>, transform_indices = @transform_2, window_bounds = array<i64: 8, 1>}, {transform_indices = @transform_3, window_bounds = array<i64: 8, 128>}]} {
    %c0 = arith.constant 0 : index
    %c0_0 = arith.constant 0 : index
    %0 = vector.load %arg1[%c0, %c0_0] : memref<8x48xbf16, #tpu.memory_space<vmem>>, vector<8x48xbf16>
    %c0_1 = arith.constant 0 : index
    %c0_2 = arith.constant 0 : index
    %1 = vector.load %arg2[%c0_1, %c0_2] : memref<48x128xbf16, #tpu.memory_space<vmem>>, vector<48x128xbf16>
    %cst = arith.constant dense<0.000000e+00> : vector<8x128xf32>
    %2 = tpu.matmul %0, %1, %cst {dimension_numbers = #tpu.dot_dimension_numbers<[1], [0], [0], [1], [0, 0, 1, 1], [], []>} : vector<8x48xbf16>, vector<48x128xbf16>, vector<8x128xf32> -> vector<8x128xf32>
    %c0_3 = arith.constant 0 : index
    %c0_4 = arith.constant 0 : index
    %3 = vector.load %arg3[%c0_3, %c0_4] : memref<8x1xf32, #tpu.memory_space<vmem>>, vector<8x1xf32>
    %4 = vector.broadcast %3 : vector<8x1xf32> to vector<8x128xf32>
    %5 = arith.addf %2, %4 : vector<8x128xf32>
    %cst_5 = arith.constant 0.000000e+00 : f32
    %6 = vector.broadcast %cst_5 : f32 to vector<8x128xf32>
    %7 = arith.maximumf %5, %6 : vector<8x128xf32>
    %8 = arith.truncf %7 : vector<8x128xf32> to vector<8x128xbf16>
    %c0_6 = arith.constant 0 : index
    %c0_7 = arith.constant 0 : index
    %9 = vector.load %arg4[%c0_6, %c0_7] : memref<8x128xbf16, #tpu.memory_space<vmem>>, vector<8x128xbf16>
    tpu.vector_store %arg4[%c0_6, %c0_7], %8 {strides = array<i32>} : memref<8x128xbf16, #tpu.memory_space<vmem>>, vector<8x128xbf16>,
    return
  }
  func.func @transform_0(%arg0: i32) -> (i32, i32) {
    %c0_i32 = arith.constant 0 : i32
    %c0_i32_0 = arith.constant 0 : i32
    %c0_i32_1 = arith.constant 0 : i32
    return %c0_i32, %c0_i32_0 : i32, i32
  }
  func.func @transform_1(%arg0: i32) -> (i32, i32) {
    %c0_i32 = arith.constant 0 : i32
    %c0_i32_0 = arith.constant 0 : i32
    return %c0_i32, %arg0 : i32, i32
  }
  func.func @transform_2(%arg0: i32) -> (i32, i32) {
    %c0_i32 = arith.constant 0 : i32
    %c0_i32_0 = arith.constant 0 : i32
    %c0_i32_1 = arith.constant 0 : i32
    return %c0_i32, %c0_i32_0 : i32, i32
  }
  func.func @transform_3(%arg0: i32) -> (i32, i32) {
    %c0_i32 = arith.constant 0 : i32
    %c0_i32_0 = arith.constant 0 : i32
    return %c0_i32, %arg0 : i32, i32
  }
}

module attributes {stable_mosaic.version = 11 : i64} {
  func.func @_wxt_kernel(%arg0: i32, %arg1: memref<8x128xbf16, #tpu.memory_space<vmem>>, %arg2: memref<128x32xbf16, #tpu.memory_space<vmem>>, %arg3: memref<8x1xf32, #tpu.memory_space<vmem>>, %arg4: memref<8x32xbf16, #tpu.memory_space<vmem>>) attributes {dimension_semantics = [#tpu.dimension_semantics<parallel>], iteration_bounds = array<i64: 1>, scalar_prefetch = 0 : i64, scratch_operands = 0 : i64, tpu.core_type = #tpu.core_type<tc>, window_params = [{pipeline_mode = #tpu.pipeline_mode<synchronous>, transform_indices = @transform_0, window_bounds = array<i64: 8, 128>}, {transform_indices = @transform_1, window_bounds = array<i64: 128, 32>}, {pipeline_mode = #tpu.pipeline_mode<synchronous>, transform_indices = @transform_2, window_bounds = array<i64: 8, 1>}, {transform_indices = @transform_3, window_bounds = array<i64: 8, 32>}]} {
    %c0 = arith.constant 0 : index
    %c0_0 = arith.constant 0 : index
    %0 = vector.load %arg1[%c0, %c0_0] : memref<8x128xbf16, #tpu.memory_space<vmem>>, vector<8x128xbf16>
    %c0_1 = arith.constant 0 : index
    %c0_2 = arith.constant 0 : index
    %1 = vector.load %arg2[%c0_1, %c0_2] : memref<128x32xbf16, #tpu.memory_space<vmem>>, vector<128x32xbf16>
    %cst = arith.constant dense<0.000000e+00> : vector<8x32xf32>
    %2 = tpu.matmul %0, %1, %cst {dimension_numbers = #tpu.dot_dimension_numbers<[1], [0], [0], [1], [0, 0, 1, 1], [], []>} : vector<8x128xbf16>, vector<128x32xbf16>, vector<8x32xf32> -> vector<8x32xf32>
    %c0_3 = arith.constant 0 : index
    %c0_4 = arith.constant 0 : index
    %3 = vector.load %arg3[%c0_3, %c0_4] : memref<8x1xf32, #tpu.memory_space<vmem>>, vector<8x1xf32>
    %4 = vector.broadcast %3 : vector<8x1xf32> to vector<8x32xf32>
    %5 = arith.addf %2, %4 : vector<8x32xf32>
    %cst_5 = arith.constant 0.000000e+00 : f32
    %6 = vector.broadcast %cst_5 : f32 to vector<8x32xf32>
    %7 = arith.maximumf %5, %6 : vector<8x32xf32>
    %8 = arith.truncf %7 : vector<8x32xf32> to vector<8x32xbf16>
    %c0_6 = arith.constant 0 : index
    %c0_7 = arith.constant 0 : index
    %9 = vector.load %arg4[%c0_6, %c0_7] : memref<8x32xbf16, #tpu.memory_space<vmem>>, vector<8x32xbf16>
    tpu.vector_store %arg4[%c0_6, %c0_7], %8 {strides = array<i32>} : memref<8x32xbf16, #tpu.memory_space<vmem>>, vector<8x32xbf16>,
    return
  }
  func.func @transform_0(%arg0: i32) -> (i32, i32) {
    %c0_i32 = arith.constant 0 : i32
    %c0_i32_0 = arith.constant 0 : i32
    %c0_i32_1 = arith.constant 0 : i32
    return %c0_i32, %c0_i32_0 : i32, i32
  }
  func.func @transform_1(%arg0: i32) -> (i32, i32) {
    %c0_i32 = arith.constant 0 : i32
    %c0_i32_0 = arith.constant 0 : i32
    return %c0_i32, %arg0 : i32, i32
  }
  func.func @transform_2(%arg0: i32) -> (i32, i32) {
    %c0_i32 = arith.constant 0 : i32
    %c0_i32_0 = arith.constant 0 : i32
    %c0_i32_1 = arith.constant 0 : i32
    return %c0_i32, %c0_i32_0 : i32, i32
  }
  func.func @transform_3(%arg0: i32) -> (i32, i32) {
    %c0_i32 = arith.constant 0 : i32
    %c0_i32_0 = arith.constant 0 : i32
    return %c0_i32, %arg0 : i32, i32
  }
}

module attributes {stable_mosaic.version = 11 : i64} {
  func.func @_resblock_kernel(%arg0: i32, %arg1: memref<8x72xbf16, #tpu.memory_space<vmem>>, %arg2: memref<72x32xbf16, #tpu.memory_space<vmem>>, %arg3: memref<8x1xf32, #tpu.memory_space<vmem>>, %arg4: memref<8x8xbf16, #tpu.memory_space<vmem>>, %arg5: memref<8x1xf32, #tpu.memory_space<vmem>>, %arg6: memref<8x32xbf16, #tpu.memory_space<vmem>>, %arg7: memref<8x32xbf16, #tpu.memory_space<vmem>>) attributes {dimension_semantics = [#tpu.dimension_semantics<parallel>], iteration_bounds = array<i64: 1>, scalar_prefetch = 0 : i64, scratch_operands = 0 : i64, tpu.core_type = #tpu.core_type<tc>, window_params = [{pipeline_mode = #tpu.pipeline_mode<synchronous>, transform_indices = @transform_0, window_bounds = array<i64: 8, 72>}, {transform_indices = @transform_1, window_bounds = array<i64: 72, 32>}, {pipeline_mode = #tpu.pipeline_mode<synchronous>, transform_indices = @transform_2, window_bounds = array<i64: 8, 1>}, {pipeline_mode = #tpu.pipeline_mode<synchronous>, transform_indices = @transform_3, window_bounds = array<i64: 8, 8>}, {pipeline_mode = #tpu.pipeline_mode<synchronous>, transform_indices = @transform_4, window_bounds = array<i64: 8, 1>}, {transform_indices = @transform_5, window_bounds = array<i64: 8, 32>}, {transform_indices = @transform_6, window_bounds = array<i64: 8, 32>}]} {
    %c0 = arith.constant 0 : index
    %c0_0 = arith.constant 0 : index
    %0 = vector.load %arg1[%c0, %c0_0] : memref<8x72xbf16, #tpu.memory_space<vmem>>, vector<8x72xbf16>
    %c0_1 = arith.constant 0 : index
    %c0_2 = arith.constant 0 : index
    %1 = vector.load %arg2[%c0_1, %c0_2] : memref<72x32xbf16, #tpu.memory_space<vmem>>, vector<72x32xbf16>
    %cst = arith.constant dense<0.000000e+00> : vector<8x32xf32>
    %2 = tpu.matmul %0, %1, %cst {dimension_numbers = #tpu.dot_dimension_numbers<[1], [0], [0], [1], [0, 0, 1, 1], [], []>} : vector<8x72xbf16>, vector<72x32xbf16>, vector<8x32xf32> -> vector<8x32xf32>
    %c0_3 = arith.constant 0 : index
    %c0_4 = arith.constant 0 : index
    %3 = vector.load %arg3[%c0_3, %c0_4] : memref<8x1xf32, #tpu.memory_space<vmem>>, vector<8x1xf32>
    %4 = vector.broadcast %3 : vector<8x1xf32> to vector<8x32xf32>
    %5 = arith.addf %2, %4 : vector<8x32xf32>
    %cst_5 = arith.constant 0.000000e+00 : f32
    %6 = vector.broadcast %cst_5 : f32 to vector<8x32xf32>
    %7 = arith.maximumf %5, %6 : vector<8x32xf32>
    %c0_6 = arith.constant 0 : index
    %c0_7 = arith.constant 0 : index
    %8 = vector.load %arg4[%c0_6, %c0_7] : memref<8x8xbf16, #tpu.memory_space<vmem>>, vector<8x8xbf16>
    %9 = arith.truncf %7 : vector<8x32xf32> to vector<8x32xbf16>
    %cst_8 = arith.constant dense<0.000000e+00> : vector<8x32xf32>
    %10 = tpu.matmul %8, %9, %cst_8 {dimension_numbers = #tpu.dot_dimension_numbers<[1], [0], [0], [1], [0, 0, 1, 1], [], []>} : vector<8x8xbf16>, vector<8x32xbf16>, vector<8x32xf32> -> vector<8x32xf32>
    %c0_9 = arith.constant 0 : index
    %c0_10 = arith.constant 0 : index
    %11 = vector.load %arg5[%c0_9, %c0_10] : memref<8x1xf32, #tpu.memory_space<vmem>>, vector<8x1xf32>
    %12 = vector.broadcast %11 : vector<8x1xf32> to vector<8x32xf32>
    %13 = arith.addf %10, %12 : vector<8x32xf32>
    %c0_11 = arith.constant 0 : index
    %c0_12 = arith.constant 0 : index
    %14 = vector.load %arg6[%c0_11, %c0_12] : memref<8x32xbf16, #tpu.memory_space<vmem>>, vector<8x32xbf16>
    %15 = arith.extf %14 : vector<8x32xbf16> to vector<8x32xf32>
    %16 = arith.addf %13, %15 : vector<8x32xf32>
    %17 = arith.truncf %16 : vector<8x32xf32> to vector<8x32xbf16>
    %c0_13 = arith.constant 0 : index
    %c0_14 = arith.constant 0 : index
    %18 = vector.load %arg7[%c0_13, %c0_14] : memref<8x32xbf16, #tpu.memory_space<vmem>>, vector<8x32xbf16>
    tpu.vector_store %arg7[%c0_13, %c0_14], %17 {strides = array<i32>} : memref<8x32xbf16, #tpu.memory_space<vmem>>, vector<8x32xbf16>,
    return
  }
  func.func @transform_0(%arg0: i32) -> (i32, i32) {
    %c0_i32 = arith.constant 0 : i32
    %c0_i32_0 = arith.constant 0 : i32
    %c0_i32_1 = arith.constant 0 : i32
    return %c0_i32, %c0_i32_0 : i32, i32
  }
  func.func @transform_1(%arg0: i32) -> (i32, i32) {
    %c0_i32 = arith.constant 0 : i32
    %c0_i32_0 = arith.constant 0 : i32
    return %c0_i32, %arg0 : i32, i32
  }
  func.func @transform_2(%arg0: i32) -> (i32, i32) {
    %c0_i32 = arith.constant 0 : i32
    %c0_i32_0 = arith.constant 0 : i32
    %c0_i32_1 = arith.constant 0 : i32
    return %c0_i32, %c0_i32_0 : i32, i32
  }
  func.func @transform_3(%arg0: i32) -> (i32, i32) {
    %c0_i32 = arith.constant 0 : i32
    %c0_i32_0 = arith.constant 0 : i32
    %c0_i32_1 = arith.constant 0 : i32
    return %c0_i32, %c0_i32_0 : i32, i32
  }
  func.func @transform_4(%arg0: i32) -> (i32, i32) {
    %c0_i32 = arith.constant 0 : i32
    %c0_i32_0 = arith.constant 0 : i32
    %c0_i32_1 = arith.constant 0 : i32
    return %c0_i32, %c0_i32_0 : i32, i32
  }
  func.func @transform_5(%arg0: i32) -> (i32, i32) {
    %c0_i32 = arith.constant 0 : i32
    %c0_i32_0 = arith.constant 0 : i32
    return %c0_i32, %arg0 : i32, i32
  }
  func.func @transform_6(%arg0: i32) -> (i32, i32) {
    %c0_i32 = arith.constant 0 : i32
    %c0_i32_0 = arith.constant 0 : i32
    return %c0_i32, %arg0 : i32, i32
  }
}

module attributes {stable_mosaic.version = 11 : i64} {
  func.func @_wxt_kernel(%arg0: i32, %arg1: memref<8x72xbf16, #tpu.memory_space<vmem>>, %arg2: memref<72x8xbf16, #tpu.memory_space<vmem>>, %arg3: memref<8x1xf32, #tpu.memory_space<vmem>>, %arg4: memref<8x8xbf16, #tpu.memory_space<vmem>>) attributes {dimension_semantics = [#tpu.dimension_semantics<parallel>], iteration_bounds = array<i64: 1>, scalar_prefetch = 0 : i64, scratch_operands = 0 : i64, tpu.core_type = #tpu.core_type<tc>, window_params = [{pipeline_mode = #tpu.pipeline_mode<synchronous>, transform_indices = @transform_0, window_bounds = array<i64: 8, 72>}, {transform_indices = @transform_1, window_bounds = array<i64: 72, 8>}, {pipeline_mode = #tpu.pipeline_mode<synchronous>, transform_indices = @transform_2, window_bounds = array<i64: 8, 1>}, {transform_indices = @transform_3, window_bounds = array<i64: 8, 8>}]} {
    %c0 = arith.constant 0 : index
    %c0_0 = arith.constant 0 : index
    %0 = vector.load %arg1[%c0, %c0_0] : memref<8x72xbf16, #tpu.memory_space<vmem>>, vector<8x72xbf16>
    %c0_1 = arith.constant 0 : index
    %c0_2 = arith.constant 0 : index
    %1 = vector.load %arg2[%c0_1, %c0_2] : memref<72x8xbf16, #tpu.memory_space<vmem>>, vector<72x8xbf16>
    %cst = arith.constant dense<0.000000e+00> : vector<8x8xf32>
    %2 = tpu.matmul %0, %1, %cst {dimension_numbers = #tpu.dot_dimension_numbers<[1], [0], [0], [1], [0, 0, 1, 1], [], []>} : vector<8x72xbf16>, vector<72x8xbf16>, vector<8x8xf32> -> vector<8x8xf32>
    %c0_3 = arith.constant 0 : index
    %c0_4 = arith.constant 0 : index
    %3 = vector.load %arg3[%c0_3, %c0_4] : memref<8x1xf32, #tpu.memory_space<vmem>>, vector<8x1xf32>
    %4 = vector.broadcast %3 : vector<8x1xf32> to vector<8x8xf32>
    %5 = arith.addf %2, %4 : vector<8x8xf32>
    %cst_5 = arith.constant 0.000000e+00 : f32
    %6 = vector.broadcast %cst_5 : f32 to vector<8x8xf32>
    %7 = arith.maximumf %5, %6 : vector<8x8xf32>
    %8 = arith.truncf %7 : vector<8x8xf32> to vector<8x8xbf16>
    %c0_6 = arith.constant 0 : index
    %c0_7 = arith.constant 0 : index
    %9 = vector.load %arg4[%c0_6, %c0_7] : memref<8x8xbf16, #tpu.memory_space<vmem>>, vector<8x8xbf16>
    tpu.vector_store %arg4[%c0_6, %c0_7], %8 {strides = array<i32>} : memref<8x8xbf16, #tpu.memory_space<vmem>>, vector<8x8xbf16>,
    return
  }
  func.func @transform_0(%arg0: i32) -> (i32, i32) {
    %c0_i32 = arith.constant 0 : i32
    %c0_i32_0 = arith.constant 0 : i32
    %c0_i32_1 = arith.constant 0 : i32
    return %c0_i32, %c0_i32_0 : i32, i32
  }
  func.func @transform_1(%arg0: i32) -> (i32, i32) {
    %c0_i32 = arith.constant 0 : i32
    %c0_i32_0 = arith.constant 0 : i32
    return %c0_i32, %arg0 : i32, i32
  }
  func.func @transform_2(%arg0: i32) -> (i32, i32) {
    %c0_i32 = arith.constant 0 : i32
    %c0_i32_0 = arith.constant 0 : i32
    %c0_i32_1 = arith.constant 0 : i32
    return %c0_i32, %c0_i32_0 : i32, i32
  }
  func.func @transform_3(%arg0: i32) -> (i32, i32) {
    %c0_i32 = arith.constant 0 : i32
    %c0_i32_0 = arith.constant 0 : i32
    return %c0_i32, %arg0 : i32, i32
  }
}

module attributes {stable_mosaic.version = 11 : i64} {
  func.func @_resblock_kernel(%arg0: i32, %arg1: memref<8x72xbf16, #tpu.memory_space<vmem>>, %arg2: memref<72x8xbf16, #tpu.memory_space<vmem>>, %arg3: memref<8x1xf32, #tpu.memory_space<vmem>>, %arg4: memref<8x8xbf16, #tpu.memory_space<vmem>>, %arg5: memref<8x1xf32, #tpu.memory_space<vmem>>, %arg6: memref<8x8xbf16, #tpu.memory_space<vmem>>, %arg7: memref<8x8xbf16, #tpu.memory_space<vmem>>) attributes {dimension_semantics = [#tpu.dimension_semantics<parallel>], iteration_bounds = array<i64: 1>, scalar_prefetch = 0 : i64, scratch_operands = 0 : i64, tpu.core_type = #tpu.core_type<tc>, window_params = [{pipeline_mode = #tpu.pipeline_mode<synchronous>, transform_indices = @transform_0, window_bounds = array<i64: 8, 72>}, {transform_indices = @transform_1, window_bounds = array<i64: 72, 8>}, {pipeline_mode = #tpu.pipeline_mode<synchronous>, transform_indices = @transform_2, window_bounds = array<i64: 8, 1>}, {pipeline_mode = #tpu.pipeline_mode<synchronous>, transform_indices = @transform_3, window_bounds = array<i64: 8, 8>}, {pipeline_mode = #tpu.pipeline_mode<synchronous>, transform_indices = @transform_4, window_bounds = array<i64: 8, 1>}, {transform_indices = @transform_5, window_bounds = array<i64: 8, 8>}, {transform_indices = @transform_6, window_bounds = array<i64: 8, 8>}]} {
    %c0 = arith.constant 0 : index
    %c0_0 = arith.constant 0 : index
    %0 = vector.load %arg1[%c0, %c0_0] : memref<8x72xbf16, #tpu.memory_space<vmem>>, vector<8x72xbf16>
    %c0_1 = arith.constant 0 : index
    %c0_2 = arith.constant 0 : index
    %1 = vector.load %arg2[%c0_1, %c0_2] : memref<72x8xbf16, #tpu.memory_space<vmem>>, vector<72x8xbf16>
    %cst = arith.constant dense<0.000000e+00> : vector<8x8xf32>
    %2 = tpu.matmul %0, %1, %cst {dimension_numbers = #tpu.dot_dimension_numbers<[1], [0], [0], [1], [0, 0, 1, 1], [], []>} : vector<8x72xbf16>, vector<72x8xbf16>, vector<8x8xf32> -> vector<8x8xf32>
    %c0_3 = arith.constant 0 : index
    %c0_4 = arith.constant 0 : index
    %3 = vector.load %arg3[%c0_3, %c0_4] : memref<8x1xf32, #tpu.memory_space<vmem>>, vector<8x1xf32>
    %4 = vector.broadcast %3 : vector<8x1xf32> to vector<8x8xf32>
    %5 = arith.addf %2, %4 : vector<8x8xf32>
    %cst_5 = arith.constant 0.000000e+00 : f32
    %6 = vector.broadcast %cst_5 : f32 to vector<8x8xf32>
    %7 = arith.maximumf %5, %6 : vector<8x8xf32>
    %c0_6 = arith.constant 0 : index
    %c0_7 = arith.constant 0 : index
    %8 = vector.load %arg4[%c0_6, %c0_7] : memref<8x8xbf16, #tpu.memory_space<vmem>>, vector<8x8xbf16>
    %9 = arith.truncf %7 : vector<8x8xf32> to vector<8x8xbf16>
    %cst_8 = arith.constant dense<0.000000e+00> : vector<8x8xf32>
    %10 = tpu.matmul %8, %9, %cst_8 {dimension_numbers = #tpu.dot_dimension_numbers<[1], [0], [0], [1], [0, 0, 1, 1], [], []>} : vector<8x8xbf16>, vector<8x8xbf16>, vector<8x8xf32> -> vector<8x8xf32>
    %c0_9 = arith.constant 0 : index
    %c0_10 = arith.constant 0 : index
    %11 = vector.load %arg5[%c0_9, %c0_10] : memref<8x1xf32, #tpu.memory_space<vmem>>, vector<8x1xf32>
    %12 = vector.broadcast %11 : vector<8x1xf32> to vector<8x8xf32>
    %13 = arith.addf %10, %12 : vector<8x8xf32>
    %c0_11 = arith.constant 0 : index
    %c0_12 = arith.constant 0 : index
    %14 = vector.load %arg6[%c0_11, %c0_12] : memref<8x8xbf16, #tpu.memory_space<vmem>>, vector<8x8xbf16>
    %15 = arith.extf %14 : vector<8x8xbf16> to vector<8x8xf32>
    %16 = arith.addf %13, %15 : vector<8x8xf32>
    %17 = arith.truncf %16 : vector<8x8xf32> to vector<8x8xbf16>
    %c0_13 = arith.constant 0 : index
    %c0_14 = arith.constant 0 : index
    %18 = vector.load %arg7[%c0_13, %c0_14] : memref<8x8xbf16, #tpu.memory_space<vmem>>, vector<8x8xbf16>
    tpu.vector_store %arg7[%c0_13, %c0_14], %17 {strides = array<i32>} : memref<8x8xbf16, #tpu.memory_space<vmem>>, vector<8x8xbf16>,
    return
  }
  func.func @transform_0(%arg0: i32) -> (i32, i32) {
    %c0_i32 = arith.constant 0 : i32
    %c0_i32_0 = arith.constant 0 : i32
    %c0_i32_1 = arith.constant 0 : i32
    return %c0_i32, %c0_i32_0 : i32, i32
  }
  func.func @transform_1(%arg0: i32) -> (i32, i32) {
    %c0_i32 = arith.constant 0 : i32
    %c0_i32_0 = arith.constant 0 : i32
    return %c0_i32, %arg0 : i32, i32
  }
  func.func @transform_2(%arg0: i32) -> (i32, i32) {
    %c0_i32 = arith.constant 0 : i32
    %c0_i32_0 = arith.constant 0 : i32
    %c0_i32_1 = arith.constant 0 : i32
    return %c0_i32, %c0_i32_0 : i32, i32
  }
  func.func @transform_3(%arg0: i32) -> (i32, i32) {
    %c0_i32 = arith.constant 0 : i32
    %c0_i32_0 = arith.constant 0 : i32
    %c0_i32_1 = arith.constant 0 : i32
    return %c0_i32, %c0_i32_0 : i32, i32
  }
  func.func @transform_4(%arg0: i32) -> (i32, i32) {
    %c0_i32 = arith.constant 0 : i32
    %c0_i32_0 = arith.constant 0 : i32
    %c0_i32_1 = arith.constant 0 : i32
    return %c0_i32, %c0_i32_0 : i32, i32
  }
  func.func @transform_5(%arg0: i32) -> (i32, i32) {
    %c0_i32 = arith.constant 0 : i32
    %c0_i32_0 = arith.constant 0 : i32
    return %c0_i32, %arg0 : i32, i32
  }
  func.func @transform_6(%arg0: i32) -> (i32, i32) {
    %c0_i32 = arith.constant 0 : i32
    %c0_i32_0 = arith.constant 0 : i32
    return %c0_i32, %arg0 : i32, i32
  }
}

module attributes {stable_mosaic.version = 11 : i64} {
  func.func @_wxt_kernel(%arg0: i32, %arg1: memref<4x8xbf16, #tpu.memory_space<vmem>>, %arg2: memref<8x8xbf16, #tpu.memory_space<vmem>>, %arg3: memref<4x1xf32, #tpu.memory_space<vmem>>, %arg4: memref<4x8xbf16, #tpu.memory_space<vmem>>) attributes {dimension_semantics = [#tpu.dimension_semantics<parallel>], iteration_bounds = array<i64: 1>, scalar_prefetch = 0 : i64, scratch_operands = 0 : i64, tpu.core_type = #tpu.core_type<tc>, window_params = [{pipeline_mode = #tpu.pipeline_mode<synchronous>, transform_indices = @transform_0, window_bounds = array<i64: 4, 8>}, {transform_indices = @transform_1, window_bounds = array<i64: 8, 8>}, {pipeline_mode = #tpu.pipeline_mode<synchronous>, transform_indices = @transform_2, window_bounds = array<i64: 4, 1>}, {transform_indices = @transform_3, window_bounds = array<i64: 4, 8>}]} {
    %c0 = arith.constant 0 : index
    %c0_0 = arith.constant 0 : index
    %0 = vector.load %arg1[%c0, %c0_0] : memref<4x8xbf16, #tpu.memory_space<vmem>>, vector<4x8xbf16>
    %c0_1 = arith.constant 0 : index
    %c0_2 = arith.constant 0 : index
    %1 = vector.load %arg2[%c0_1, %c0_2] : memref<8x8xbf16, #tpu.memory_space<vmem>>, vector<8x8xbf16>
    %cst = arith.constant dense<0.000000e+00> : vector<4x8xf32>
    %2 = tpu.matmul %0, %1, %cst {dimension_numbers = #tpu.dot_dimension_numbers<[1], [0], [0], [1], [0, 0, 1, 1], [], []>} : vector<4x8xbf16>, vector<8x8xbf16>, vector<4x8xf32> -> vector<4x8xf32>
    %c0_3 = arith.constant 0 : index
    %c0_4 = arith.constant 0 : index
    %3 = vector.load %arg3[%c0_3, %c0_4] : memref<4x1xf32, #tpu.memory_space<vmem>>, vector<4x1xf32>
    %4 = vector.broadcast %3 : vector<4x1xf32> to vector<4x8xf32>
    %5 = arith.addf %2, %4 : vector<4x8xf32>
    %6 = arith.truncf %5 : vector<4x8xf32> to vector<4x8xbf16>
    %c0_5 = arith.constant 0 : index
    %c0_6 = arith.constant 0 : index
    %7 = vector.load %arg4[%c0_5, %c0_6] : memref<4x8xbf16, #tpu.memory_space<vmem>>, vector<4x8xbf16>
    tpu.vector_store %arg4[%c0_5, %c0_6], %6 {strides = array<i32>} : memref<4x8xbf16, #tpu.memory_space<vmem>>, vector<4x8xbf16>,
    return
  }
  func.func @transform_0(%arg0: i32) -> (i32, i32) {
    %c0_i32 = arith.constant 0 : i32
    %c0_i32_0 = arith.constant 0 : i32
    %c0_i32_1 = arith.constant 0 : i32
    return %c0_i32, %c0_i32_0 : i32, i32
  }
  func.func @transform_1(%arg0: i32) -> (i32, i32) {
    %c0_i32 = arith.constant 0 : i32
    %c0_i32_0 = arith.constant 0 : i32
    return %c0_i32, %arg0 : i32, i32
  }
  func.func @transform_2(%arg0: i32) -> (i32, i32) {
    %c0_i32 = arith.constant 0 : i32
    %c0_i32_0 = arith.constant 0 : i32
    %c0_i32_1 = arith.constant 0 : i32
    return %c0_i32, %c0_i32_0 : i32, i32
  }
  func.func @transform_3(%arg0: i32) -> (i32, i32) {
    %c0_i32 = arith.constant 0 : i32
    %c0_i32_0 = arith.constant 0 : i32
    return %c0_i32, %arg0 : i32, i32
  }
}

module attributes {stable_mosaic.version = 11 : i64} {
  func.func @_vq_kernel_t(%arg0: i32, %arg1: memref<4x8xbf16, #tpu.memory_space<vmem>>, %arg2: memref<32x4xbf16, #tpu.memory_space<vmem>>, %arg3: memref<4x8xbf16, #tpu.memory_space<vmem>>, %arg4: memref<1x1xf32, #tpu.memory_space<vmem>>) attributes {dimension_semantics = [#tpu.dimension_semantics<arbitrary>], iteration_bounds = array<i64: 1>, scalar_prefetch = 0 : i64, scratch_operands = 0 : i64, tpu.core_type = #tpu.core_type<tc>, window_params = [{transform_indices = @transform_0, window_bounds = array<i64: 4, 8>}, {pipeline_mode = #tpu.pipeline_mode<synchronous>, transform_indices = @transform_1, window_bounds = array<i64: 32, 4>}, {transform_indices = @transform_2, window_bounds = array<i64: 4, 8>}, {pipeline_mode = #tpu.pipeline_mode<synchronous>, transform_indices = @transform_3, window_bounds = array<i64: 1, 1>}]} {
    %c0_i32 = arith.constant 0 : i32
    %0 = arith.cmpi eq, %arg0, %c0_i32 : i32
    %1 = arith.extui %0 : i1 to i32
    %c0_i32_0 = arith.constant 0 : i32
    %2 = arith.cmpi ne, %1, %c0_i32_0 : i32
    scf.if %2 {
      %cst_19 = arith.constant 0.000000e+00 : f32
      %55 = vector.broadcast %cst_19 : f32 to vector<1x1xf32>
      %c0_20 = arith.constant 0 : index
      %c0_21 = arith.constant 0 : index
      %56 = vector.load %arg4[%c0_20, %c0_21] : memref<1x1xf32, #tpu.memory_space<vmem>>, vector<1x1xf32>
      tpu.vector_store %arg4[%c0_20, %c0_21], %55 {strides = array<i32>} : memref<1x1xf32, #tpu.memory_space<vmem>>, vector<1x1xf32>,
    } else {
    }
    %c0 = arith.constant 0 : index
    %c0_1 = arith.constant 0 : index
    %3 = vector.load %arg1[%c0, %c0_1] : memref<4x8xbf16, #tpu.memory_space<vmem>>, vector<4x8xbf16>
    %c0_2 = arith.constant 0 : index
    %c0_3 = arith.constant 0 : index
    %4 = vector.load %arg2[%c0_2, %c0_3] : memref<32x4xbf16, #tpu.memory_space<vmem>>, vector<32x4xbf16>
    %5 = arith.extf %3 : vector<4x8xbf16> to vector<4x8xf32>
    %6 = arith.extf %4 : vector<32x4xbf16> to vector<32x4xf32>
    %7 = arith.mulf %5, %5 : vector<4x8xf32>
    %cst = arith.constant dense<0.000000e+00> : vector<8xf32>
    %8 = vector.multi_reduction <add>, %7, %cst [0] : vector<4x8xf32> to vector<8xf32>
    %9 = vector.shape_cast %8 : vector<8xf32> to vector<1x8xf32>
    %10 = arith.mulf %6, %6 : vector<32x4xf32>
    %cst_4 = arith.constant dense<0.000000e+00> : vector<32xf32>
    %11 = vector.multi_reduction <add>, %10, %cst_4 [1] : vector<32x4xf32> to vector<32xf32>
    %12 = vector.shape_cast %11 : vector<32xf32> to vector<32x1xf32>
    %cst_5 = arith.constant dense<0.000000e+00> : vector<32x8xf32>
    %13 = tpu.matmul %4, %3, %cst_5 {dimension_numbers = #tpu.dot_dimension_numbers<[1], [0], [0], [1], [0, 0, 1, 1], [], []>} : vector<32x4xbf16>, vector<4x8xbf16>, vector<32x8xf32> -> vector<32x8xf32>
    %cst_6 = arith.constant 2.000000e+00 : f32
    %14 = vector.broadcast %cst_6 : f32 to vector<32x8xf32>
    %15 = arith.mulf %14, %13 : vector<32x8xf32>
    %16 = vector.broadcast %12 : vector<32x1xf32> to vector<32x8xf32>
    %17 = arith.subf %16, %15 : vector<32x8xf32>
    %18 = vector.broadcast %9 : vector<1x8xf32> to vector<32x8xf32>
    %19 = arith.addf %17, %18 : vector<32x8xf32>
    %20 = tpu.iota {dimensions = array<i32: 0>} : vector<32x8xi32>
    %cst_7 = arith.constant dense<0x7F800000> : vector<8xf32>
    %21 = vector.multi_reduction <minimumf>, %19, %cst_7 [0] : vector<32x8xf32> to vector<8xf32>
    %22 = vector.shape_cast %21 : vector<8xf32> to vector<1x8xf32>
    %23 = vector.broadcast %22 : vector<1x8xf32> to vector<32x8xf32>
    %24 = arith.cmpf ole, %19, %23 : vector<32x8xf32>
    %c1073741824_i32 = arith.constant 1073741824 : i32
    %25 = vector.broadcast %c1073741824_i32 : i32 to vector<32x8xi32>
    %26 = arith.select %24, %20, %25 : vector<32x8xi1>, vector<32x8xi32>
    %cst_8 = arith.constant dense<2147483647> : vector<8xi32>
    %27 = vector.multi_reduction <minsi>, %26, %cst_8 [0] : vector<32x8xi32> to vector<8xi32>
    %28 = vector.shape_cast %27 : vector<8xi32> to vector<1x8xi32>
    %29 = vector.broadcast %28 : vector<1x8xi32> to vector<32x8xi32>
    %30 = arith.cmpi eq, %20, %29 : vector<32x8xi32>
    %31 = arith.extui %30 : vector<32x8xi1> to vector<32x8xi32>
    %32 = arith.sitofp %31 : vector<32x8xi32> to vector<32x8xf32>
    %33 = arith.truncf %32 : vector<32x8xf32> to vector<32x8xbf16>
    %cst_9 = arith.constant dense<0.000000e+00> : vector<4x8xf32>
    %34 = tpu.matmul %4, %33, %cst_9 {dimension_numbers = #tpu.dot_dimension_numbers<[0], [0], [1], [1], [0, 1, 1, 1], [], []>} : vector<32x4xbf16>, vector<32x8xbf16>, vector<4x8xf32> -> vector<4x8xf32>
    %35 = arith.truncf %34 : vector<4x8xf32> to vector<4x8xbf16>
    %c0_10 = arith.constant 0 : index
    %c0_11 = arith.constant 0 : index
    %36 = vector.load %arg3[%c0_10, %c0_11] : memref<4x8xbf16, #tpu.memory_space<vmem>>, vector<4x8xbf16>
    tpu.vector_store %arg3[%c0_10, %c0_11], %35 {strides = array<i32>} : memref<4x8xbf16, #tpu.memory_space<vmem>>, vector<4x8xbf16>,
    %c8_i32 = arith.constant 8 : i32
    %37 = arith.muli %arg0, %c8_i32 : i32
    %38 = tpu.iota {dimensions = array<i32: 1>} : vector<4x8xi32>
    %39 = vector.broadcast %37 : i32 to vector<4x8xi32>
    %40 = arith.addi %39, %38 : vector<4x8xi32>
    %41 = arith.subf %34, %5 : vector<4x8xf32>
    %c8_i32_12 = arith.constant 8 : i32
    %42 = vector.broadcast %c8_i32_12 : i32 to vector<4x8xi32>
    %43 = arith.cmpi slt, %40, %42 : vector<4x8xi32>
    %44 = arith.mulf %41, %41 : vector<4x8xf32>
    %cst_13 = arith.constant 0.000000e+00 : f32
    %45 = vector.broadcast %cst_13 : f32 to vector<4x8xf32>
    %46 = arith.select %43, %44, %45 : vector<4x8xi1>, vector<4x8xf32>
    %c0_14 = arith.constant 0 : index
    %c0_15 = arith.constant 0 : index
    %47 = vector.load %arg4[%c0_14, %c0_15] : memref<1x1xf32, #tpu.memory_space<vmem>>, vector<1x1xf32>
    %48 = vector.shape_cast %46 : vector<4x8xf32> to vector<1x4x8xf32>
    %cst_16 = arith.constant dense<0.000000e+00> : vector<1xf32>
    %49 = vector.multi_reduction <add>, %48, %cst_16 [1, 2] : vector<1x4x8xf32> to vector<1xf32>
    %50 = vector.shape_cast %49 : vector<1xf32> to vector<1x1x1xf32>
    %51 = vector.extract %50[0, 0, 0] : f32 from vector<1x1x1xf32>
    %52 = vector.broadcast %51 : f32 to vector<1x1xf32>
    %53 = arith.addf %47, %52 : vector<1x1xf32>
    %c0_17 = arith.constant 0 : index
    %c0_18 = arith.constant 0 : index
    %54 = vector.load %arg4[%c0_17, %c0_18] : memref<1x1xf32, #tpu.memory_space<vmem>>, vector<1x1xf32>
    tpu.vector_store %arg4[%c0_17, %c0_18], %53 {strides = array<i32>} : memref<1x1xf32, #tpu.memory_space<vmem>>, vector<1x1xf32>,
    return
  }
  func.func @transform_0(%arg0: i32) -> (i32, i32) {
    %c0_i32 = arith.constant 0 : i32
    %c0_i32_0 = arith.constant 0 : i32
    return %c0_i32, %arg0 : i32, i32
  }
  func.func @transform_1(%arg0: i32) -> (i32, i32) {
    %c0_i32 = arith.constant 0 : i32
    %c0_i32_0 = arith.constant 0 : i32
    %c0_i32_1 = arith.constant 0 : i32
    return %c0_i32, %c0_i32_0 : i32, i32
  }
  func.func @transform_2(%arg0: i32) -> (i32, i32) {
    %c0_i32 = arith.constant 0 : i32
    %c0_i32_0 = arith.constant 0 : i32
    return %c0_i32, %arg0 : i32, i32
  }
  func.func @transform_3(%arg0: i32) -> (i32, i32) {
    %c0_i32 = arith.constant 0 : i32
    %c0_i32_0 = arith.constant 0 : i32
    %c0_i32_1 = arith.constant 0 : i32
    return %c0_i32, %c0_i32_0 : i32, i32
  }
}

module attributes {stable_mosaic.version = 11 : i64} {
  func.func @_resblock_kernel(%arg0: i32, %arg1: memref<4x36xbf16, #tpu.memory_space<vmem>>, %arg2: memref<36x8xbf16, #tpu.memory_space<vmem>>, %arg3: memref<4x1xf32, #tpu.memory_space<vmem>>, %arg4: memref<4x4xbf16, #tpu.memory_space<vmem>>, %arg5: memref<4x1xf32, #tpu.memory_space<vmem>>, %arg6: memref<4x8xbf16, #tpu.memory_space<vmem>>, %arg7: memref<4x8xbf16, #tpu.memory_space<vmem>>) attributes {dimension_semantics = [#tpu.dimension_semantics<parallel>], iteration_bounds = array<i64: 1>, scalar_prefetch = 0 : i64, scratch_operands = 0 : i64, tpu.core_type = #tpu.core_type<tc>, window_params = [{pipeline_mode = #tpu.pipeline_mode<synchronous>, transform_indices = @transform_0, window_bounds = array<i64: 4, 36>}, {transform_indices = @transform_1, window_bounds = array<i64: 36, 8>}, {pipeline_mode = #tpu.pipeline_mode<synchronous>, transform_indices = @transform_2, window_bounds = array<i64: 4, 1>}, {pipeline_mode = #tpu.pipeline_mode<synchronous>, transform_indices = @transform_3, window_bounds = array<i64: 4, 4>}, {pipeline_mode = #tpu.pipeline_mode<synchronous>, transform_indices = @transform_4, window_bounds = array<i64: 4, 1>}, {transform_indices = @transform_5, window_bounds = array<i64: 4, 8>}, {transform_indices = @transform_6, window_bounds = array<i64: 4, 8>}]} {
    %c0 = arith.constant 0 : index
    %c0_0 = arith.constant 0 : index
    %0 = vector.load %arg1[%c0, %c0_0] : memref<4x36xbf16, #tpu.memory_space<vmem>>, vector<4x36xbf16>
    %c0_1 = arith.constant 0 : index
    %c0_2 = arith.constant 0 : index
    %1 = vector.load %arg2[%c0_1, %c0_2] : memref<36x8xbf16, #tpu.memory_space<vmem>>, vector<36x8xbf16>
    %cst = arith.constant dense<0.000000e+00> : vector<4x8xf32>
    %2 = tpu.matmul %0, %1, %cst {dimension_numbers = #tpu.dot_dimension_numbers<[1], [0], [0], [1], [0, 0, 1, 1], [], []>} : vector<4x36xbf16>, vector<36x8xbf16>, vector<4x8xf32> -> vector<4x8xf32>
    %c0_3 = arith.constant 0 : index
    %c0_4 = arith.constant 0 : index
    %3 = vector.load %arg3[%c0_3, %c0_4] : memref<4x1xf32, #tpu.memory_space<vmem>>, vector<4x1xf32>
    %4 = vector.broadcast %3 : vector<4x1xf32> to vector<4x8xf32>
    %5 = arith.addf %2, %4 : vector<4x8xf32>
    %cst_5 = arith.constant 0.000000e+00 : f32
    %6 = vector.broadcast %cst_5 : f32 to vector<4x8xf32>
    %7 = arith.maximumf %5, %6 : vector<4x8xf32>
    %c0_6 = arith.constant 0 : index
    %c0_7 = arith.constant 0 : index
    %8 = vector.load %arg4[%c0_6, %c0_7] : memref<4x4xbf16, #tpu.memory_space<vmem>>, vector<4x4xbf16>
    %9 = arith.truncf %7 : vector<4x8xf32> to vector<4x8xbf16>
    %cst_8 = arith.constant dense<0.000000e+00> : vector<4x8xf32>
    %10 = tpu.matmul %8, %9, %cst_8 {dimension_numbers = #tpu.dot_dimension_numbers<[1], [0], [0], [1], [0, 0, 1, 1], [], []>} : vector<4x4xbf16>, vector<4x8xbf16>, vector<4x8xf32> -> vector<4x8xf32>
    %c0_9 = arith.constant 0 : index
    %c0_10 = arith.constant 0 : index
    %11 = vector.load %arg5[%c0_9, %c0_10] : memref<4x1xf32, #tpu.memory_space<vmem>>, vector<4x1xf32>
    %12 = vector.broadcast %11 : vector<4x1xf32> to vector<4x8xf32>
    %13 = arith.addf %10, %12 : vector<4x8xf32>
    %c0_11 = arith.constant 0 : index
    %c0_12 = arith.constant 0 : index
    %14 = vector.load %arg6[%c0_11, %c0_12] : memref<4x8xbf16, #tpu.memory_space<vmem>>, vector<4x8xbf16>
    %15 = arith.extf %14 : vector<4x8xbf16> to vector<4x8xf32>
    %16 = arith.addf %13, %15 : vector<4x8xf32>
    %17 = arith.truncf %16 : vector<4x8xf32> to vector<4x8xbf16>
    %c0_13 = arith.constant 0 : index
    %c0_14 = arith.constant 0 : index
    %18 = vector.load %arg7[%c0_13, %c0_14] : memref<4x8xbf16, #tpu.memory_space<vmem>>, vector<4x8xbf16>
    tpu.vector_store %arg7[%c0_13, %c0_14], %17 {strides = array<i32>} : memref<4x8xbf16, #tpu.memory_space<vmem>>, vector<4x8xbf16>,
    return
  }
  func.func @transform_0(%arg0: i32) -> (i32, i32) {
    %c0_i32 = arith.constant 0 : i32
    %c0_i32_0 = arith.constant 0 : i32
    %c0_i32_1 = arith.constant 0 : i32
    return %c0_i32, %c0_i32_0 : i32, i32
  }
  func.func @transform_1(%arg0: i32) -> (i32, i32) {
    %c0_i32 = arith.constant 0 : i32
    %c0_i32_0 = arith.constant 0 : i32
    return %c0_i32, %arg0 : i32, i32
  }
  func.func @transform_2(%arg0: i32) -> (i32, i32) {
    %c0_i32 = arith.constant 0 : i32
    %c0_i32_0 = arith.constant 0 : i32
    %c0_i32_1 = arith.constant 0 : i32
    return %c0_i32, %c0_i32_0 : i32, i32
  }
  func.func @transform_3(%arg0: i32) -> (i32, i32) {
    %c0_i32 = arith.constant 0 : i32
    %c0_i32_0 = arith.constant 0 : i32
    %c0_i32_1 = arith.constant 0 : i32
    return %c0_i32, %c0_i32_0 : i32, i32
  }
  func.func @transform_4(%arg0: i32) -> (i32, i32) {
    %c0_i32 = arith.constant 0 : i32
    %c0_i32_0 = arith.constant 0 : i32
    %c0_i32_1 = arith.constant 0 : i32
    return %c0_i32, %c0_i32_0 : i32, i32
  }
  func.func @transform_5(%arg0: i32) -> (i32, i32) {
    %c0_i32 = arith.constant 0 : i32
    %c0_i32_0 = arith.constant 0 : i32
    return %c0_i32, %arg0 : i32, i32
  }
  func.func @transform_6(%arg0: i32) -> (i32, i32) {
    %c0_i32 = arith.constant 0 : i32
    %c0_i32_0 = arith.constant 0 : i32
    return %c0_i32, %arg0 : i32, i32
  }
}

module attributes {stable_mosaic.version = 11 : i64} {
  func.func @_wxt_kernel(%arg0: i32, %arg1: memref<4x36xbf16, #tpu.memory_space<vmem>>, %arg2: memref<36x32xbf16, #tpu.memory_space<vmem>>, %arg3: memref<4x1xf32, #tpu.memory_space<vmem>>, %arg4: memref<4x32xbf16, #tpu.memory_space<vmem>>) attributes {dimension_semantics = [#tpu.dimension_semantics<parallel>], iteration_bounds = array<i64: 1>, scalar_prefetch = 0 : i64, scratch_operands = 0 : i64, tpu.core_type = #tpu.core_type<tc>, window_params = [{pipeline_mode = #tpu.pipeline_mode<synchronous>, transform_indices = @transform_0, window_bounds = array<i64: 4, 36>}, {transform_indices = @transform_1, window_bounds = array<i64: 36, 32>}, {pipeline_mode = #tpu.pipeline_mode<synchronous>, transform_indices = @transform_2, window_bounds = array<i64: 4, 1>}, {transform_indices = @transform_3, window_bounds = array<i64: 4, 32>}]} {
    %c0 = arith.constant 0 : index
    %c0_0 = arith.constant 0 : index
    %0 = vector.load %arg1[%c0, %c0_0] : memref<4x36xbf16, #tpu.memory_space<vmem>>, vector<4x36xbf16>
    %c0_1 = arith.constant 0 : index
    %c0_2 = arith.constant 0 : index
    %1 = vector.load %arg2[%c0_1, %c0_2] : memref<36x32xbf16, #tpu.memory_space<vmem>>, vector<36x32xbf16>
    %cst = arith.constant dense<0.000000e+00> : vector<4x32xf32>
    %2 = tpu.matmul %0, %1, %cst {dimension_numbers = #tpu.dot_dimension_numbers<[1], [0], [0], [1], [0, 0, 1, 1], [], []>} : vector<4x36xbf16>, vector<36x32xbf16>, vector<4x32xf32> -> vector<4x32xf32>
    %c0_3 = arith.constant 0 : index
    %c0_4 = arith.constant 0 : index
    %3 = vector.load %arg3[%c0_3, %c0_4] : memref<4x1xf32, #tpu.memory_space<vmem>>, vector<4x1xf32>
    %4 = vector.broadcast %3 : vector<4x1xf32> to vector<4x32xf32>
    %5 = arith.addf %2, %4 : vector<4x32xf32>
    %6 = arith.truncf %5 : vector<4x32xf32> to vector<4x32xbf16>
    %c0_5 = arith.constant 0 : index
    %c0_6 = arith.constant 0 : index
    %7 = vector.load %arg4[%c0_5, %c0_6] : memref<4x32xbf16, #tpu.memory_space<vmem>>, vector<4x32xbf16>
    tpu.vector_store %arg4[%c0_5, %c0_6], %6 {strides = array<i32>} : memref<4x32xbf16, #tpu.memory_space<vmem>>, vector<4x32xbf16>,
    return
  }
  func.func @transform_0(%arg0: i32) -> (i32, i32) {
    %c0_i32 = arith.constant 0 : i32
    %c0_i32_0 = arith.constant 0 : i32
    %c0_i32_1 = arith.constant 0 : i32
    return %c0_i32, %c0_i32_0 : i32, i32
  }
  func.func @transform_1(%arg0: i32) -> (i32, i32) {
    %c0_i32 = arith.constant 0 : i32
    %c0_i32_0 = arith.constant 0 : i32
    return %c0_i32, %arg0 : i32, i32
  }
  func.func @transform_2(%arg0: i32) -> (i32, i32) {
    %c0_i32 = arith.constant 0 : i32
    %c0_i32_0 = arith.constant 0 : i32
    %c0_i32_1 = arith.constant 0 : i32
    return %c0_i32, %c0_i32_0 : i32, i32
  }
  func.func @transform_3(%arg0: i32) -> (i32, i32) {
    %c0_i32 = arith.constant 0 : i32
    %c0_i32_0 = arith.constant 0 : i32
    return %c0_i32, %arg0 : i32, i32
  }
}

module attributes {stable_mosaic.version = 11 : i64} {
  func.func @_wxt_kernel(%arg0: i32, %arg1: memref<4x8xbf16, #tpu.memory_space<vmem>>, %arg2: memref<8x32xbf16, #tpu.memory_space<vmem>>, %arg3: memref<4x1xf32, #tpu.memory_space<vmem>>, %arg4: memref<4x32xbf16, #tpu.memory_space<vmem>>) attributes {dimension_semantics = [#tpu.dimension_semantics<parallel>], iteration_bounds = array<i64: 1>, scalar_prefetch = 0 : i64, scratch_operands = 0 : i64, tpu.core_type = #tpu.core_type<tc>, window_params = [{pipeline_mode = #tpu.pipeline_mode<synchronous>, transform_indices = @transform_0, window_bounds = array<i64: 4, 8>}, {transform_indices = @transform_1, window_bounds = array<i64: 8, 32>}, {pipeline_mode = #tpu.pipeline_mode<synchronous>, transform_indices = @transform_2, window_bounds = array<i64: 4, 1>}, {transform_indices = @transform_3, window_bounds = array<i64: 4, 32>}]} {
    %c0 = arith.constant 0 : index
    %c0_0 = arith.constant 0 : index
    %0 = vector.load %arg1[%c0, %c0_0] : memref<4x8xbf16, #tpu.memory_space<vmem>>, vector<4x8xbf16>
    %c0_1 = arith.constant 0 : index
    %c0_2 = arith.constant 0 : index
    %1 = vector.load %arg2[%c0_1, %c0_2] : memref<8x32xbf16, #tpu.memory_space<vmem>>, vector<8x32xbf16>
    %cst = arith.constant dense<0.000000e+00> : vector<4x32xf32>
    %2 = tpu.matmul %0, %1, %cst {dimension_numbers = #tpu.dot_dimension_numbers<[1], [0], [0], [1], [0, 0, 1, 1], [], []>} : vector<4x8xbf16>, vector<8x32xbf16>, vector<4x32xf32> -> vector<4x32xf32>
    %c0_3 = arith.constant 0 : index
    %c0_4 = arith.constant 0 : index
    %3 = vector.load %arg3[%c0_3, %c0_4] : memref<4x1xf32, #tpu.memory_space<vmem>>, vector<4x1xf32>
    %4 = vector.broadcast %3 : vector<4x1xf32> to vector<4x32xf32>
    %5 = arith.addf %2, %4 : vector<4x32xf32>
    %6 = arith.truncf %5 : vector<4x32xf32> to vector<4x32xbf16>
    %c0_5 = arith.constant 0 : index
    %c0_6 = arith.constant 0 : index
    %7 = vector.load %arg4[%c0_5, %c0_6] : memref<4x32xbf16, #tpu.memory_space<vmem>>, vector<4x32xbf16>
    tpu.vector_store %arg4[%c0_5, %c0_6], %6 {strides = array<i32>} : memref<4x32xbf16, #tpu.memory_space<vmem>>, vector<4x32xbf16>,
    return
  }
  func.func @transform_0(%arg0: i32) -> (i32, i32) {
    %c0_i32 = arith.constant 0 : i32
    %c0_i32_0 = arith.constant 0 : i32
    %c0_i32_1 = arith.constant 0 : i32
    return %c0_i32, %c0_i32_0 : i32, i32
  }
  func.func @transform_1(%arg0: i32) -> (i32, i32) {
    %c0_i32 = arith.constant 0 : i32
    %c0_i32_0 = arith.constant 0 : i32
    return %c0_i32, %arg0 : i32, i32
  }
  func.func @transform_2(%arg0: i32) -> (i32, i32) {
    %c0_i32 = arith.constant 0 : i32
    %c0_i32_0 = arith.constant 0 : i32
    %c0_i32_1 = arith.constant 0 : i32
    return %c0_i32, %c0_i32_0 : i32, i32
  }
  func.func @transform_3(%arg0: i32) -> (i32, i32) {
    %c0_i32 = arith.constant 0 : i32
    %c0_i32_0 = arith.constant 0 : i32
    return %c0_i32, %arg0 : i32, i32
  }
}

module attributes {stable_mosaic.version = 11 : i64} {
  func.func @_vq_kernel_t(%arg0: i32, %arg1: memref<8x32xbf16, #tpu.memory_space<vmem>>, %arg2: memref<32x8xbf16, #tpu.memory_space<vmem>>, %arg3: memref<8x32xbf16, #tpu.memory_space<vmem>>, %arg4: memref<1x1xf32, #tpu.memory_space<vmem>>) attributes {dimension_semantics = [#tpu.dimension_semantics<arbitrary>], iteration_bounds = array<i64: 1>, scalar_prefetch = 0 : i64, scratch_operands = 0 : i64, tpu.core_type = #tpu.core_type<tc>, window_params = [{transform_indices = @transform_0, window_bounds = array<i64: 8, 32>}, {pipeline_mode = #tpu.pipeline_mode<synchronous>, transform_indices = @transform_1, window_bounds = array<i64: 32, 8>}, {transform_indices = @transform_2, window_bounds = array<i64: 8, 32>}, {pipeline_mode = #tpu.pipeline_mode<synchronous>, transform_indices = @transform_3, window_bounds = array<i64: 1, 1>}]} {
    %c0_i32 = arith.constant 0 : i32
    %0 = arith.cmpi eq, %arg0, %c0_i32 : i32
    %1 = arith.extui %0 : i1 to i32
    %c0_i32_0 = arith.constant 0 : i32
    %2 = arith.cmpi ne, %1, %c0_i32_0 : i32
    scf.if %2 {
      %cst_19 = arith.constant 0.000000e+00 : f32
      %55 = vector.broadcast %cst_19 : f32 to vector<1x1xf32>
      %c0_20 = arith.constant 0 : index
      %c0_21 = arith.constant 0 : index
      %56 = vector.load %arg4[%c0_20, %c0_21] : memref<1x1xf32, #tpu.memory_space<vmem>>, vector<1x1xf32>
      tpu.vector_store %arg4[%c0_20, %c0_21], %55 {strides = array<i32>} : memref<1x1xf32, #tpu.memory_space<vmem>>, vector<1x1xf32>,
    } else {
    }
    %c0 = arith.constant 0 : index
    %c0_1 = arith.constant 0 : index
    %3 = vector.load %arg1[%c0, %c0_1] : memref<8x32xbf16, #tpu.memory_space<vmem>>, vector<8x32xbf16>
    %c0_2 = arith.constant 0 : index
    %c0_3 = arith.constant 0 : index
    %4 = vector.load %arg2[%c0_2, %c0_3] : memref<32x8xbf16, #tpu.memory_space<vmem>>, vector<32x8xbf16>
    %5 = arith.extf %3 : vector<8x32xbf16> to vector<8x32xf32>
    %6 = arith.extf %4 : vector<32x8xbf16> to vector<32x8xf32>
    %7 = arith.mulf %5, %5 : vector<8x32xf32>
    %cst = arith.constant dense<0.000000e+00> : vector<32xf32>
    %8 = vector.multi_reduction <add>, %7, %cst [0] : vector<8x32xf32> to vector<32xf32>
    %9 = vector.shape_cast %8 : vector<32xf32> to vector<1x32xf32>
    %10 = arith.mulf %6, %6 : vector<32x8xf32>
    %cst_4 = arith.constant dense<0.000000e+00> : vector<32xf32>
    %11 = vector.multi_reduction <add>, %10, %cst_4 [1] : vector<32x8xf32> to vector<32xf32>
    %12 = vector.shape_cast %11 : vector<32xf32> to vector<32x1xf32>
    %cst_5 = arith.constant dense<0.000000e+00> : vector<32x32xf32>
    %13 = tpu.matmul %4, %3, %cst_5 {dimension_numbers = #tpu.dot_dimension_numbers<[1], [0], [0], [1], [0, 0, 1, 1], [], []>} : vector<32x8xbf16>, vector<8x32xbf16>, vector<32x32xf32> -> vector<32x32xf32>
    %cst_6 = arith.constant 2.000000e+00 : f32
    %14 = vector.broadcast %cst_6 : f32 to vector<32x32xf32>
    %15 = arith.mulf %14, %13 : vector<32x32xf32>
    %16 = vector.broadcast %12 : vector<32x1xf32> to vector<32x32xf32>
    %17 = arith.subf %16, %15 : vector<32x32xf32>
    %18 = vector.broadcast %9 : vector<1x32xf32> to vector<32x32xf32>
    %19 = arith.addf %17, %18 : vector<32x32xf32>
    %20 = tpu.iota {dimensions = array<i32: 0>} : vector<32x32xi32>
    %cst_7 = arith.constant dense<0x7F800000> : vector<32xf32>
    %21 = vector.multi_reduction <minimumf>, %19, %cst_7 [0] : vector<32x32xf32> to vector<32xf32>
    %22 = vector.shape_cast %21 : vector<32xf32> to vector<1x32xf32>
    %23 = vector.broadcast %22 : vector<1x32xf32> to vector<32x32xf32>
    %24 = arith.cmpf ole, %19, %23 : vector<32x32xf32>
    %c1073741824_i32 = arith.constant 1073741824 : i32
    %25 = vector.broadcast %c1073741824_i32 : i32 to vector<32x32xi32>
    %26 = arith.select %24, %20, %25 : vector<32x32xi1>, vector<32x32xi32>
    %cst_8 = arith.constant dense<2147483647> : vector<32xi32>
    %27 = vector.multi_reduction <minsi>, %26, %cst_8 [0] : vector<32x32xi32> to vector<32xi32>
    %28 = vector.shape_cast %27 : vector<32xi32> to vector<1x32xi32>
    %29 = vector.broadcast %28 : vector<1x32xi32> to vector<32x32xi32>
    %30 = arith.cmpi eq, %20, %29 : vector<32x32xi32>
    %31 = arith.extui %30 : vector<32x32xi1> to vector<32x32xi32>
    %32 = arith.sitofp %31 : vector<32x32xi32> to vector<32x32xf32>
    %33 = arith.truncf %32 : vector<32x32xf32> to vector<32x32xbf16>
    %cst_9 = arith.constant dense<0.000000e+00> : vector<8x32xf32>
    %34 = tpu.matmul %4, %33, %cst_9 {dimension_numbers = #tpu.dot_dimension_numbers<[0], [0], [1], [1], [0, 1, 1, 1], [], []>} : vector<32x8xbf16>, vector<32x32xbf16>, vector<8x32xf32> -> vector<8x32xf32>
    %35 = arith.truncf %34 : vector<8x32xf32> to vector<8x32xbf16>
    %c0_10 = arith.constant 0 : index
    %c0_11 = arith.constant 0 : index
    %36 = vector.load %arg3[%c0_10, %c0_11] : memref<8x32xbf16, #tpu.memory_space<vmem>>, vector<8x32xbf16>
    tpu.vector_store %arg3[%c0_10, %c0_11], %35 {strides = array<i32>} : memref<8x32xbf16, #tpu.memory_space<vmem>>, vector<8x32xbf16>,
    %c32_i32 = arith.constant 32 : i32
    %37 = arith.muli %arg0, %c32_i32 : i32
    %38 = tpu.iota {dimensions = array<i32: 1>} : vector<8x32xi32>
    %39 = vector.broadcast %37 : i32 to vector<8x32xi32>
    %40 = arith.addi %39, %38 : vector<8x32xi32>
    %41 = arith.subf %34, %5 : vector<8x32xf32>
    %c32_i32_12 = arith.constant 32 : i32
    %42 = vector.broadcast %c32_i32_12 : i32 to vector<8x32xi32>
    %43 = arith.cmpi slt, %40, %42 : vector<8x32xi32>
    %44 = arith.mulf %41, %41 : vector<8x32xf32>
    %cst_13 = arith.constant 0.000000e+00 : f32
    %45 = vector.broadcast %cst_13 : f32 to vector<8x32xf32>
    %46 = arith.select %43, %44, %45 : vector<8x32xi1>, vector<8x32xf32>
    %c0_14 = arith.constant 0 : index
    %c0_15 = arith.constant 0 : index
    %47 = vector.load %arg4[%c0_14, %c0_15] : memref<1x1xf32, #tpu.memory_space<vmem>>, vector<1x1xf32>
    %48 = vector.shape_cast %46 : vector<8x32xf32> to vector<1x8x32xf32>
    %cst_16 = arith.constant dense<0.000000e+00> : vector<1xf32>
    %49 = vector.multi_reduction <add>, %48, %cst_16 [1, 2] : vector<1x8x32xf32> to vector<1xf32>
    %50 = vector.shape_cast %49 : vector<1xf32> to vector<1x1x1xf32>
    %51 = vector.extract %50[0, 0, 0] : f32 from vector<1x1x1xf32>
    %52 = vector.broadcast %51 : f32 to vector<1x1xf32>
    %53 = arith.addf %47, %52 : vector<1x1xf32>
    %c0_17 = arith.constant 0 : index
    %c0_18 = arith.constant 0 : index
    %54 = vector.load %arg4[%c0_17, %c0_18] : memref<1x1xf32, #tpu.memory_space<vmem>>, vector<1x1xf32>
    tpu.vector_store %arg4[%c0_17, %c0_18], %53 {strides = array<i32>} : memref<1x1xf32, #tpu.memory_space<vmem>>, vector<1x1xf32>,
    return
  }
  func.func @transform_0(%arg0: i32) -> (i32, i32) {
    %c0_i32 = arith.constant 0 : i32
    %c0_i32_0 = arith.constant 0 : i32
    return %c0_i32, %arg0 : i32, i32
  }
  func.func @transform_1(%arg0: i32) -> (i32, i32) {
    %c0_i32 = arith.constant 0 : i32
    %c0_i32_0 = arith.constant 0 : i32
    %c0_i32_1 = arith.constant 0 : i32
    return %c0_i32, %c0_i32_0 : i32, i32
  }
  func.func @transform_2(%arg0: i32) -> (i32, i32) {
    %c0_i32 = arith.constant 0 : i32
    %c0_i32_0 = arith.constant 0 : i32
    return %c0_i32, %arg0 : i32, i32
  }
  func.func @transform_3(%arg0: i32) -> (i32, i32) {
    %c0_i32 = arith.constant 0 : i32
    %c0_i32_0 = arith.constant 0 : i32
    %c0_i32_1 = arith.constant 0 : i32
    return %c0_i32, %c0_i32_0 : i32, i32
  }
}

module attributes {stable_mosaic.version = 11 : i64} {
  func.func @_resblock_kernel(%arg0: i32, %arg1: memref<12x108xbf16, #tpu.memory_space<vmem>>, %arg2: memref<108x32xbf16, #tpu.memory_space<vmem>>, %arg3: memref<12x1xf32, #tpu.memory_space<vmem>>, %arg4: memref<12x12xbf16, #tpu.memory_space<vmem>>, %arg5: memref<12x1xf32, #tpu.memory_space<vmem>>, %arg6: memref<12x32xbf16, #tpu.memory_space<vmem>>, %arg7: memref<12x32xbf16, #tpu.memory_space<vmem>>) attributes {dimension_semantics = [#tpu.dimension_semantics<parallel>], iteration_bounds = array<i64: 1>, scalar_prefetch = 0 : i64, scratch_operands = 0 : i64, tpu.core_type = #tpu.core_type<tc>, window_params = [{pipeline_mode = #tpu.pipeline_mode<synchronous>, transform_indices = @transform_0, window_bounds = array<i64: 12, 108>}, {transform_indices = @transform_1, window_bounds = array<i64: 108, 32>}, {pipeline_mode = #tpu.pipeline_mode<synchronous>, transform_indices = @transform_2, window_bounds = array<i64: 12, 1>}, {pipeline_mode = #tpu.pipeline_mode<synchronous>, transform_indices = @transform_3, window_bounds = array<i64: 12, 12>}, {pipeline_mode = #tpu.pipeline_mode<synchronous>, transform_indices = @transform_4, window_bounds = array<i64: 12, 1>}, {transform_indices = @transform_5, window_bounds = array<i64: 12, 32>}, {transform_indices = @transform_6, window_bounds = array<i64: 12, 32>}]} {
    %c0 = arith.constant 0 : index
    %c0_0 = arith.constant 0 : index
    %0 = vector.load %arg1[%c0, %c0_0] : memref<12x108xbf16, #tpu.memory_space<vmem>>, vector<12x108xbf16>
    %c0_1 = arith.constant 0 : index
    %c0_2 = arith.constant 0 : index
    %1 = vector.load %arg2[%c0_1, %c0_2] : memref<108x32xbf16, #tpu.memory_space<vmem>>, vector<108x32xbf16>
    %cst = arith.constant dense<0.000000e+00> : vector<12x32xf32>
    %2 = tpu.matmul %0, %1, %cst {dimension_numbers = #tpu.dot_dimension_numbers<[1], [0], [0], [1], [0, 0, 1, 1], [], []>} : vector<12x108xbf16>, vector<108x32xbf16>, vector<12x32xf32> -> vector<12x32xf32>
    %c0_3 = arith.constant 0 : index
    %c0_4 = arith.constant 0 : index
    %3 = vector.load %arg3[%c0_3, %c0_4] : memref<12x1xf32, #tpu.memory_space<vmem>>, vector<12x1xf32>
    %4 = vector.broadcast %3 : vector<12x1xf32> to vector<12x32xf32>
    %5 = arith.addf %2, %4 : vector<12x32xf32>
    %cst_5 = arith.constant 0.000000e+00 : f32
    %6 = vector.broadcast %cst_5 : f32 to vector<12x32xf32>
    %7 = arith.maximumf %5, %6 : vector<12x32xf32>
    %c0_6 = arith.constant 0 : index
    %c0_7 = arith.constant 0 : index
    %8 = vector.load %arg4[%c0_6, %c0_7] : memref<12x12xbf16, #tpu.memory_space<vmem>>, vector<12x12xbf16>
    %9 = arith.truncf %7 : vector<12x32xf32> to vector<12x32xbf16>
    %cst_8 = arith.constant dense<0.000000e+00> : vector<12x32xf32>
    %10 = tpu.matmul %8, %9, %cst_8 {dimension_numbers = #tpu.dot_dimension_numbers<[1], [0], [0], [1], [0, 0, 1, 1], [], []>} : vector<12x12xbf16>, vector<12x32xbf16>, vector<12x32xf32> -> vector<12x32xf32>
    %c0_9 = arith.constant 0 : index
    %c0_10 = arith.constant 0 : index
    %11 = vector.load %arg5[%c0_9, %c0_10] : memref<12x1xf32, #tpu.memory_space<vmem>>, vector<12x1xf32>
    %12 = vector.broadcast %11 : vector<12x1xf32> to vector<12x32xf32>
    %13 = arith.addf %10, %12 : vector<12x32xf32>
    %c0_11 = arith.constant 0 : index
    %c0_12 = arith.constant 0 : index
    %14 = vector.load %arg6[%c0_11, %c0_12] : memref<12x32xbf16, #tpu.memory_space<vmem>>, vector<12x32xbf16>
    %15 = arith.extf %14 : vector<12x32xbf16> to vector<12x32xf32>
    %16 = arith.addf %13, %15 : vector<12x32xf32>
    %17 = arith.truncf %16 : vector<12x32xf32> to vector<12x32xbf16>
    %c0_13 = arith.constant 0 : index
    %c0_14 = arith.constant 0 : index
    %18 = vector.load %arg7[%c0_13, %c0_14] : memref<12x32xbf16, #tpu.memory_space<vmem>>, vector<12x32xbf16>
    tpu.vector_store %arg7[%c0_13, %c0_14], %17 {strides = array<i32>} : memref<12x32xbf16, #tpu.memory_space<vmem>>, vector<12x32xbf16>,
    return
  }
  func.func @transform_0(%arg0: i32) -> (i32, i32) {
    %c0_i32 = arith.constant 0 : i32
    %c0_i32_0 = arith.constant 0 : i32
    %c0_i32_1 = arith.constant 0 : i32
    return %c0_i32, %c0_i32_0 : i32, i32
  }
  func.func @transform_1(%arg0: i32) -> (i32, i32) {
    %c0_i32 = arith.constant 0 : i32
    %c0_i32_0 = arith.constant 0 : i32
    return %c0_i32, %arg0 : i32, i32
  }
  func.func @transform_2(%arg0: i32) -> (i32, i32) {
    %c0_i32 = arith.constant 0 : i32
    %c0_i32_0 = arith.constant 0 : i32
    %c0_i32_1 = arith.constant 0 : i32
    return %c0_i32, %c0_i32_0 : i32, i32
  }
  func.func @transform_3(%arg0: i32) -> (i32, i32) {
    %c0_i32 = arith.constant 0 : i32
    %c0_i32_0 = arith.constant 0 : i32
    %c0_i32_1 = arith.constant 0 : i32
    return %c0_i32, %c0_i32_0 : i32, i32
  }
  func.func @transform_4(%arg0: i32) -> (i32, i32) {
    %c0_i32 = arith.constant 0 : i32
    %c0_i32_0 = arith.constant 0 : i32
    %c0_i32_1 = arith.constant 0 : i32
    return %c0_i32, %c0_i32_0 : i32, i32
  }
  func.func @transform_5(%arg0: i32) -> (i32, i32) {
    %c0_i32 = arith.constant 0 : i32
    %c0_i32_0 = arith.constant 0 : i32
    return %c0_i32, %arg0 : i32, i32
  }
  func.func @transform_6(%arg0: i32) -> (i32, i32) {
    %c0_i32 = arith.constant 0 : i32
    %c0_i32_0 = arith.constant 0 : i32
    return %c0_i32, %arg0 : i32, i32
  }
}

module attributes {stable_mosaic.version = 11 : i64} {
  func.func @_wxt_kernel(%arg0: i32, %arg1: memref<12x192xbf16, #tpu.memory_space<vmem>>, %arg2: memref<192x128xbf16, #tpu.memory_space<vmem>>, %arg3: memref<12x1xf32, #tpu.memory_space<vmem>>, %arg4: memref<12x128xbf16, #tpu.memory_space<vmem>>) attributes {dimension_semantics = [#tpu.dimension_semantics<parallel>], iteration_bounds = array<i64: 1>, scalar_prefetch = 0 : i64, scratch_operands = 0 : i64, tpu.core_type = #tpu.core_type<tc>, window_params = [{pipeline_mode = #tpu.pipeline_mode<synchronous>, transform_indices = @transform_0, window_bounds = array<i64: 12, 192>}, {transform_indices = @transform_1, window_bounds = array<i64: 192, 128>}, {pipeline_mode = #tpu.pipeline_mode<synchronous>, transform_indices = @transform_2, window_bounds = array<i64: 12, 1>}, {transform_indices = @transform_3, window_bounds = array<i64: 12, 128>}]} {
    %c0 = arith.constant 0 : index
    %c0_0 = arith.constant 0 : index
    %0 = vector.load %arg1[%c0, %c0_0] : memref<12x192xbf16, #tpu.memory_space<vmem>>, vector<12x192xbf16>
    %c0_1 = arith.constant 0 : index
    %c0_2 = arith.constant 0 : index
    %1 = vector.load %arg2[%c0_1, %c0_2] : memref<192x128xbf16, #tpu.memory_space<vmem>>, vector<192x128xbf16>
    %cst = arith.constant dense<0.000000e+00> : vector<12x128xf32>
    %2 = tpu.matmul %0, %1, %cst {dimension_numbers = #tpu.dot_dimension_numbers<[1], [0], [0], [1], [0, 0, 1, 1], [], []>} : vector<12x192xbf16>, vector<192x128xbf16>, vector<12x128xf32> -> vector<12x128xf32>
    %c0_3 = arith.constant 0 : index
    %c0_4 = arith.constant 0 : index
    %3 = vector.load %arg3[%c0_3, %c0_4] : memref<12x1xf32, #tpu.memory_space<vmem>>, vector<12x1xf32>
    %4 = vector.broadcast %3 : vector<12x1xf32> to vector<12x128xf32>
    %5 = arith.addf %2, %4 : vector<12x128xf32>
    %cst_5 = arith.constant 0.000000e+00 : f32
    %6 = vector.broadcast %cst_5 : f32 to vector<12x128xf32>
    %7 = arith.maximumf %5, %6 : vector<12x128xf32>
    %8 = arith.truncf %7 : vector<12x128xf32> to vector<12x128xbf16>
    %c0_6 = arith.constant 0 : index
    %c0_7 = arith.constant 0 : index
    %9 = vector.load %arg4[%c0_6, %c0_7] : memref<12x128xbf16, #tpu.memory_space<vmem>>, vector<12x128xbf16>
    tpu.vector_store %arg4[%c0_6, %c0_7], %8 {strides = array<i32>} : memref<12x128xbf16, #tpu.memory_space<vmem>>, vector<12x128xbf16>,
    return
  }
  func.func @transform_0(%arg0: i32) -> (i32, i32) {
    %c0_i32 = arith.constant 0 : i32
    %c0_i32_0 = arith.constant 0 : i32
    %c0_i32_1 = arith.constant 0 : i32
    return %c0_i32, %c0_i32_0 : i32, i32
  }
  func.func @transform_1(%arg0: i32) -> (i32, i32) {
    %c0_i32 = arith.constant 0 : i32
    %c0_i32_0 = arith.constant 0 : i32
    return %c0_i32, %arg0 : i32, i32
  }
  func.func @transform_2(%arg0: i32) -> (i32, i32) {
    %c0_i32 = arith.constant 0 : i32
    %c0_i32_0 = arith.constant 0 : i32
    %c0_i32_1 = arith.constant 0 : i32
    return %c0_i32, %c0_i32_0 : i32, i32
  }
  func.func @transform_3(%arg0: i32) -> (i32, i32) {
    %c0_i32 = arith.constant 0 : i32
    %c0_i32_0 = arith.constant 0 : i32
    return %c0_i32, %arg0 : i32, i32
  }
}

module attributes {stable_mosaic.version = 11 : i64} {
  func.func @_wxt_kernel(%arg0: i32, %arg1: memref<3x192xbf16, #tpu.memory_space<vmem>>, %arg2: memref<192x256xbf16, #tpu.memory_space<vmem>>, %arg3: memref<3x1xf32, #tpu.memory_space<vmem>>, %arg4: memref<3x256xf32, #tpu.memory_space<vmem>>) attributes {dimension_semantics = [#tpu.dimension_semantics<parallel>], iteration_bounds = array<i64: 2>, scalar_prefetch = 0 : i64, scratch_operands = 0 : i64, tpu.core_type = #tpu.core_type<tc>, window_params = [{pipeline_mode = #tpu.pipeline_mode<synchronous>, transform_indices = @transform_0, window_bounds = array<i64: 3, 192>}, {transform_indices = @transform_1, window_bounds = array<i64: 192, 256>}, {pipeline_mode = #tpu.pipeline_mode<synchronous>, transform_indices = @transform_2, window_bounds = array<i64: 3, 1>}, {transform_indices = @transform_3, window_bounds = array<i64: 3, 256>}]} {
    %c0 = arith.constant 0 : index
    %c0_0 = arith.constant 0 : index
    %0 = vector.load %arg1[%c0, %c0_0] : memref<3x192xbf16, #tpu.memory_space<vmem>>, vector<3x192xbf16>
    %c0_1 = arith.constant 0 : index
    %c0_2 = arith.constant 0 : index
    %1 = vector.load %arg2[%c0_1, %c0_2] : memref<192x256xbf16, #tpu.memory_space<vmem>>, vector<192x256xbf16>
    %cst = arith.constant dense<0.000000e+00> : vector<3x256xf32>
    %2 = tpu.matmul %0, %1, %cst {dimension_numbers = #tpu.dot_dimension_numbers<[1], [0], [0], [1], [0, 0, 1, 1], [], []>} : vector<3x192xbf16>, vector<192x256xbf16>, vector<3x256xf32> -> vector<3x256xf32>
    %c0_3 = arith.constant 0 : index
    %c0_4 = arith.constant 0 : index
    %3 = vector.load %arg3[%c0_3, %c0_4] : memref<3x1xf32, #tpu.memory_space<vmem>>, vector<3x1xf32>
    %4 = vector.broadcast %3 : vector<3x1xf32> to vector<3x256xf32>
    %5 = arith.addf %2, %4 : vector<3x256xf32>
    %c0_5 = arith.constant 0 : index
    %c0_6 = arith.constant 0 : index
    %6 = vector.load %arg4[%c0_5, %c0_6] : memref<3x256xf32, #tpu.memory_space<vmem>>, vector<3x256xf32>
    tpu.vector_store %arg4[%c0_5, %c0_6], %5 {strides = array<i32>} : memref<3x256xf32, #tpu.memory_space<vmem>>, vector<3x256xf32>,
    return
  }
  func.func @transform_0(%arg0: i32) -> (i32, i32) {
    %c0_i32 = arith.constant 0 : i32
    %c0_i32_0 = arith.constant 0 : i32
    %c0_i32_1 = arith.constant 0 : i32
    return %c0_i32, %c0_i32_0 : i32, i32
  }
  func.func @transform_1(%arg0: i32) -> (i32, i32) {
    %c0_i32 = arith.constant 0 : i32
    %c0_i32_0 = arith.constant 0 : i32
    return %c0_i32, %arg0 : i32, i32
  }
  func.func @transform_2(%arg0: i32) -> (i32, i32) {
    %c0_i32 = arith.constant 0 : i32
    %c0_i32_0 = arith.constant 0 : i32
    %c0_i32_1 = arith.constant 0 : i32
    return %c0_i32, %c0_i32_0 : i32, i32
  }
  func.func @transform_3(%arg0: i32) -> (i32, i32) {
    %c0_i32 = arith.constant 0 : i32
    %c0_i32_0 = arith.constant 0 : i32
    return %c0_i32, %arg0 : i32, i32
  }
}

</mosaic_0001>

<bundles_post_ra>
// kernel: vqvae2_forward.15
= control target key start
LH: loop header
LB: loop body
LE: loop exit
PB: predicated region body
PF: predicated region fallthrough
CT: control target
= control target key end

     0   :  { %v122_v0 = vmov 0.0   ;;  %vm123_vm0 = vmmov 0   ;;  %v124_v2 = vmov 0   ;;  %vm46_vm1 = vcmask 392192   ;;  %s163_s1 = inlined_call_operand.vmem [shape: bf16[48,128], index: 1, kind: input, shape index: {}]   ;;  %s164_s2 = inlined_call_operand.vmem [shape: f32[8,1], index: 2, kind: input, shape index: {}]   ;;  %s165_s0 = inlined_call_operand.vmem [shape: bf16[8,48], index: 0, kind: input, shape index: {}]   ;;  %s166_s3 = inlined_call_operand.vmem [shape: bf16[8,128], index: 3, kind: output, shape index: {}]  }
   0x1   :  { %105 = vmatprep.subr.bf16.mxu0 %v122_v0  ;;  %v119_v1 = vld [vmem:[%s163_s1] sm:$0xff]   ;;  %111 = vmatprep.mubr.msk.bf16.mxu0 %vm123_vm0, %v122_v0  ;;  %v120_v3 = vld [vmem:[%s163_s1 + $0x8] sm:$0xff]   ;;  %v121_v5 = vld [vmem:[%s163_s1 + $0x10] sm:$0xff]  }
   0x2   :  { %118 = vset.pattern.permute.xlu0 %v124_v2  ;;  %106 = vmatpush3.bf16.msra.mxu0 %v119_v1  ;;  %v22_v4 = vld [vmem:[%s164_s2] sm:$0xff] }
   0x3   :  { %107 = vmatprep.subr.bf16.mxu0 %v122_v0  ;;  %25 = vperm.xlu0 %118, %v22_v4   ;;  %v15_v6 = vld [vmem:[%s165_s0] sm:$0xf] }
   0x6   :  { %108 = vmatpush3.bf16.msra.mxu0 %v120_v3 }
   0x7   :  { %109 = vmatprep.subr.bf16.mxu0 %v122_v0 }
   0xa   :  { %110 = vmatpush3.bf16.msra.mxu0 %v121_v5 }
   0xd   :  { %112 = vmatmul.mubr.msk.bf16.vlgmr.msra.gmra.mrb[0].mxu0 %vm46_vm1, %v15_v6 }
  0x82   :  { %v26_v7 = vpop.permute.xlu0 %25 }
  0xe0   :  { %v84_v8 = vpop.f32.mrb[0].mxu0 }
  0xe1   :  { %v85_v9 = vadd.f32 %v84_v8, %v26_v7  ;;  %v113_v10 = vpop.f32.mrb[1].mxu0 }
  0xe2   :  { %v87_v11 = vpop.f32.mrb[2].mxu0 }
  0xe3   :  { %v90_v12 = vmax.f32 %v85_v9, 0.0  ;;  %v114_v13 = vpop.f32.mrb[3].mxu0 }
  0xe5   :  { %v91_v14 = vpack.c.bf16 %v90_v12, %v90_v12 }
  0xe7   :  { %92 = vst [vmem:[%s166_s3] sm:$0xf] %v91_v14 }

// kernel: vqvae2_forward.16
= control target key start
LH: loop header
LB: loop body
LE: loop exit
PB: predicated region body
PF: predicated region fallthrough
CT: control target
= control target key end

     0   :  { %v183_v0 = vmov 0.0   ;;  %vm184_vm0 = vmmov 0   ;;  %v185_v2 = vmov 0   ;;  %vm128_vm1 = vcmask 257024   ;;  %s239_s1 = inlined_call_operand.vmem [shape: bf16[128,32], index: 1, kind: input, shape index: {}]   ;;  %s240_s2 = inlined_call_operand.vmem [shape: f32[8,1], index: 2, kind: input, shape index: {}]   ;;  %s241_s0 = inlined_call_operand.vmem [shape: bf16[8,128], index: 0, kind: input, shape index: {}]   ;;  %s242_s3 = inlined_call_operand.vmem [shape: bf16[8,32], index: 3, kind: output, shape index: {}]  }
   0x1   :  { %151 = vmatprep.subr.bf16.mxu0 %v183_v0  ;;  %v175_v1 = vld [vmem:[%s239_s1] sm:$0xff]   ;;  %167 = vmatprep.mubr.msk.bf16.mxu0 %vm184_vm0, %v183_v0  ;;  %v176_v3 = vld [vmem:[%s239_s1 + $0x8] sm:$0xff]   ;;  %v177_v4 = vld [vmem:[%s239_s1 + $0x10] sm:$0xff]  }
   0x2   :  { %174 = vset.pattern.permute.xlu0 %v185_v2  ;;  %152 = vmatpush3.bf16.msra.mxu0 %v175_v1  ;;  %v32_v5 = vld [vmem:[%s240_s2] sm:$0xff]  ;;  %v178_v6 = vld [vmem:[%s239_s1 + $0x18] sm:$0xff]   ;;  %v180_v8 = vld [vmem:[%s239_s1 + $0x28] sm:$0xff]  }
   0x3   :  { %153 = vmatprep.subr.bf16.mxu0 %v183_v0  ;;  %35 = vperm.xlu0 %174, %v32_v5   ;;  %v179_v7 = vld [vmem:[%s239_s1 + $0x20] sm:$0xff]   ;;  %v181_v9 = vld [vmem:[%s239_s1 + $0x30] sm:$0xff]   ;;  %v182_v10 = vld [vmem:[%s239_s1 + $0x38] sm:$0xff]  }
   0x4   :  { %v15_v11 = vld [vmem:[%s241_s0] sm:$0xf] }
   0x6   :  { %154 = vmatpush3.bf16.msra.mxu0 %v176_v3 }
   0x7   :  { %155 = vmatprep.subr.bf16.mxu0 %v183_v0 }
   0xa   :  { %156 = vmatpush3.bf16.msra.mxu0 %v177_v4 }
   0xb   :  { %157 = vmatprep.subr.bf16.mxu0 %v183_v0 }
   0xe   :  { %158 = vmatpush3.bf16.msra.mxu0 %v178_v6 }
   0xf   :  { %159 = vmatprep.subr.bf16.mxu0 %v183_v0 }
  0x12   :  { %160 = vmatpush3.bf16.msra.mxu0 %v179_v7 }
  0x13   :  { %161 = vmatprep.subr.bf16.mxu0 %v183_v0 }
  0x16   :  { %162 = vmatpush3.bf16.msra.mxu0 %v180_v8 }
  0x17   :  { %163 = vmatprep.subr.bf16.mxu0 %v183_v0 }
  0x1a   :  { %164 = vmatpush3.bf16.msra.mxu0 %v181_v9 }
  0x1b   :  { %165 = vmatprep.subr.bf16.mxu0 %v183_v0 }
  0x1e   :  { %166 = vmatpush3.bf16.msra.mxu0 %v182_v10 }
  0x21   :  { %168 = vmatmul.mubr.bf16.vlgmr.msra.gmra.mrb[0].mxu0 %v15_v11 }
  0x82   :  { %v36_v12 = vpop.permute.xlu0 %35 }
  0xf4   :  { %v120_v13 = vpop.f32.mrb[0].mxu0 }
  0xf5   :  { %v121_v14 = vadd.f32 %v120_v13, %v36_v12  ;;  %v169_v15 = vpop.f32.mrb[1].mxu0 }
  0xf6   :  { %v123_v16 = vpop.f32.mrb[2].mxu0 }
  0xf7   :  { %v126_v17 = vmax.f32 %v121_v14, 0.0  ;;  %v170_v18 = vpop.f32.mrb[3].mxu0 }
  0xf9   :  { %v127_v19 = vpack.c.bf16 %v126_v17, %v126_v17 }
  0xfb   :  { %129 = vst.msk [vmem:[%s242_s3] sm:$0xf] %vm128_vm1, %v127_v19 }

// kernel: vqvae2_forward.17
= control target key start
LH: loop header
LB: loop body
LE: loop exit
PB: predicated region body
PF: predicated region fallthrough
CT: control target
= control target key end

     0   :  { %v225_v0 = vmov 0.0   ;;  %vm226_vm0 = vmmov 0   ;;  %v227_v2 = vmov 0   ;;  %vm71_vm1 = vcmask 1043456   ;;  %s298_s1 = inlined_call_operand.vmem [shape: bf16[72,32], index: 1, kind: input, shape index: {}]   ;;  %s299_s2 = inlined_call_operand.vmem [shape: f32[8,1], index: 2, kind: input, shape index: {}]   ;;  %s300_s4 = inlined_call_operand.vmem [shape: f32[8,1], index: 4, kind: input, shape index: {}]   ;;  %s301_s0 = inlined_call_operand.vmem [shape: bf16[8,72], index: 0, kind: input, shape index: {}]   ;;  %s302_s3 = inlined_call_operand.vmem [shape: bf16[8,8], index: 3, kind: input, shape index: {}]   ;;  %s303_s5 = inlined_call_operand.vmem [shape: bf16[8,32], index: 5, kind: input, shape index: {}]   ;;  %s304_s6 = inlined_call_operand.vmem [shape: bf16[8,32], index: 6, kind: output, shape index: {}]  }
   0x1   :  { %196 = vmatprep.subr.bf16.mxu0 %v225_v0  ;;  %v220_v1 = vld [vmem:[%s298_s1] sm:$0xff]   ;;  %206 = vmatprep.mubr.msk.bf16.mxu0 %vm226_vm0, %v225_v0  ;;  %v221_v3 = vld [vmem:[%s298_s1 + $0x8] sm:$0xff]   ;;  %v222_v5 = vld [vmem:[%s298_s1 + $0x10] sm:$0xff]   ;;  %vm67_vm2 = vcmask 588800   ;;  %vm124_vm3 = vcmask 64512   ;;  %vm175_vm4 = vcmask 257024  }
   0x2   :  { %219 = vset.pattern.permute.xlu0 %v227_v2  ;;  %210 = vmatprep.subr.bf16.mxu1 %v225_v0  ;;  %v34_v4 = vld [vmem:[%s299_s2] sm:$0xff]  ;;  %v223_v7 = vld [vmem:[%s298_s1 + $0x18] sm:$0xff]  }
   0x3   :  { %197 = vmatpush3.bf16.msra.mxu0 %v220_v1  ;;  %212 = vmatprep.mubr.msk.bf16.mxu1 %vm226_vm0, %v225_v0  ;;  %v118_v6 = vld [vmem:[%s300_s4] sm:$0xff] }
   0x4   :  { %198 = vmatprep.subr.bf16.mxu0 %v225_v0  ;;  %37 = vperm.xlu0 %219, %v34_v4   ;;  %v224_v8 = vld [vmem:[%s298_s1 + $0x20] ss:$0 sps:$4 sm:$0xff]  }
   0x5   :  { %v73_v9 = vsel %vm71_vm1, %v224_v8, 0  ;;  %v24_v10 = vld [vmem:[%s301_s0] sm:$0xf] }
   0x6   :  { %v116_v20 = vld [vmem:[%s302_s3] sm:$0xf] }
   0x7   :  { %199 = vmatpush3.bf16.msra.mxu0 %v221_v3  ;;  %v171_v21 = vld [vmem:[%s303_s5] sm:$0xf] }
   0x8   :  { %200 = vmatprep.subr.bf16.mxu0 %v225_v0  ;;  %121 = vperm.xlu0 %219, %v118_v6   ;;  %v172_v22 = vunpack.c.l.bf16 %v171_v21 }
   0xb   :  { %201 = vmatpush3.bf16.msra.mxu0 %v222_v5 }
   0xc   :  { %202 = vmatprep.subr.bf16.mxu0 %v225_v0 }
   0xf   :  { %203 = vmatpush3.bf16.msra.mxu0 %v223_v7 }
  0x10   :  { %204 = vmatprep.subr.bf16.mxu0 %v225_v0 }
  0x13   :  { %205 = vmatpush3.bf16.msra.mxu0 %v73_v9 }
  0x16   :  { %207 = vmatmul.mubr.msk.bf16.vlgmr.msra.gmra.mrb[0].mxu0 %vm67_vm2, %v24_v10 }
  0x83   :  { %v38_v11 = vpop.permute.xlu0 %37 }
  0x87   :  { %v122_v23 = vpop.permute.xlu0 %121 }
  0xe9   :  { %v109_v12 = vpop.f32.mrb[0].mxu0 }
  0xea   :  { %v110_v13 = vadd.f32 %v109_v12, %v38_v11  ;;  %v208_v14 = vpop.f32.mrb[1].mxu0 }
  0xeb   :  { %v112_v15 = vpop.f32.mrb[2].mxu0 }
  0xec   :  { %v115_v16 = vmax.f32 %v110_v13, 0.0  ;;  %v209_v17 = vpop.f32.mrb[3].mxu0 }
  0xee   :  { %v117_v18 = vpack.c.bf16 %v115_v16, %v115_v16 }
  0xf0   :  { %v129_v19 = vsel %vm71_vm1, %v117_v18, 0 }
  0xf1   :  { %211 = vmatpush3.bf16.msra.mxu1 %v129_v19 }
  0xf4   :  { %213 = vmatmul.mubr.msk.bf16.vlgmr.msra.gmra.mrb[0].mxu1 %vm124_vm3, %v116_v20 }
 0x1c7   :  { %v165_v24 = vpop.f32.mrb[0].mxu1 }
 0x1c8   :  { %v166_v25 = vadd.f32 %v165_v24, %v122_v23  ;;  %v214_v26 = vpop.f32.mrb[1].mxu1 }
 0x1c9   :  { %v168_v27 = vpop.f32.mrb[2].mxu1 }
 0x1ca   :  { %v173_v28 = vadd.f32 %v172_v22, %v166_v25  ;;  %v215_v29 = vpop.f32.mrb[3].mxu1 }
 0x1cc   :  { %v174_v30 = vpack.c.bf16 %v173_v28, %v173_v28 }
 0x1ce   :  { %176 = vst.msk [vmem:[%s304_s6] sm:$0xf] %vm175_vm4, %v174_v30 }

// kernel: vqvae2_forward.18
= control target key start
LH: loop header
LB: loop body
LE: loop exit
PB: predicated region body
PF: predicated region fallthrough
CT: control target
= control target key end

     0   :  { %v149_v0 = vmov 0.0   ;;  %vm150_vm0 = vmmov 0   ;;  %v151_v2 = vmov 0   ;;  %vm62_vm1 = vcmask 1043456   ;;  %s196_s1 = inlined_call_operand.vmem [shape: bf16[72,8], index: 1, kind: input, shape index: {}]   ;;  %s197_s2 = inlined_call_operand.vmem [shape: f32[8,1], index: 2, kind: input, shape index: {}]   ;;  %s198_s0 = inlined_call_operand.vmem [shape: bf16[8,72], index: 0, kind: input, shape index: {}]   ;;  %s199_s3 = inlined_call_operand.vmem [shape: bf16[8,8], index: 3, kind: output, shape index: {}]  }
   0x1   :  { %126 = vmatprep.subr.bf16.mxu0 %v149_v0  ;;  %v144_v1 = vld [vmem:[%s196_s1] sm:$0xff]   ;;  %136 = vmatprep.mubr.msk.bf16.mxu0 %vm150_vm0, %v149_v0  ;;  %v145_v3 = vld [vmem:[%s196_s1 + $0x8] sm:$0xff]   ;;  %v146_v5 = vld [vmem:[%s196_s1 + $0x10] sm:$0xff]   ;;  %vm58_vm2 = vcmask 588800   ;;  %vm108_vm3 = vcmask 60416  }
   0x2   :  { %143 = vset.pattern.permute.xlu0 %v151_v2  ;;  %127 = vmatpush3.bf16.msra.mxu0 %v144_v1  ;;  %v25_v4 = vld [vmem:[%s197_s2] sm:$0xff]  ;;  %v147_v6 = vld [vmem:[%s196_s1 + $0x18] sm:$0xff]  }
   0x3   :  { %128 = vmatprep.subr.bf16.mxu0 %v149_v0  ;;  %28 = vperm.xlu0 %143, %v25_v4   ;;  %v148_v7 = vld [vmem:[%s196_s1 + $0x20] ss:$0 sps:$4 sm:$0xff]  }
   0x4   :  { %v64_v8 = vsel %vm62_vm1, %v148_v7, 0  ;;  %v15_v9 = vld [vmem:[%s198_s0] sm:$0xf] }
   0x6   :  { %129 = vmatpush3.bf16.msra.mxu0 %v145_v3 }
   0x7   :  { %130 = vmatprep.subr.bf16.mxu0 %v149_v0 }
   0xa   :  { %131 = vmatpush3.bf16.msra.mxu0 %v146_v5 }
   0xb   :  { %132 = vmatprep.subr.bf16.mxu0 %v149_v0 }
   0xe   :  { %133 = vmatpush3.bf16.msra.mxu0 %v147_v6 }
   0xf   :  { %134 = vmatprep.subr.bf16.mxu0 %v149_v0 }
  0x12   :  { %135 = vmatpush3.bf16.msra.mxu0 %v64_v8 }
  0x15   :  { %137 = vmatmul.mubr.msk.bf16.vlgmr.msra.gmra.mrb[0].mxu0 %vm58_vm2, %v15_v9 }
  0x82   :  { %v29_v10 = vpop.permute.xlu0 %28 }
  0xe8   :  { %v100_v11 = vpop.f32.mrb[0].mxu0 }
  0xe9   :  { %v101_v12 = vadd.f32 %v100_v11, %v29_v10  ;;  %v138_v13 = vpop.f32.mrb[1].mxu0 }
  0xea   :  { %v103_v14 = vpop.f32.mrb[2].mxu0 }
  0xeb   :  { %v106_v15 = vmax.f32 %v101_v12, 0.0  ;;  %v139_v16 = vpop.f32.mrb[3].mxu0 }
  0xed   :  { %v107_v17 = vpack.c.bf16 %v106_v15, %v106_v15 }
  0xef   :  { %109 = vst.msk [vmem:[%s199_s3] sm:$0xf] %vm108_vm3, %v107_v17 }

// kernel: vqvae2_forward.19
= control target key start
LH: loop header
LB: loop body
LE: loop exit
PB: predicated region body
PF: predicated region fallthrough
CT: control target
= control target key end

     0   :  { %v225_v0 = vmov 0.0   ;;  %vm226_vm0 = vmmov 0   ;;  %v227_v2 = vmov 0   ;;  %vm71_vm1 = vcmask 1043456   ;;  %s298_s1 = inlined_call_operand.vmem [shape: bf16[72,8], index: 1, kind: input, shape index: {}]   ;;  %s299_s2 = inlined_call_operand.vmem [shape: f32[8,1], index: 2, kind: input, shape index: {}]   ;;  %s300_s4 = inlined_call_operand.vmem [shape: f32[8,1], index: 4, kind: input, shape index: {}]   ;;  %s301_s0 = inlined_call_operand.vmem [shape: bf16[8,72], index: 0, kind: input, shape index: {}]   ;;  %s302_s3 = inlined_call_operand.vmem [shape: bf16[8,8], index: 3, kind: input, shape index: {}]   ;;  %s303_s5 = inlined_call_operand.vmem [shape: bf16[8,8], index: 5, kind: input, shape index: {}]   ;;  %s304_s6 = inlined_call_operand.vmem [shape: bf16[8,8], index: 6, kind: output, shape index: {}]  }
   0x1   :  { %196 = vmatprep.subr.bf16.mxu0 %v225_v0  ;;  %v220_v1 = vld [vmem:[%s298_s1] sm:$0xff]   ;;  %206 = vmatprep.mubr.msk.bf16.mxu0 %vm226_vm0, %v225_v0  ;;  %v221_v3 = vld [vmem:[%s298_s1 + $0x8] sm:$0xff]   ;;  %v222_v5 = vld [vmem:[%s298_s1 + $0x10] sm:$0xff]   ;;  %vm67_vm2 = vcmask 588800   ;;  %vm124_vm3 = vcmask 64512   ;;  %vm175_vm4 = vcmask 60416  }
   0x2   :  { %219 = vset.pattern.permute.xlu0 %v227_v2  ;;  %210 = vmatprep.subr.bf16.mxu1 %v225_v0  ;;  %v34_v4 = vld [vmem:[%s299_s2] sm:$0xff]  ;;  %v223_v7 = vld [vmem:[%s298_s1 + $0x18] sm:$0xff]  }
   0x3   :  { %197 = vmatpush3.bf16.msra.mxu0 %v220_v1  ;;  %212 = vmatprep.mubr.msk.bf16.mxu1 %vm226_vm0, %v225_v0  ;;  %v118_v6 = vld [vmem:[%s300_s4] sm:$0xff] }
   0x4   :  { %198 = vmatprep.subr.bf16.mxu0 %v225_v0  ;;  %37 = vperm.xlu0 %219, %v34_v4   ;;  %v224_v8 = vld [vmem:[%s298_s1 + $0x20] ss:$0 sps:$4 sm:$0xff]  }
   0x5   :  { %v73_v9 = vsel %vm71_vm1, %v224_v8, 0  ;;  %v24_v10 = vld [vmem:[%s301_s0] sm:$0xf] }
   0x6   :  { %v116_v20 = vld [vmem:[%s302_s3] sm:$0xf] }
   0x7   :  { %199 = vmatpush3.bf16.msra.mxu0 %v221_v3  ;;  %v171_v21 = vld [vmem:[%s303_s5] sm:$0xf] }
   0x8   :  { %200 = vmatprep.subr.bf16.mxu0 %v225_v0  ;;  %121 = vperm.xlu0 %219, %v118_v6   ;;  %v172_v22 = vunpack.c.l.bf16 %v171_v21 }
   0xb   :  { %201 = vmatpush3.bf16.msra.mxu0 %v222_v5 }
   0xc   :  { %202 = vmatprep.subr.bf16.mxu0 %v225_v0 }
   0xf   :  { %203 = vmatpush3.bf16.msra.mxu0 %v223_v7 }
  0x10   :  { %204 = vmatprep.subr.bf16.mxu0 %v225_v0 }
  0x13   :  { %205 = vmatpush3.bf16.msra.mxu0 %v73_v9 }
  0x16   :  { %207 = vmatmul.mubr.msk.bf16.vlgmr.msra.gmra.mrb[0].mxu0 %vm67_vm2, %v24_v10 }
  0x83   :  { %v38_v11 = vpop.permute.xlu0 %37 }
  0x87   :  { %v122_v23 = vpop.permute.xlu0 %121 }
  0xe9   :  { %v109_v12 = vpop.f32.mrb[0].mxu0 }
  0xea   :  { %v110_v13 = vadd.f32 %v109_v12, %v38_v11  ;;  %v208_v14 = vpop.f32.mrb[1].mxu0 }
  0xeb   :  { %v112_v15 = vpop.f32.mrb[2].mxu0 }
  0xec   :  { %v115_v16 = vmax.f32 %v110_v13, 0.0  ;;  %v209_v17 = vpop.f32.mrb[3].mxu0 }
  0xee   :  { %v117_v18 = vpack.c.bf16 %v115_v16, %v115_v16 }
  0xf0   :  { %v129_v19 = vsel %vm71_vm1, %v117_v18, 0 }
  0xf1   :  { %211 = vmatpush3.bf16.msra.mxu1 %v129_v19 }
  0xf4   :  { %213 = vmatmul.mubr.msk.bf16.vlgmr.msra.gmra.mrb[0].mxu1 %vm124_vm3, %v116_v20 }
 0x1c7   :  { %v165_v24 = vpop.f32.mrb[0].mxu1 }
 0x1c8   :  { %v166_v25 = vadd.f32 %v165_v24, %v122_v23  ;;  %v214_v26 = vpop.f32.mrb[1].mxu1 }
 0x1c9   :  { %v168_v27 = vpop.f32.mrb[2].mxu1 }
 0x1ca   :  { %v173_v28 = vadd.f32 %v172_v22, %v166_v25  ;;  %v215_v29 = vpop.f32.mrb[3].mxu1 }
 0x1cc   :  { %v174_v30 = vpack.c.bf16 %v173_v28, %v173_v28 }
 0x1ce   :  { %176 = vst.msk [vmem:[%s304_s6] sm:$0xf] %vm175_vm4, %v174_v30 }

// kernel: vqvae2_forward.21
= control target key start
LH: loop header
LB: loop body
LE: loop exit
PB: predicated region body
PF: predicated region fallthrough
CT: control target
= control target key end

     0   :  { %vm27_vm0 = vcmask 1043456   ;;  %v91_v0 = vmov 0.0   ;;  %vm92_vm1 = vmmov 0   ;;  %v93_v3 = vmov 0   ;;  %s126_s1 = inlined_call_operand.vmem [shape: bf16[8,8], index: 1, kind: input, shape index: {}]   ;;  %s127_s0 = inlined_call_operand.vmem [shape: bf16[4,8], index: 0, kind: input, shape index: {}]   ;;  %s128_s2 = inlined_call_operand.vmem [shape: f32[4,1], index: 2, kind: input, shape index: {}]   ;;  %s129_s3 = inlined_call_operand.vmem [shape: bf16[4,8], index: 3, kind: output, shape index: {}]  }
   0x1   :  { %81 = vmatprep.subr.bf16.mxu0 %v91_v0  ;;  %v16_v1 = vld [vmem:[%s126_s1] sm:$0xf]  ;;  %83 = vmatprep.mubr.msk.bf16.mxu0 %vm92_vm1, %v91_v0  ;;  %vm23_vm2 = vcmask 64512   ;;  %vm72_vm3 = vcmask 58368  }
   0x2   :  { %v29_v2 = vsel %vm27_vm0, %v16_v1, 0  ;;  %90 = vset.pattern.permute.xlu0 %v93_v3  ;;  %v17_v4 = vld [vmem:[%s128_s2] sm:$0xf] }
   0x3   :  { %82 = vmatpush3.bf16.msra.mxu0 %v29_v2  ;;  %v15_v5 = vld [vmem:[%s127_s0] sm:$0x3]  ;;  %20 = vperm.xlu0 %90, %v17_v4  }
   0x6   :  { %84 = vmatmul.mubr.msk.bf16.vlgmr.msra.gmra.mrb[0].mxu0 %vm23_vm2, %v15_v5 }
  0x82   :  { %v21_v6 = vpop.permute.xlu0 %20 }
  0xd9   :  { %v65_v7 = vpop.f32.mrb[0].mxu0 }
  0xda   :  { %v66_v8 = vadd.f32 %v65_v7, %v21_v6  ;;  %v85_v9 = vpop.f32.mrb[1].mxu0 }
  0xdb   :  { %v68_v10 = vpop.f32.mrb[2].mxu0 }
  0xdc   :  { %v71_v11 = vpack.c.bf16 %v66_v8, %v66_v8  ;;  %v86_v12 = vpop.f32.mrb[3].mxu0 }
  0xde   :  { %73 = vst.msk [vmem:[%s129_s3] sm:$0x3] %vm72_vm3, %v71_v11 }

// kernel: vqvae2_forward.22
= control target key start
LH: loop header
LB: loop body
LE: loop exit
PB: predicated region body
PF: predicated region fallthrough
CT: control target
= control target key end

     0   :  { %vm73_vm0 = vcmask 1041408   ;;  %vm44_vm1 = vcmask 31744   ;;  %s449_s0 = inlined_call_operand.vmem [shape: bf16[4,8], index: 0, kind: input, shape index: {}]   ;;  %s450_s1 = inlined_call_operand.vmem [shape: bf16[32,4], index: 1, kind: input, shape index: {}]   ;;  %s451_s2 = inlined_call_operand.vmem [shape: bf16[4,8], index: 2, kind: output, shape index: {0}]   ;;  %s452_s3 = inlined_call_operand.hbm [shape: f32[1,1], index: 3, kind: output, shape index: {1}]  }
   0x1   :  { %v21_v0 = vld [vmem:[%s449_s0] sm:$0x3]  ;;  %v24_v3 = vld [vmem:[%s450_s1 + $0x8] sm:$0xff]  }
   0x2   :  { %v22_v1 = vld [vmem:[%s450_s1] sm:$0xff]   ;;  %338 = vmatprep.subr.msk.bf16.mxu0 %vm73_vm0, %v21_v0  ;;  %v75_v2 = vsel %vm73_vm0, %v21_v0, 0 }
   0x3   :  { %v27_v4 = vunpack.c.l.bf16 %v22_v1 }
   0x4   :  { %9 = vsyncpa [#allocation3], 0  ;;  %325 = vmatpush3.bf16.msra.mxu0 %v75_v2  ;;  %v29_v5 = vunpack.c.l.bf16 %v24_v3  ;;  %v30_v6 = vunpack.c.h.bf16 %v24_v3  ;;  %v28_v7 = vunpack.c.h.bf16 %v22_v1  ;;  %326 = vmatprep.mubr.msk.bf16.mxu0 %vm44_vm1, %v22_v1  ;;  %vm19_vm2 = vcmask 0   ;;  %s377_s18 = smov [#allocation2]  }
   0x5   :  { %v40_v8 = vmul.f32 %v27_v4, %v27_v4  ;;  %v374_v16 = vmov 0.0   ;;  %vm375_vm3 = vmmov 0   ;;  %v417_v17 = vunpack.c.l.bf16 %v21_v0  ;;  %s295_s19 = sshll.u32 %s377_s18, 4  ;;  %s296_s19 = int_to_ptr.vmem [resolvable:$true] %s295_s19 }
   0x6   :  { %v42_v9 = vmul.f32 %v29_v5, %v29_v5  ;;  %v43_v10 = vmul.f32 %v30_v6, %v30_v6  ;;  %v41_v11 = vmul.f32 %v28_v7, %v28_v7  ;;  %20 = vst.msk [vmem:[#allocation2] sm:$0x1] %vm19_vm2, %v374_v16  ;;  %330 = vmatprep.subr.bf16.mxu1 %v374_v16  ;;  %vm32_vm4 = vcmask 60416   ;;  %s354_s21 = scalar_lea.vmem %s296_s19, 32  ;;  %p355_p1 = scmp.lt.s32.totalorder %s296_s19, %s296_s19 }
   0x7   :  { %327 = vmatmul.mubr.msk.bf16.vlgmr.msra.gmra.mrb[0].mxu0 %vm44_vm1, %v24_v3  ;;  %v45_v12 = vsel %vm44_vm1, %v40_v8, 0.0  ;;  %334 = vmatprep.mubr.msk.bf16.mxu1 %vm375_vm3, %v374_v16  ;;  %v31_v18 = vmul.f32 %v417_v17, %v417_v17  ;;  %vm143_vm5 = vcmask 64512   ;;  %v138_v54 = vlaneseq }
   0x8   :  { %v51_v13 = vsel %vm44_vm1, %v42_v9, 0.0  ;;  %46 = vadd.xlane.f32.xlu0 %v45_v12  ;;  %v48_v14 = vsel %vm44_vm1, %v41_v11, 0.0  ;;  %v54_v15 = vsel %vm44_vm1, %v43_v10, 0.0 }
   0x9   :  { %52 = vadd.xlane.f32.xlu1 %v51_v13  ;;  %v33_v19 = vsel %vm32_vm4, %v31_v18, 0.0  ;;  %v139_v57 = vshrl.u32 %v138_v54, 7 }
   0xa   :  { %v34_v20 = vrot.slane %v33_v19, 4 }
   0xb   :  { %v140_v60 = vadd.s32 8, %v139_v57  ;;  %v141_v61 = vadd.s32 16, %v139_v57  ;;  %v142_v62 = vadd.s32 24, %v139_v57 }
   0xc   :  { %49 = vadd.xlane.f32.xlu0 %v48_v14  ;;  %v35_v21 = vadd.f32 %v34_v20, %v33_v19  ;;  %v376_v19 = vmov 1.0|1.0  }
   0xd   :  { %55 = vadd.xlane.f32.xlu1 %v54_v15 }
   0xe   :  { %v36_v22 = vrot.slane %v35_v21, 2 }
  0x10   :  { %v37_v23 = vadd.f32 %v36_v22, %v35_v21  ;;  %v265_v21 = vand.u32 127, %v138_v54 }
  0x12   :  { %v38_v25 = vrot.slane %v37_v23, 1 }
  0x14   :  { %v39_v28 = vadd.f32 %v38_v25, %v37_v23 }
  0x39   :  { %200 = vxpose.xlu0.c.b16.start [1/2] (short) (narrow) %v22_v1, 16 }
  0x3d   :  { %201 = vxpose.xlu0.c.b16.end [2/2] (short) (narrow) %v24_v3, 16 }
  0x95   :  { %v47_v26 = vpop.xlane.xlu0 %46 }
  0x96   :  { %v53_v24 = vpop.xlane.xlu1 %52 }
  0x99   :  { %v50_v37 = vpop.xlane.xlu0 %49 }
  0x9a   :  { %v56_v33 = vpop.xlane.xlu1 %55 }
  0x9f   :  { %v208_v20 = vpop.trf.xlu0 }
  0xda   :  { %v328_v27 = vpop.f32.mrb[0].mxu0 }
  0xdb   :  { %v128_v29 = vmul.f32 2.0, %v328_v27  ;;  %v111_v30 = vpop.f32.mrb[1].mxu0 }
  0xdc   :  { %v126_v31 = vmul.f32 2.0, %v111_v30  ;;  %v329_v32 = vpop.f32.mrb[2].mxu0 }
  0xdd   :  { %v132_v34 = vsub.f32 %v53_v24, %v128_v29  ;;  %v129_v35 = vmul.f32 2.0, %v329_v32  ;;  %v114_v36 = vpop.f32.mrb[3].mxu0 }
  0xde   :  { %v130_v38 = vsub.f32 %v47_v26, %v126_v31  ;;  %v127_v39 = vmul.f32 2.0, %v114_v36  ;;  %v272_v36 = vld [vmem:[#allocation2] sm:$0x1] }
  0xdf   :  { %v136_v40 = vadd.f32 %v132_v34, %v39_v28  ;;  %v133_v41 = vsub.f32 %v56_v33, %v129_v35 }
  0xe0   :  { %v134_v42 = vadd.f32 %v130_v38, %v39_v28  ;;  %v131_v43 = vsub.f32 %v50_v37, %v127_v39 }
  0xe1   :  { %v137_v44 = vadd.f32 %v133_v41, %v39_v28  ;;  %v146_v46 = vsel %vm143_vm5, %v136_v40, inf }
  0xe2   :  { %v135_v45 = vadd.f32 %v131_v43, %v39_v28  ;;  %v144_v49 = vsel %vm143_vm5, %v134_v42, inf }
  0xe3   :  { %v147_v47 = vsel %vm143_vm5, %v137_v44, inf }
  0xe4   :  { %v149_v48 = vmin.f32 %v146_v46, %v147_v47  ;;  %v145_v50 = vsel %vm143_vm5, %v135_v45, inf }
  0xe5   :  { %v148_v51 = vmin.f32 %v144_v49, %v145_v50 }
  0xe7   :  { %v150_v52 = vmin.f32 %v148_v51, %v149_v48 }
  0xe9   :  { %v151_v53 = vrot.slane %v150_v52, 4 }
  0xeb   :  { %v152_v55 = vmin.f32 %v150_v52, %v151_v53 }
  0xed   :  { %v153_v56 = vrot.slane %v152_v55, 2 }
  0xef   :  { %v154_v58 = vmin.f32 %v152_v55, %v153_v56 }
  0xf1   :  { %v155_v59 = vrot.slane %v154_v58, 1 }
  0xf3   :  { %v156_v63 = vmin.f32 %v154_v58, %v155_v59 }
  0xf5   :  { %vm158_vm6 = vcmp.le.f32.partialorder %v135_v45, %v156_v63  ;;  %vm157_vm7 = vcmp.le.f32.partialorder %v134_v42, %v156_v63  ;;  %vm159_vm8 = vcmp.le.f32.partialorder %v136_v40, %v156_v63  ;;  %vm160_vm9 = vcmp.le.f32.partialorder %v137_v44, %v156_v63 }
  0xf6   :  { %v161_v0 = vsel %vm157_vm7, %v139_v57, 1073741824  ;;  %v162_v1 = vsel %vm158_vm6, %v140_v60, 1073741824  ;;  %v163_v2 = vsel %vm159_vm8, %v141_v61, 1073741824  ;;  %v164_v3 = vsel %vm160_vm9, %v142_v62, 1073741824 }
  0xf7   :  { %v165_v4 = vsel %vm143_vm5, %v161_v0, 2147483647  ;;  %v166_v5 = vsel %vm143_vm5, %v162_v1, 2147483647  ;;  %v167_v6 = vsel %vm143_vm5, %v163_v2, 2147483647 }
  0xf8   :  { %v168_v7 = vsel %vm143_vm5, %v164_v3, 2147483647  ;;  %vm169_vm10 = vcmp.lt.s32.totalorder %v165_v4, %v166_v5  ;;  %vm216_vm8 = vcmask 261120   ;;  %vm261_vm9 = vcmask 58368  }
  0xf9   :  { %v170_v8 = vsel %vm169_vm10, %v165_v4, %v166_v5  ;;  %vm171_vm11 = vcmp.lt.s32.totalorder %v167_v6, %v168_v7  ;;  %vm269_vm10 = vcmp.lt.s32.totalorder %v265_v21, 8 }
  0xfa   :  { %v172_v9 = vsel %vm171_vm11, %v167_v6, %v168_v7 }
  0xfb   :  { %vm173_vm12 = vcmp.lt.s32.totalorder %v170_v8, %v172_v9 }
  0xfc   :  { %v174_v10 = vsel %vm173_vm12, %v170_v8, %v172_v9 }
  0xfd   :  { %v175_v11 = vrot.slane %v174_v10, 4 }
  0xff   :  { %vm176_vm13 = vcmp.lt.s32.totalorder %v174_v10, %v175_v11 }
 0x100   :  { %v177_v12 = vsel %vm176_vm13, %v174_v10, %v175_v11 }
 0x101   :  { %v178_v13 = vrot.slane %v177_v12, 2 }
 0x103   :  { %vm179_vm14 = vcmp.lt.s32.totalorder %v177_v12, %v178_v13 }
 0x104   :  { %v180_v14 = vsel %vm179_vm14, %v177_v12, %v178_v13 }
 0x105   :  { %v181_v15 = vrot.slane %v180_v14, 1 }
 0x107   :  { %vm182_vm15 = vcmp.lt.s32.totalorder %v180_v14, %v181_v15 }
 0x108   :  { %v183_v18 = vsel %vm182_vm15, %v180_v14, %v181_v15 }
 0x109   :  { %vm184_vm0 = vcmp.eq.s32.totalorder %v139_v57, %v183_v18  ;;  %vm185_vm1 = vcmp.eq.s32.totalorder %v140_v60, %v183_v18  ;;  %vm186_vm5 = vcmp.eq.s32.totalorder %v141_v61, %v183_v18  ;;  %vm187_vm6 = vcmp.eq.s32.totalorder %v142_v62, %v183_v18 }
 0x10a   :  { %vm313_vm3 = vmpackc.low %vm185_vm1, %vm184_vm0 }
 0x10b   :  { %331 = vmatpush3.bf16.msk.msra.mxu1 %vm313_vm3, %v376_v19  ;;  %vm315_vm7 = vmpackc.low %vm187_vm6, %vm186_vm5 }
 0x10c   :  { %332 = vmatprep.subr.bf16.mxu1 %v374_v16 }
 0x10f   :  { %333 = vmatpush3.bf16.msk.msra.mxu1 %vm315_vm7, %v376_v19 }
 0x112   :  { %335 = vmatmul.mubr.msk.bf16.vlgmr.msra.gmra.mrb[0].mxu1 %vm216_vm8, %v208_v20 }
 0x1e5   :  { %v254_v22 = vpop.f32.mrb[0].mxu1 }
 0x1e6   :  { %v260_v23 = vpack.c.bf16 %v254_v22, %v254_v22  ;;  %v268_v24 = vsub.f32 %v254_v22, %v417_v17  ;;  %v336_v25 = vpop.f32.mrb[1].mxu1 }
 0x1e7   :  { %v257_v26 = vpop.f32.mrb[2].mxu1 }
 0x1e8   :  { %262 = vst.msk [vmem:[%s451_s2] sm:$0x3] %vm261_vm9, %v260_v23  ;;  %v270_v27 = vmul.f32 %v268_v24, %v268_v24  ;;  %v337_v16 = vpop.f32.mrb[3].mxu1  ;;  %s350_s2 = scalar_lea.vmem %s296_s19, 16 }
 0x1e9   :  { %p351_p0 = scmp.ne.s32.totalorder %s296_s19, %s350_s2  ;;  %p356_p2 = scmp.lt.s32.totalorder %s354_s21, %s350_s2 }
 0x1ea   :  { %v271_v28 = vsel %vm269_vm10, %v270_v27, 0.0 }
 0x1eb   :  { %v273_v29 = vsel %vm32_vm4, %v271_v28, 0.0  ;;  %p357_p3 = por %p356_p2, %p355_p1 }
 0x1ec   :  { %274 = vadd.xlane.f32.xlu1 %v273_v29 }
 0x1ed   :  { %p358_p4 = pnand %p357_p3, %p351_p0 }
 0x279   :  { %v275_v30 = vpop.xlane.xlu1 %274 }
 0x27a   :  { %v276_v31 = vrot.slane %v275_v30, 4 }
 0x27c   :  { %v277_v32 = vadd.f32 %v276_v31, %v275_v30 }
 0x27e   :  { %v278_v33 = vrot.slane %v277_v32, 2 }
 0x280   :  { %v279_v34 = vadd.f32 %v278_v33, %v277_v32 }
 0x282   :  { %v280_v35 = vrot.slane %v279_v34, 1 }
 0x284   :  { %v281_v17 = vadd.f32 %v280_v35, %v279_v34 }
 0x286   :  { %339 = vpush %v281_v17 }
 0x2b7   :  { %s340_s20 = spop %339 }
 0x2b8   :  { %v283_v37 = vstv %s340_s20 }
 0x2b9   :  { %v284_v38 = vadd.f32 %v283_v37, %v272_v36 }
 0x2bb   :  { %286 = vst.msk [vmem:[#allocation2] sm:$0x1] %vm19_vm2, %v284_v38 }
 0x2bc   :  { %361 = shalt.err (!%p358_p4)
}
 0x2bd   :  { %s362_s24 = scalar_lea.hbm %s452_s3, 16 }
 0x2be   :  { %p363_p5 = scmp.ne.s32.totalorder %s452_s3, %s362_s24  ;;  %p366_p6 = scmp.lt.u32.totalorder %s362_s24, %s452_s3 }
 0x2c0   :  { %p368_p7 = pnand %p366_p6, %p363_p5 }
 0x2c2   :  { %371 = shalt.err (!%p368_p7)
}
 0x2c3   :  { %298 = dma.vmem_to_hbm [thread:$0]  %s296_s19, 16, %s452_s3, [#allocation3]  }
 0x2c4   :  { %372 = dma.done.wait [#allocation3], 16  }
 0x2c5   :  { %373 = vsyncadd [#allocation3], 4294967280 }
 0x2c6   :  { %304 = vsyncpa [#allocation3], 1 }

// kernel: vqvae2_forward.24
= control target key start
LH: loop header
LB: loop body
LE: loop exit
PB: predicated region body
PF: predicated region fallthrough
CT: control target
= control target key end

     0   :  { %v199_v0 = vmov 0.0   ;;  %vm200_vm0 = vmmov 0   ;;  %v201_v2 = vmov 0   ;;  %vm55_vm1 = vcmask 1041408   ;;  %s266_s1 = inlined_call_operand.vmem [shape: bf16[36,8], index: 1, kind: input, shape index: {}]   ;;  %s267_s2 = inlined_call_operand.vmem [shape: f32[4,1], index: 2, kind: input, shape index: {}]   ;;  %s268_s4 = inlined_call_operand.vmem [shape: f32[4,1], index: 4, kind: input, shape index: {}]   ;;  %s269_s0 = inlined_call_operand.vmem [shape: bf16[4,36], index: 0, kind: input, shape index: {}]   ;;  %s270_s3 = inlined_call_operand.vmem [shape: bf16[4,4], index: 3, kind: input, shape index: {}]   ;;  %s271_s5 = inlined_call_operand.vmem [shape: bf16[4,8], index: 5, kind: input, shape index: {}]   ;;  %s272_s6 = inlined_call_operand.vmem [shape: bf16[4,8], index: 6, kind: output, shape index: {}]  }
   0x1   :  { %176 = vmatprep.subr.bf16.mxu0 %v199_v0  ;;  %v196_v1 = vld [vmem:[%s266_s1] sm:$0xff]   ;;  %182 = vmatprep.mubr.msk.bf16.mxu0 %vm200_vm0, %v199_v0  ;;  %v197_v3 = vld [vmem:[%s266_s1 + $0x8] sm:$0xff]   ;;  %v198_v4 = vld [vmem:[%s266_s1 + $0x10] ss:$0 sps:$4 sm:$0x33]   ;;  %vm51_vm2 = vcmask 293888  }
   0x2   :  { %195 = vset.pattern.permute.xlu0 %v201_v2  ;;  %186 = vmatprep.subr.bf16.mxu1 %v199_v0  ;;  %v30_v5 = vld [vmem:[%s267_s2] sm:$0xf]  ;;  %v57_v7 = vsel %vm55_vm1, %v198_v4, 0  ;;  %vm108_vm3 = vcmask 31744   ;;  %vm159_vm4 = vcmask 58368  }
   0x3   :  { %177 = vmatpush3.bf16.msra.mxu0 %v196_v1  ;;  %188 = vmatprep.mubr.msk.bf16.mxu1 %vm200_vm0, %v199_v0  ;;  %v102_v6 = vld [vmem:[%s268_s4] sm:$0xf] }
   0x4   :  { %178 = vmatprep.subr.bf16.mxu0 %v199_v0  ;;  %33 = vperm.xlu0 %195, %v30_v5   ;;  %v24_v8 = vld [vmem:[%s269_s0] sm:$0x3] }
   0x5   :  { %v100_v18 = vld [vmem:[%s270_s3] sm:$0x3] }
   0x6   :  { %v155_v19 = vld [vmem:[%s271_s5] sm:$0x3] }
   0x7   :  { %179 = vmatpush3.bf16.msra.mxu0 %v197_v3  ;;  %v156_v20 = vunpack.c.l.bf16 %v155_v19 }
   0x8   :  { %180 = vmatprep.subr.bf16.mxu0 %v199_v0  ;;  %105 = vperm.xlu0 %195, %v102_v6  }
   0xb   :  { %181 = vmatpush3.bf16.msra.mxu0 %v57_v7 }
   0xe   :  { %183 = vmatmul.mubr.msk.bf16.vlgmr.msra.gmra.mrb[0].mxu0 %vm51_vm2, %v24_v8 }
  0x83   :  { %v34_v9 = vpop.permute.xlu0 %33 }
  0x87   :  { %v106_v21 = vpop.permute.xlu0 %105 }
  0xe1   :  { %v93_v10 = vpop.f32.mrb[0].mxu0 }
  0xe2   :  { %v94_v11 = vadd.f32 %v93_v10, %v34_v9  ;;  %v184_v12 = vpop.f32.mrb[1].mxu0 }
  0xe3   :  { %v96_v13 = vpop.f32.mrb[2].mxu0 }
  0xe4   :  { %v99_v14 = vmax.f32 %v94_v11, 0.0  ;;  %v185_v15 = vpop.f32.mrb[3].mxu0 }
  0xe6   :  { %v101_v16 = vpack.c.bf16 %v99_v14, %v99_v14 }
  0xe8   :  { %v113_v17 = vsel %vm55_vm1, %v101_v16, 0 }
  0xe9   :  { %187 = vmatpush3.bf16.msra.mxu1 %v113_v17 }
  0xec   :  { %189 = vmatmul.mubr.msk.bf16.vlgmr.msra.gmra.mrb[0].mxu1 %vm108_vm3, %v100_v18 }
 0x1bf   :  { %v149_v22 = vpop.f32.mrb[0].mxu1 }
 0x1c0   :  { %v150_v23 = vadd.f32 %v149_v22, %v106_v21  ;;  %v190_v24 = vpop.f32.mrb[1].mxu1 }
 0x1c1   :  { %v152_v25 = vpop.f32.mrb[2].mxu1 }
 0x1c2   :  { %v157_v26 = vadd.f32 %v156_v20, %v150_v23  ;;  %v191_v27 = vpop.f32.mrb[3].mxu1 }
 0x1c4   :  { %v158_v28 = vpack.c.bf16 %v157_v26, %v157_v26 }
 0x1c6   :  { %160 = vst.msk [vmem:[%s272_s6] sm:$0x3] %vm159_vm4, %v158_v28 }

// kernel: vqvae2_forward.25
= control target key start
LH: loop header
LB: loop body
LE: loop exit
PB: predicated region body
PF: predicated region fallthrough
CT: control target
= control target key end

     0   :  { %v122_v0 = vmov 0.0   ;;  %vm123_vm0 = vmmov 0   ;;  %v124_v2 = vmov 0   ;;  %vm46_vm1 = vcmask 1041408   ;;  %s163_s1 = inlined_call_operand.vmem [shape: bf16[36,32], index: 1, kind: input, shape index: {}]   ;;  %s164_s2 = inlined_call_operand.vmem [shape: f32[4,1], index: 2, kind: input, shape index: {}]   ;;  %s165_s0 = inlined_call_operand.vmem [shape: bf16[4,36], index: 0, kind: input, shape index: {}]   ;;  %s166_s3 = inlined_call_operand.vmem [shape: bf16[4,32], index: 3, kind: output, shape index: {}]  }
   0x1   :  { %105 = vmatprep.subr.bf16.mxu0 %v122_v0  ;;  %v119_v1 = vld [vmem:[%s163_s1] sm:$0xff]   ;;  %111 = vmatprep.mubr.msk.bf16.mxu0 %vm123_vm0, %v122_v0  ;;  %v120_v3 = vld [vmem:[%s163_s1 + $0x8] sm:$0xff]   ;;  %v121_v4 = vld [vmem:[%s163_s1 + $0x10] ss:$0 sps:$4 sm:$0x33]   ;;  %vm42_vm2 = vcmask 293888  }
   0x2   :  { %118 = vset.pattern.permute.xlu0 %v124_v2  ;;  %106 = vmatpush3.bf16.msra.mxu0 %v119_v1  ;;  %v21_v5 = vld [vmem:[%s164_s2] sm:$0xf]  ;;  %v48_v6 = vsel %vm46_vm1, %v121_v4, 0  ;;  %vm91_vm3 = vcmask 254976  }
   0x3   :  { %107 = vmatprep.subr.bf16.mxu0 %v122_v0  ;;  %24 = vperm.xlu0 %118, %v21_v5   ;;  %v15_v7 = vld [vmem:[%s165_s0] sm:$0x3] }
   0x6   :  { %108 = vmatpush3.bf16.msra.mxu0 %v120_v3 }
   0x7   :  { %109 = vmatprep.subr.bf16.mxu0 %v122_v0 }
   0xa   :  { %110 = vmatpush3.bf16.msra.mxu0 %v48_v6 }
   0xd   :  { %112 = vmatmul.mubr.msk.bf16.vlgmr.msra.gmra.mrb[0].mxu0 %vm42_vm2, %v15_v7 }
  0x82   :  { %v25_v8 = vpop.permute.xlu0 %24 }
  0xe0   :  { %v84_v9 = vpop.f32.mrb[0].mxu0 }
  0xe1   :  { %v85_v10 = vadd.f32 %v84_v9, %v25_v8  ;;  %v113_v11 = vpop.f32.mrb[1].mxu0 }
  0xe2   :  { %v87_v12 = vpop.f32.mrb[2].mxu0 }
  0xe3   :  { %v90_v13 = vpack.c.bf16 %v85_v10, %v85_v10  ;;  %v114_v14 = vpop.f32.mrb[3].mxu0 }
  0xe5   :  { %92 = vst.msk [vmem:[%s166_s3] sm:$0x3] %vm91_vm3, %v90_v13 }

// kernel: vqvae2_forward.20
= control target key start
LH: loop header
LB: loop body
LE: loop exit
PB: predicated region body
PF: predicated region fallthrough
CT: control target
= control target key end

     0   :  { %vm27_vm0 = vcmask 1043456   ;;  %v91_v0 = vmov 0.0   ;;  %vm92_vm1 = vmmov 0   ;;  %v93_v3 = vmov 0   ;;  %s126_s1 = inlined_call_operand.vmem [shape: bf16[8,32], index: 1, kind: input, shape index: {}]   ;;  %s127_s0 = inlined_call_operand.vmem [shape: bf16[4,8], index: 0, kind: input, shape index: {}]   ;;  %s128_s2 = inlined_call_operand.vmem [shape: f32[4,1], index: 2, kind: input, shape index: {}]   ;;  %s129_s3 = inlined_call_operand.vmem [shape: bf16[4,32], index: 3, kind: output, shape index: {}]  }
   0x1   :  { %81 = vmatprep.subr.bf16.mxu0 %v91_v0  ;;  %v16_v1 = vld [vmem:[%s126_s1] sm:$0xf]  ;;  %83 = vmatprep.mubr.msk.bf16.mxu0 %vm92_vm1, %v91_v0  ;;  %vm23_vm2 = vcmask 64512   ;;  %vm72_vm3 = vcmask 254976  }
   0x2   :  { %v29_v2 = vsel %vm27_vm0, %v16_v1, 0  ;;  %90 = vset.pattern.permute.xlu0 %v93_v3  ;;  %v17_v4 = vld [vmem:[%s128_s2] sm:$0xf] }
   0x3   :  { %82 = vmatpush3.bf16.msra.mxu0 %v29_v2  ;;  %v15_v5 = vld [vmem:[%s127_s0] sm:$0x3]  ;;  %20 = vperm.xlu0 %90, %v17_v4  }
   0x6   :  { %84 = vmatmul.mubr.msk.bf16.vlgmr.msra.gmra.mrb[0].mxu0 %vm23_vm2, %v15_v5 }
  0x82   :  { %v21_v6 = vpop.permute.xlu0 %20 }
  0xd9   :  { %v65_v7 = vpop.f32.mrb[0].mxu0 }
  0xda   :  { %v66_v8 = vadd.f32 %v65_v7, %v21_v6  ;;  %v85_v9 = vpop.f32.mrb[1].mxu0 }
  0xdb   :  { %v68_v10 = vpop.f32.mrb[2].mxu0 }
  0xdc   :  { %v71_v11 = vpack.c.bf16 %v66_v8, %v66_v8  ;;  %v86_v12 = vpop.f32.mrb[3].mxu0 }
  0xde   :  { %73 = vst.msk [vmem:[%s129_s3] sm:$0x3] %vm72_vm3, %v71_v11 }

// kernel: vqvae2_forward.26
= control target key start
LH: loop header
LB: loop body
LE: loop exit
PB: predicated region body
PF: predicated region fallthrough
CT: control target
= control target key end

     0   :  { %vm73_vm0 = vcmask 1043456   ;;  %vm44_vm1 = vcmask 64512   ;;  %s448_s0 = inlined_call_operand.vmem [shape: bf16[8,32], index: 0, kind: input, shape index: {}]   ;;  %s449_s1 = inlined_call_operand.vmem [shape: bf16[32,8], index: 1, kind: input, shape index: {}]   ;;  %s450_s2 = inlined_call_operand.vmem [shape: bf16[8,32], index: 2, kind: output, shape index: {0}]   ;;  %s451_s3 = inlined_call_operand.hbm [shape: f32[1,1], index: 3, kind: output, shape index: {1}]  }
   0x1   :  { %v21_v0 = vld [vmem:[%s448_s0] sm:$0xf]  ;;  %v24_v3 = vld [vmem:[%s449_s1 + $0x8] sm:$0xff]  }
   0x2   :  { %v22_v1 = vld [vmem:[%s449_s1] sm:$0xff]   ;;  %336 = vmatprep.subr.msk.bf16.mxu0 %vm73_vm0, %v21_v0  ;;  %v75_v2 = vsel %vm73_vm0, %v21_v0, 0 }
   0x3   :  { %v27_v4 = vunpack.c.l.bf16 %v22_v1 }
   0x4   :  { %9 = vsyncpa [#allocation3], 0  ;;  %323 = vmatpush3.bf16.msra.mxu0 %v75_v2  ;;  %v29_v5 = vunpack.c.l.bf16 %v24_v3  ;;  %v30_v6 = vunpack.c.h.bf16 %v24_v3  ;;  %v28_v7 = vunpack.c.h.bf16 %v22_v1  ;;  %324 = vmatprep.mubr.msk.bf16.mxu0 %vm44_vm1, %v22_v1  ;;  %vm19_vm2 = vcmask 0   ;;  %s375_s18 = smov [#allocation2]  }
   0x5   :  { %v40_v8 = vmul.f32 %v27_v4, %v27_v4  ;;  %v372_v16 = vmov 0.0   ;;  %vm373_vm3 = vmmov 0   ;;  %v415_v17 = vunpack.c.l.bf16 %v21_v0  ;;  %s293_s19 = sshll.u32 %s375_s18, 4  ;;  %s294_s19 = int_to_ptr.vmem [resolvable:$true] %s293_s19 }
   0x6   :  { %v42_v9 = vmul.f32 %v29_v5, %v29_v5  ;;  %v43_v10 = vmul.f32 %v30_v6, %v30_v6  ;;  %v41_v11 = vmul.f32 %v28_v7, %v28_v7  ;;  %20 = vst.msk [vmem:[#allocation2] sm:$0x1] %vm19_vm2, %v372_v16  ;;  %328 = vmatprep.subr.bf16.mxu1 %v372_v16  ;;  %vm32_vm4 = vcmask 261120   ;;  %s352_s21 = scalar_lea.vmem %s294_s19, 32  ;;  %p353_p1 = scmp.lt.s32.totalorder %s294_s19, %s294_s19 }
   0x7   :  { %325 = vmatmul.mubr.msk.bf16.vlgmr.msra.gmra.mrb[0].mxu0 %vm44_vm1, %v24_v3  ;;  %v45_v12 = vsel %vm44_vm1, %v40_v8, 0.0  ;;  %332 = vmatprep.mubr.msk.bf16.mxu1 %vm373_vm3, %v372_v16  ;;  %v31_v18 = vmul.f32 %v415_v17, %v415_v17  ;;  %v138_v54 = vlaneseq }
   0x8   :  { %v51_v13 = vsel %vm44_vm1, %v42_v9, 0.0  ;;  %46 = vadd.xlane.f32.xlu0 %v45_v12  ;;  %v48_v14 = vsel %vm44_vm1, %v41_v11, 0.0  ;;  %v54_v15 = vsel %vm44_vm1, %v43_v10, 0.0 }
   0x9   :  { %52 = vadd.xlane.f32.xlu1 %v51_v13  ;;  %v33_v19 = vsel %vm32_vm4, %v31_v18, 0.0  ;;  %v139_v57 = vshrl.u32 %v138_v54, 7 }
   0xa   :  { %v34_v20 = vrot.slane %v33_v19, 4 }
   0xb   :  { %v140_v60 = vadd.s32 8, %v139_v57  ;;  %v141_v61 = vadd.s32 16, %v139_v57  ;;  %v142_v62 = vadd.s32 24, %v139_v57 }
   0xc   :  { %49 = vadd.xlane.f32.xlu0 %v48_v14  ;;  %v35_v21 = vadd.f32 %v34_v20, %v33_v19  ;;  %v374_v19 = vmov 1.0|1.0  }
   0xd   :  { %55 = vadd.xlane.f32.xlu1 %v54_v15 }
   0xe   :  { %v36_v22 = vrot.slane %v35_v21, 2 }
  0x10   :  { %v37_v23 = vadd.f32 %v36_v22, %v35_v21  ;;  %v263_v21 = vand.u32 127, %v138_v54 }
  0x12   :  { %v38_v25 = vrot.slane %v37_v23, 1 }
  0x14   :  { %v39_v28 = vadd.f32 %v38_v25, %v37_v23 }
  0x39   :  { %199 = vxpose.xlu0.c.b16.start [1/2] (short) (narrow) %v22_v1, 16 }
  0x3d   :  { %200 = vxpose.xlu0.c.b16.end [2/2] (short) (narrow) %v24_v3, 16 }
  0x95   :  { %v47_v26 = vpop.xlane.xlu0 %46 }
  0x96   :  { %v53_v24 = vpop.xlane.xlu1 %52 }
  0x99   :  { %v50_v37 = vpop.xlane.xlu0 %49 }
  0x9a   :  { %v56_v33 = vpop.xlane.xlu1 %55 }
  0x9f   :  { %v207_v20 = vpop.trf.xlu0 }
  0xda   :  { %v326_v27 = vpop.f32.mrb[0].mxu0 }
  0xdb   :  { %v128_v29 = vmul.f32 2.0, %v326_v27  ;;  %v111_v30 = vpop.f32.mrb[1].mxu0 }
  0xdc   :  { %v126_v31 = vmul.f32 2.0, %v111_v30  ;;  %v327_v32 = vpop.f32.mrb[2].mxu0 }
  0xdd   :  { %v132_v34 = vsub.f32 %v53_v24, %v128_v29  ;;  %v129_v35 = vmul.f32 2.0, %v327_v32  ;;  %v114_v36 = vpop.f32.mrb[3].mxu0 }
  0xde   :  { %v130_v38 = vsub.f32 %v47_v26, %v126_v31  ;;  %v127_v39 = vmul.f32 2.0, %v114_v36  ;;  %v270_v36 = vld [vmem:[#allocation2] sm:$0x1] }
  0xdf   :  { %v136_v40 = vadd.f32 %v132_v34, %v39_v28  ;;  %v133_v41 = vsub.f32 %v56_v33, %v129_v35 }
  0xe0   :  { %v134_v42 = vadd.f32 %v130_v38, %v39_v28  ;;  %v131_v43 = vsub.f32 %v50_v37, %v127_v39 }
  0xe1   :  { %v137_v44 = vadd.f32 %v133_v41, %v39_v28  ;;  %v145_v46 = vsel %vm32_vm4, %v136_v40, inf }
  0xe2   :  { %v135_v45 = vadd.f32 %v131_v43, %v39_v28  ;;  %v143_v49 = vsel %vm32_vm4, %v134_v42, inf }
  0xe3   :  { %v146_v47 = vsel %vm32_vm4, %v137_v44, inf }
  0xe4   :  { %v148_v48 = vmin.f32 %v145_v46, %v146_v47  ;;  %v144_v50 = vsel %vm32_vm4, %v135_v45, inf }
  0xe5   :  { %v147_v51 = vmin.f32 %v143_v49, %v144_v50 }
  0xe7   :  { %v149_v52 = vmin.f32 %v147_v51, %v148_v48 }
  0xe9   :  { %v150_v53 = vrot.slane %v149_v52, 4 }
  0xeb   :  { %v151_v55 = vmin.f32 %v149_v52, %v150_v53 }
  0xed   :  { %v152_v56 = vrot.slane %v151_v55, 2 }
  0xef   :  { %v153_v58 = vmin.f32 %v151_v55, %v152_v56 }
  0xf1   :  { %v154_v59 = vrot.slane %v153_v58, 1 }
  0xf3   :  { %v155_v63 = vmin.f32 %v153_v58, %v154_v59 }
  0xf5   :  { %vm157_vm5 = vcmp.le.f32.partialorder %v135_v45, %v155_v63  ;;  %vm156_vm6 = vcmp.le.f32.partialorder %v134_v42, %v155_v63  ;;  %vm158_vm7 = vcmp.le.f32.partialorder %v136_v40, %v155_v63  ;;  %vm159_vm8 = vcmp.le.f32.partialorder %v137_v44, %v155_v63 }
  0xf6   :  { %v160_v0 = vsel %vm156_vm6, %v139_v57, 1073741824  ;;  %v161_v1 = vsel %vm157_vm5, %v140_v60, 1073741824  ;;  %v162_v2 = vsel %vm158_vm7, %v141_v61, 1073741824  ;;  %v163_v3 = vsel %vm159_vm8, %v142_v62, 1073741824 }
  0xf7   :  { %v164_v4 = vsel %vm32_vm4, %v160_v0, 2147483647  ;;  %v165_v5 = vsel %vm32_vm4, %v161_v1, 2147483647  ;;  %v166_v6 = vsel %vm32_vm4, %v162_v2, 2147483647 }
  0xf8   :  { %v167_v7 = vsel %vm32_vm4, %v163_v3, 2147483647  ;;  %vm168_vm9 = vcmp.lt.s32.totalorder %v164_v4, %v165_v5  ;;  %vm259_vm7 = vcmask 257024   ;;  %vm267_vm8 = vcmp.lt.s32.totalorder %v263_v21, 32 }
  0xf9   :  { %v169_v8 = vsel %vm168_vm9, %v164_v4, %v165_v5  ;;  %vm170_vm10 = vcmp.lt.s32.totalorder %v166_v6, %v167_v7 }
  0xfa   :  { %v171_v9 = vsel %vm170_vm10, %v166_v6, %v167_v7 }
  0xfb   :  { %vm172_vm11 = vcmp.lt.s32.totalorder %v169_v8, %v171_v9 }
  0xfc   :  { %v173_v10 = vsel %vm172_vm11, %v169_v8, %v171_v9 }
  0xfd   :  { %v174_v11 = vrot.slane %v173_v10, 4 }
  0xff   :  { %vm175_vm12 = vcmp.lt.s32.totalorder %v173_v10, %v174_v11 }
 0x100   :  { %v176_v12 = vsel %vm175_vm12, %v173_v10, %v174_v11 }
 0x101   :  { %v177_v13 = vrot.slane %v176_v12, 2 }
 0x103   :  { %vm178_vm13 = vcmp.lt.s32.totalorder %v176_v12, %v177_v13 }
 0x104   :  { %v179_v14 = vsel %vm178_vm13, %v176_v12, %v177_v13 }
 0x105   :  { %v180_v15 = vrot.slane %v179_v14, 1 }
 0x107   :  { %vm181_vm14 = vcmp.lt.s32.totalorder %v179_v14, %v180_v15 }
 0x108   :  { %v182_v18 = vsel %vm181_vm14, %v179_v14, %v180_v15 }
 0x109   :  { %vm183_vm15 = vcmp.eq.s32.totalorder %v139_v57, %v182_v18  ;;  %vm184_vm0 = vcmp.eq.s32.totalorder %v140_v60, %v182_v18  ;;  %vm185_vm3 = vcmp.eq.s32.totalorder %v141_v61, %v182_v18  ;;  %vm186_vm5 = vcmp.eq.s32.totalorder %v142_v62, %v182_v18 }
 0x10a   :  { %vm311_vm1 = vmpackc.low %vm184_vm0, %vm183_vm15 }
 0x10b   :  { %329 = vmatpush3.bf16.msk.msra.mxu1 %vm311_vm1, %v374_v19  ;;  %vm313_vm6 = vmpackc.low %vm186_vm5, %vm185_vm3 }
 0x10c   :  { %330 = vmatprep.subr.bf16.mxu1 %v372_v16 }
 0x10f   :  { %331 = vmatpush3.bf16.msk.msra.mxu1 %vm313_vm6, %v374_v19 }
 0x112   :  { %333 = vmatmul.mubr.msk.bf16.vlgmr.msra.gmra.mrb[0].mxu1 %vm32_vm4, %v207_v20 }
 0x1e5   :  { %v252_v22 = vpop.f32.mrb[0].mxu1 }
 0x1e6   :  { %v258_v23 = vpack.c.bf16 %v252_v22, %v252_v22  ;;  %v266_v24 = vsub.f32 %v252_v22, %v415_v17  ;;  %v334_v25 = vpop.f32.mrb[1].mxu1 }
 0x1e7   :  { %v255_v26 = vpop.f32.mrb[2].mxu1 }
 0x1e8   :  { %260 = vst.msk [vmem:[%s450_s2] sm:$0xf] %vm259_vm7, %v258_v23  ;;  %v268_v27 = vmul.f32 %v266_v24, %v266_v24  ;;  %v335_v16 = vpop.f32.mrb[3].mxu1  ;;  %s348_s2 = scalar_lea.vmem %s294_s19, 16 }
 0x1e9   :  { %p349_p0 = scmp.ne.s32.totalorder %s294_s19, %s348_s2  ;;  %p354_p2 = scmp.lt.s32.totalorder %s352_s21, %s348_s2 }
 0x1ea   :  { %v269_v28 = vsel %vm267_vm8, %v268_v27, 0.0 }
 0x1eb   :  { %v271_v29 = vsel %vm32_vm4, %v269_v28, 0.0  ;;  %p355_p3 = por %p354_p2, %p353_p1 }
 0x1ec   :  { %272 = vadd.xlane.f32.xlu1 %v271_v29 }
 0x1ed   :  { %p356_p4 = pnand %p355_p3, %p349_p0 }
 0x279   :  { %v273_v30 = vpop.xlane.xlu1 %272 }
 0x27a   :  { %v274_v31 = vrot.slane %v273_v30, 4 }
 0x27c   :  { %v275_v32 = vadd.f32 %v274_v31, %v273_v30 }
 0x27e   :  { %v276_v33 = vrot.slane %v275_v32, 2 }
 0x280   :  { %v277_v34 = vadd.f32 %v276_v33, %v275_v32 }
 0x282   :  { %v278_v35 = vrot.slane %v277_v34, 1 }
 0x284   :  { %v279_v17 = vadd.f32 %v278_v35, %v277_v34 }
 0x286   :  { %337 = vpush %v279_v17 }
 0x2b7   :  { %s338_s20 = spop %337 }
 0x2b8   :  { %v281_v37 = vstv %s338_s20 }
 0x2b9   :  { %v282_v38 = vadd.f32 %v281_v37, %v270_v36 }
 0x2bb   :  { %284 = vst.msk [vmem:[#allocation2] sm:$0x1] %vm19_vm2, %v282_v38 }
 0x2bc   :  { %359 = shalt.err (!%p356_p4)
}
 0x2bd   :  { %s360_s24 = scalar_lea.hbm %s451_s3, 16 }
 0x2be   :  { %p361_p5 = scmp.ne.s32.totalorder %s451_s3, %s360_s24  ;;  %p364_p6 = scmp.lt.u32.totalorder %s360_s24, %s451_s3 }
 0x2c0   :  { %p366_p7 = pnand %p364_p6, %p361_p5 }
 0x2c2   :  { %369 = shalt.err (!%p366_p7)
}
 0x2c3   :  { %296 = dma.vmem_to_hbm [thread:$0]  %s294_s19, 16, %s451_s3, [#allocation3]  }
 0x2c4   :  { %370 = dma.done.wait [#allocation3], 16  }
 0x2c5   :  { %371 = vsyncadd [#allocation3], 4294967280 }
 0x2c6   :  { %302 = vsyncpa [#allocation3], 1 }

// kernel: vqvae2_forward.27
= control target key start
LH: loop header
LB: loop body
LE: loop exit
PB: predicated region body
PF: predicated region fallthrough
CT: control target
= control target key end

     0   :  { %v302_v0 = vmov 0.0   ;;  %vm303_vm0 = vmmov 0   ;;  %v304_v2 = vmov 0   ;;  %vm102_vm1 = vcmask 1045504   ;;  %s393_s1 = inlined_call_operand.vmem [shape: bf16[108,32], index: 1, kind: input, shape index: {}]   ;;  %s394_s2 = inlined_call_operand.vmem [shape: f32[12,1], index: 2, kind: input, shape index: {}]   ;;  %s395_s0 = inlined_call_operand.vmem [shape: bf16[12,108], index: 0, kind: input, shape index: {}]   ;;  %s396_s3 = inlined_call_operand.vmem [shape: bf16[12,12], index: 3, kind: input, shape index: {}]   ;;  %s397_s4 = inlined_call_operand.vmem [shape: f32[12,1], index: 4, kind: input, shape index: {}]   ;;  %s398_s5 = inlined_call_operand.vmem [shape: bf16[12,32], index: 5, kind: input, shape index: {}]   ;;  %s399_s6 = inlined_call_operand.vmem [shape: bf16[12,32], index: 6, kind: output, shape index: {}]  }
   0x1   :  { %264 = vmatprep.subr.bf16.mxu0 %v302_v0  ;;  %v293_v1 = vld [vmem:[%s393_s1] sm:$0xff]   ;;  %278 = vmatprep.mubr.msk.bf16.mxu0 %vm303_vm0, %v302_v0  ;;  %v294_v3 = vld [vmem:[%s393_s1 + $0x8] sm:$0xff]   ;;  %v295_v4 = vld [vmem:[%s393_s1 + $0x10] sm:$0xff]   ;;  %vm98_vm2 = vcmask 883712   ;;  %vm169_vm3 = vcmask 97280   ;;  %vm231_vm4 = vcmask 257024  }
   0x2   :  { %291 = vset.pattern.permute.xlu0 %v304_v2  ;;  %282 = vmatprep.subr.bf16.mxu1 %v302_v0  ;;  %v40_v5 = vld [vmem:[%s394_s2] sm:$0xff]  ;;  %v296_v6 = vld [vmem:[%s393_s1 + $0x18] sm:$0xff]   ;;  %v41_v7 = vld [vmem:[%s394_s2 + $0x8] sm:$0xf]  ;;  %vm233_vm5 = vcmask 254976  }
   0x3   :  { %265 = vmatpush3.bf16.msra.mxu0 %v293_v1  ;;  %284 = vmatprep.mubr.msk.bf16.mxu1 %vm303_vm0, %v302_v0  ;;  %v297_v8 = vld [vmem:[%s393_s1 + $0x20] sm:$0xff]   ;;  %v298_v9 = vld [vmem:[%s393_s1 + $0x28] sm:$0xff]   ;;  %v299_v10 = vld [vmem:[%s393_s1 + $0x30] sm:$0x3f]  }
   0x4   :  { %266 = vmatprep.subr.bf16.mxu0 %v302_v0  ;;  %292 = vset.pattern.permute.xlu1 %v304_v2  ;;  %v104_v11 = vsel %vm102_vm1, %v299_v10, 0  ;;  %v300_v12 = vld [vmem:[%s395_s0] sm:$0x3f]   ;;  %v153_v14 = vld [vmem:[%s397_s4 + $0x8] sm:$0xf] }
   0x5   :  { %44 = vperm.xlu0 %291, %v40_v5   ;;  %v152_v13 = vld [vmem:[%s397_s4] sm:$0xff] }
   0x6   :  { %156 = vperm.xlu1 %292, %v152_v13   ;;  %v301_v27 = vld [vmem:[%s396_s3] sm:$0x3f]  }
   0x7   :  { %267 = vmatpush3.bf16.msra.mxu0 %v294_v3  ;;  %v217_v29 = vld [vmem:[%s398_s5] sm:$0xf]  ;;  %v218_v30 = vld [vmem:[%s398_s5 + $0x4] sm:$0x3] }
   0x8   :  { %268 = vmatprep.subr.bf16.mxu0 %v302_v0  ;;  %v219_v31 = vunpack.c.l.bf16 %v217_v29  ;;  %v220_v35 = vunpack.c.l.bf16 %v218_v30 }
   0x9   :  { %49 = vperm.xlu0 %291, %v41_v7  }
   0xa   :  { %161 = vperm.xlu1 %292, %v153_v14  }
   0xb   :  { %269 = vmatpush3.bf16.msra.mxu0 %v295_v4 }
   0xc   :  { %270 = vmatprep.subr.bf16.mxu0 %v302_v0 }
   0xf   :  { %271 = vmatpush3.bf16.msra.mxu0 %v296_v6 }
  0x10   :  { %272 = vmatprep.subr.bf16.mxu0 %v302_v0 }
  0x13   :  { %273 = vmatpush3.bf16.msra.mxu0 %v297_v8 }
  0x14   :  { %274 = vmatprep.subr.bf16.mxu0 %v302_v0 }
  0x17   :  { %275 = vmatpush3.bf16.msra.mxu0 %v298_v9 }
  0x18   :  { %276 = vmatprep.subr.bf16.mxu0 %v302_v0 }
  0x1b   :  { %277 = vmatpush3.bf16.msra.mxu0 %v104_v11 }
  0x1e   :  { %279 = vmatmul.mubr.msk.bf16.vlgmr.msra.gmra.mrb[0].mxu0 %vm98_vm2, %v300_v12 }
  0x84   :  { %v45_v15 = vpop.permute.xlu0 %44 }
  0x85   :  { %v157_v28 = vpop.permute.xlu1 %156 }
  0x88   :  { %v50_v19 = vpop.permute.xlu0 %49 }
  0x89   :  { %v162_v36 = vpop.permute.xlu1 %161 }
  0xf1   :  { %v140_v16 = vpop.f32.mrb[0].mxu0 }
  0xf2   :  { %v141_v17 = vadd.f32 %v140_v16, %v45_v15  ;;  %v280_v18 = vpop.f32.mrb[1].mxu0 }
  0xf3   :  { %v143_v20 = vpop.f32.mrb[2].mxu0 }
  0xf4   :  { %v144_v21 = vadd.f32 %v143_v20, %v50_v19  ;;  %v281_v22 = vpop.f32.mrb[3].mxu0  ;;  %v147_v23 = vmax.f32 %v141_v17, 0.0 }
  0xf6   :  { %v148_v24 = vmax.f32 %v144_v21, 0.0 }
  0xf8   :  { %v151_v25 = vpack.c.bf16 %v148_v24, %v147_v23 }
  0xfa   :  { %v174_v26 = vsel %vm102_vm1, %v151_v25, 0 }
  0xfb   :  { %283 = vmatpush3.bf16.msra.mxu1 %v174_v26 }
  0xfe   :  { %285 = vmatmul.mubr.msk.bf16.vlgmr.msra.gmra.mrb[0].mxu1 %vm169_vm3, %v301_v27 }
 0x1d1   :  { %v210_v32 = vpop.f32.mrb[0].mxu1 }
 0x1d2   :  { %v211_v33 = vadd.f32 %v210_v32, %v157_v28  ;;  %v286_v34 = vpop.f32.mrb[1].mxu1 }
 0x1d3   :  { %v213_v37 = vpop.f32.mrb[2].mxu1 }
 0x1d4   :  { %v221_v38 = vadd.f32 %v219_v31, %v211_v33  ;;  %v214_v39 = vadd.f32 %v213_v37, %v162_v36  ;;  %v287_v40 = vpop.f32.mrb[3].mxu1 }
 0x1d6   :  { %v252_v41 = vpack.c.bf16 %v221_v38, %v221_v38  ;;  %v222_v42 = vadd.f32 %v220_v35, %v214_v39 }
 0x1d8   :  { %232 = vst.msk [vmem:[%s399_s6] sm:$0xf] %vm231_vm4, %v252_v41  ;;  %v253_v43 = vpack.c.bf16 %v222_v42, %v222_v42 }
 0x1da   :  { %234 = vst.msk [vmem:[%s399_s6 + $0x4] sm:$0x3] %vm233_vm5, %v253_v43 }

// kernel: vqvae2_forward.28
= control target key start
LH: loop header
LB: loop body
LE: loop exit
PB: predicated region body
PF: predicated region fallthrough
CT: control target
= control target key end

     0   :  { %v231_v0 = vmov 0   ;;  %vm134_vm0 = vcmask 523264   ;;  %s306_s1 = inlined_call_operand.vmem [shape: bf16[192,128], index: 1, kind: input, shape index: {}]   ;;  %s307_s0 = inlined_call_operand.vmem [shape: bf16[12,192], index: 0, kind: input, shape index: {}]   ;;  %s308_s2 = inlined_call_operand.vmem [shape: f32[12,1], index: 2, kind: input, shape index: {}]   ;;  %s309_s3 = inlined_call_operand.vmem [shape: bf16[12,128], index: 3, kind: output, shape index: {}]  }
   0x1   :  { %138 = vmatprep.subr.bf16.mxu0 %v231_v0  ;;  %v216_v1 = vld [vmem:[%s306_s1] sm:$0xff]   ;;  %215 = vset.pattern.permute.xlu0 %v231_v0  ;;  %v217_v2 = vld [vmem:[%s306_s1 + $0x8] sm:$0xff]   ;;  %v218_v3 = vld [vmem:[%s306_s1 + $0x10] sm:$0xff]  }
   0x2   :  { %139 = vmatpush1.bf16.msra.mxu0 %v216_v1  ;;  %v219_v4 = vld [vmem:[%s306_s1 + $0x18] sm:$0xff]   ;;  %v230_v5 = vld [vmem:[%s307_s0 + $0x4] ss:$8 sps:$4 sm:$0x3f]   ;;  %v42_v8 = vld [vmem:[%s308_s2 + $0x8] sm:$0xf] }
   0x3   :  { %140 = vmatprep.subr.bf16.mxu0 %v231_v0  ;;  %v41_v6 = vld [vmem:[%s308_s2] sm:$0xff]  ;;  %209 = vmatprep.mubr.msk.bf16.mxu0 %vm134_vm0, %v230_v5  ;;  %v221_v9 = vld [vmem:[%s306_s1 + $0x28] sm:$0xff]   ;;  %v222_v10 = vld [vmem:[%s306_s1 + $0x30] sm:$0xff]  }
   0x4   :  { %v220_v7 = vld [vmem:[%s306_s1 + $0x20] sm:$0xff]   ;;  %45 = vperm.xlu0 %215, %v41_v6   ;;  %v223_v11 = vld [vmem:[%s306_s1 + $0x38] sm:$0xff]   ;;  %v225_v13 = vld [vmem:[%s306_s1 + $0x48] sm:$0xff]  }
   0x5   :  { %v224_v12 = vld [vmem:[%s306_s1 + $0x40] sm:$0xff]   ;;  %v226_v14 = vld [vmem:[%s306_s1 + $0x50] sm:$0xff]   ;;  %v227_v15 = vld [vmem:[%s306_s1 + $0x58] sm:$0xff]  }
   0x6   :  { %141 = vmatpush1.bf16.msra.mxu0 %v217_v2  ;;  %v228_v16 = vld [vmem:[%s307_s0] ss:$8 sps:$4 sm:$0x3f]  }
   0x7   :  { %142 = vmatprep.subr.bf16.mxu0 %v231_v0 }
   0x8   :  { %50 = vperm.xlu0 %215, %v42_v8  }
   0xa   :  { %143 = vmatpush1.bf16.msra.mxu0 %v218_v3 }
   0xb   :  { %144 = vmatprep.subr.bf16.mxu0 %v231_v0 }
   0xe   :  { %145 = vmatpush1.bf16.msra.mxu0 %v219_v4 }
   0xf   :  { %146 = vmatprep.subr.bf16.mxu0 %v231_v0 }
  0x12   :  { %147 = vmatpush1.bf16.msra.mxu0 %v220_v7 }
  0x13   :  { %148 = vmatprep.subr.bf16.mxu0 %v231_v0 }
  0x16   :  { %149 = vmatpush1.bf16.msra.mxu0 %v221_v9 }
  0x17   :  { %150 = vmatprep.subr.bf16.mxu0 %v231_v0 }
  0x1a   :  { %151 = vmatpush1.bf16.msra.mxu0 %v222_v10 }
  0x1b   :  { %152 = vmatprep.subr.bf16.mxu0 %v231_v0 }
  0x1e   :  { %153 = vmatpush1.bf16.msra.mxu0 %v223_v11 }
  0x1f   :  { %154 = vmatprep.subr.bf16.mxu0 %v231_v0 }
  0x22   :  { %155 = vmatpush1.bf16.msra.mxu0 %v224_v12 }
  0x23   :  { %156 = vmatprep.subr.bf16.mxu0 %v231_v0 }
  0x26   :  { %157 = vmatpush1.bf16.msra.mxu0 %v225_v13 }
  0x27   :  { %158 = vmatprep.subr.bf16.mxu0 %v231_v0 }
  0x2a   :  { %159 = vmatpush1.bf16.msra.mxu0 %v226_v14 }
  0x2b   :  { %160 = vmatprep.subr.bf16.mxu0 %v231_v0 }
  0x2e   :  { %161 = vmatpush1.bf16.msra.mxu0 %v227_v15 }
  0x31   :  { %171 = vmatmul.mubr.bf16.vlgmr.msra.gmra.mrb[0].mxu0 %v228_v16 }
  0x83   :  { %v46_v17 = vpop.permute.xlu0 %45 }
  0x87   :  { %v51_v21 = vpop.permute.xlu0 %50 }
 0x104   :  { %v172_v18 = vpop.f32.mrb[0].mxu0 }
 0x105   :  { %v173_v19 = vadd.f32 %v172_v18, %v46_v17  ;;  %v174_v20 = vpop.f32.mrb[1].mxu0 }
 0x106   :  { %v175_v22 = vpop.f32.mrb[2].mxu0 }
 0x107   :  { %v179_v23 = vmax.f32 %v173_v19, 0.0  ;;  %v176_v24 = vadd.f32 %v175_v22, %v51_v21  ;;  %v177_v25 = vpop.f32.mrb[3].mxu0 }
 0x109   :  { %v212_v26 = vpack.c.bf16 %v179_v23, %v179_v23  ;;  %v180_v27 = vmax.f32 %v176_v24, 0.0 }
 0x10b   :  { %189 = vst [vmem:[%s309_s3] sm:$0xf] %v212_v26  ;;  %v213_v28 = vpack.c.bf16 %v180_v27, %v180_v27 }
 0x10d   :  { %190 = vst [vmem:[%s309_s3 + $0x4] sm:$0x3] %v213_v28 }

// kernel: vqvae2_forward.29
= control target key start
LH: loop header
LB: loop body
LE: loop exit
PB: predicated region body
PF: predicated region fallthrough
CT: control target
= control target key end

     0   :  { %s721_s12 = smov 0   ;;  %s723_s13 = smov 0   ;;  %s857_s0 = inlined_call_operand.vmem [shape: bf16[3,192], index: 0, kind: input, shape index: {}]   ;;  %s858_s1 = inlined_call_operand.vmem [shape: bf16[192,512], index: 1, kind: input, shape index: {}]   ;;  %s859_s2 = inlined_call_operand.vmem [shape: f32[3,1], index: 2, kind: input, shape index: {}]   ;;  %s860_s3 = inlined_call_operand.vmem [shape: f32[3,512], index: 3, kind: output, shape index: {}]  }
   0x1   :  { %s725_s14 = smov 0  }
   0x2 LB: > { %s574_s15 = sadd.s32 4294967295, %s698_s14   ;;  %s738_s16 = sadd.s32 1, %s698_s14   ;;  %s698_s14 = sphi %s725_s14, %s863_s14   ;;  %s694_s13 = sphi %s723_s13, %s862_s13   ;;  %s690_s12 = sphi %s721_s12, %s861_s12  }
   0x3   : > { %s38_s17 = ssub.s32 %s698_s14, %s738_s16  ;;  %s41_s18 = sadd.s32 1, %s694_s13 }
   0x4   : > { %p39_p0 = scmp.eq.s32.totalorder %s38_s17, 0  ;;  %p48_p1 = scmp.ne.s32.totalorder %s694_s13, %s690_s12 }
   0x5   : > { %p49_p2 = scmp.eq.s32.totalorder %s698_s14, 0  ;;  %p577_p4 = scmp.ge.s32.totalorder %s698_s14, 2 }
   0x6   : > { %s747_s19 = scalar_select %p39_p0, %s694_s13, %s41_s18  }
   0x7   : > { %p50_p3 = por %p49_p2, %p48_p1  ;;  %127 = sbr.rel (%p577_p4) target bundleno = 30 (0x1e), region = 24 }
   0xe   : > { %130 = sbr.rel (!%p50_p3) target bundleno = 30 (0x1e), region = 28  ;;  %s132_s20 = sand.u32 (%p50_p3), 1, %s694_s13  }
   0xf   : > { %s611_s21 = sshll.u32 (%p50_p3), %s698_s14, 3  ;;  %s612_s22 = smul.u32 (%p50_p3), 192, %s132_s20 }
  0x10   : > { %s755_s25 = scalar_lea.vmem (%p50_p3), %s858_s1, %s611_s21 }
  0x11   : > { %v211_v0 = vld [vmem:[%s755_s25] sm:$0xff] (%p50_p3)  ;;  %v213_v1 = vld [vmem:[%s755_s25 + $0x10] sm:$0xff] (%p50_p3)  ;;  %s763_s26 = scalar_lea.vmem (%p50_p3), [#allocation2], %s612_s22 }
  0x12   : > { %v215_v2 = vld [vmem:[%s755_s25 + $0x20] sm:$0xff] (%p50_p3)  ;;  %v217_v3 = vld [vmem:[%s755_s25 + $0x30] sm:$0xff] (%p50_p3)  ;;  %212 = vst [vmem:[%s763_s26] sm:$0xff] (%p50_p3), %v211_v0  ;;  %214 = vst [vmem:[%s763_s26 + $0x8] sm:$0xff] (%p50_p3), %v213_v1 }
  0x13   : > { %v219_v4 = vld [vmem:[%s755_s25 + $0x40] sm:$0xff] (%p50_p3)  ;;  %v221_v5 = vld [vmem:[%s755_s25 + $0x50] sm:$0xff] (%p50_p3)  ;;  %216 = vst [vmem:[%s763_s26 + $0x10] sm:$0xff] (%p50_p3), %v215_v2  ;;  %218 = vst [vmem:[%s763_s26 + $0x18] sm:$0xff] (%p50_p3), %v217_v3 }
  0x14   : > { %220 = vst [vmem:[%s763_s26 + $0x20] sm:$0xff] (%p50_p3), %v219_v4  ;;  %222 = vst [vmem:[%s763_s26 + $0x28] sm:$0xff] (%p50_p3), %v221_v5  ;;  %v223_v6 = vld [vmem:[%s755_s25 + $0x60] sm:$0xff] (%p50_p3)  ;;  %v225_v7 = vld [vmem:[%s755_s25 + $0x70] sm:$0xff] (%p50_p3) }
  0x15   : > { %v227_v8 = vld [vmem:[%s755_s25 + $0x80] sm:$0xff]  ;;  %224 = vst [vmem:[%s763_s26 + $0x30] sm:$0xff] %v223_v6  ;;  %226 = vst [vmem:[%s763_s26 + $0x38] sm:$0xff] %v225_v7  ;;  %v229_v9 = vld [vmem:[%s755_s25 + $0x90] sm:$0xff] }
  0x16   : > { %228 = vst [vmem:[%s763_s26 + $0x40] sm:$0xff] %v227_v8  ;;  %v231_v10 = vld [vmem:[%s755_s25 + $0xa0] sm:$0xff]  ;;  %v233_v11 = vld [vmem:[%s755_s25 + $0xb0] sm:$0xff]  ;;  %230 = vst [vmem:[%s763_s26 + $0x48] sm:$0xff] %v229_v9 }
  0x17   : > { %232 = vst [vmem:[%s763_s26 + $0x50] sm:$0xff] %v231_v10  ;;  %234 = vst [vmem:[%s763_s26 + $0x58] sm:$0xff] %v233_v11  ;;  %v235_v12 = vld [vmem:[%s755_s25 + $0xc0] sm:$0xff]  ;;  %v237_v13 = vld [vmem:[%s755_s25 + $0xd0] sm:$0xff] }
  0x18   : > { %v239_v14 = vld [vmem:[%s755_s25 + $0xe0] sm:$0xff]  ;;  %236 = vst [vmem:[%s763_s26 + $0x60] sm:$0xff] %v235_v12  ;;  %238 = vst [vmem:[%s763_s26 + $0x68] sm:$0xff] %v237_v13  ;;  %v241_v15 = vld [vmem:[%s755_s25 + $0xf0] sm:$0xff] }
  0x19   : > { %240 = vst [vmem:[%s763_s26 + $0x70] sm:$0xff] %v239_v14  ;;  %v243_v16 = vld [vmem:[%s755_s25 + $0x100] sm:$0xff]  ;;  %v245_v17 = vld [vmem:[%s755_s25 + $0x110] sm:$0xff]  ;;  %242 = vst [vmem:[%s763_s26 + $0x78] sm:$0xff] %v241_v15 }
  0x1a   : > { %244 = vst [vmem:[%s763_s26 + $0x80] sm:$0xff] %v243_v16  ;;  %246 = vst [vmem:[%s763_s26 + $0x88] sm:$0xff] %v245_v17  ;;  %v247_v18 = vld [vmem:[%s755_s25 + $0x120] sm:$0xff]  ;;  %v249_v19 = vld [vmem:[%s755_s25 + $0x130] sm:$0xff] }
  0x1b   : > { %v251_v20 = vld [vmem:[%s755_s25 + $0x140] sm:$0xff]  ;;  %248 = vst [vmem:[%s763_s26 + $0x90] sm:$0xff] %v247_v18  ;;  %250 = vst [vmem:[%s763_s26 + $0x98] sm:$0xff] %v249_v19  ;;  %v253_v21 = vld [vmem:[%s755_s25 + $0x150] sm:$0xff] }
  0x1c   : > { %252 = vst [vmem:[%s763_s26 + $0xa0] sm:$0xff] %v251_v20  ;;  %v255_v22 = vld [vmem:[%s755_s25 + $0x160] sm:$0xff]  ;;  %v257_v23 = vld [vmem:[%s755_s25 + $0x170] sm:$0xff]  ;;  %254 = vst [vmem:[%s763_s26 + $0xa8] sm:$0xff] %v253_v21 }
  0x1d   : > { %256 = vst [vmem:[%s763_s26 + $0xb0] sm:$0xff] %v255_v22  ;;  %258 = vst [vmem:[%s763_s26 + $0xb8] sm:$0xff] %v257_v23 }
  0x1e PF: > { %p580_p5 = scmp.ge.s32.totalorder %s698_s14, 1  ;;  %p263_p6 = scmp.lt.s32.totalorder %s698_s14, 3 }
  0x20   : > { %p264_p7 = pnand %p580_p5, %p263_p6 }
  0x21   : > { %s270_s27 = sand.u32 (!%p264_p7), 1, %s690_s12   ;;  %v583_v24 = vld.sshfl [vmem:[%s857_s0] sm:$0x33 pattern:$0x76325410] (!%p264_p7)  ;;  %vm462_vm0 = vcmask (!%p264_p7), 523264  }
  0x22   : > { %267 = sbr.rel (%p264_p7) target bundleno = 305 (0x131), region = 66  ;;  %v340_v25 = vcombine.high (!%p264_p7), %v583_v24, %v583_v24  ;;  %v326_v26 = vld [vmem:[%s859_s2] sm:$0x7] (!%p264_p7)  ;;  %v700_v27 = vmov (!%p264_p7), 0   ;;  %s581_s7 = sshll.u32 (!%p264_p7), %s574_s15, 1 }
  0x23   : > { %s613_s30 = smul.u32 (!%p264_p7), 192, %s270_s27  ;;  %639 = vset.pattern.permute.xlu0 (!%p264_p7), %v700_v27  ;;  %p295_p8 = scmp.lt.s32.totalorder (!%p264_p7), %s581_s7, 3 }
  0x24   : > { %608 = vmatprep.mubr.msk.bf16.mxu0 (!%p264_p7), %vm462_vm0, %v340_v25  ;;  %329 = vperm.xlu0 (!%p264_p7), %639, %v326_v26  }
  0x25   : > { %s816_s6 = scalar_lea.vmem (!%p264_p7), [#allocation2], %s613_s30 }
  0x26   : > { %v640_v28 = vld [vmem:[%s816_s6 + $0x4] ss:$8 sps:$4 sm:$0xff] (!%p264_p7)   ;;  %v642_v29 = vld [vmem:[%s816_s6] ss:$8 sps:$4 sm:$0xff] (!%p264_p7)   ;;  %v643_v30 = vld [vmem:[%s816_s6 + $0x14] ss:$8 sps:$4 sm:$0xff] (!%p264_p7)  }
  0x27   : > { %466 = vmatprep.subr.bf16.mxu0 (!%p264_p7), %v640_v28  ;;  %v645_v31 = vld [vmem:[%s816_s6 + $0x10] ss:$8 sps:$4 sm:$0xff] (!%p264_p7)   ;;  %v646_v32 = vld [vmem:[%s816_s6 + $0x24] ss:$8 sps:$4 sm:$0xff] (!%p264_p7)   ;;  %v648_v33 = vld [vmem:[%s816_s6 + $0x20] ss:$8 sps:$4 sm:$0xff] (!%p264_p7)  }
  0x28   : > { %467 = vmatpush1.bf16.msra.mxu0 (!%p264_p7), %v642_v29  ;;  %v649_v34 = vld [vmem:[%s816_s6 + $0x34] ss:$8 sps:$4 sm:$0xff] (!%p264_p7)   ;;  %v651_v35 = vld [vmem:[%s816_s6 + $0x30] ss:$8 sps:$4 sm:$0xff] (!%p264_p7)   ;;  %v652_v36 = vld [vmem:[%s816_s6 + $0x44] ss:$8 sps:$4 sm:$0xff] (!%p264_p7)  }
  0x29   : > { %468 = vmatprep.subr.bf16.mxu0 %v643_v30  ;;  %v654_v37 = vld [vmem:[%s816_s6 + $0x40] ss:$8 sps:$4 sm:$0xff]   ;;  %v655_v38 = vld [vmem:[%s816_s6 + $0x54] ss:$8 sps:$4 sm:$0xff]   ;;  %v657_v39 = vld [vmem:[%s816_s6 + $0x50] ss:$8 sps:$4 sm:$0xff]  }
  0x2a   : > { %v658_v40 = vld [vmem:[%s816_s6 + $0x64] ss:$8 sps:$4 sm:$0xff]   ;;  %v660_v41 = vld [vmem:[%s816_s6 + $0x60] ss:$8 sps:$4 sm:$0xff]   ;;  %v661_v42 = vld [vmem:[%s816_s6 + $0x74] ss:$8 sps:$4 sm:$0xff]  }
  0x2b   : > { %v663_v43 = vld [vmem:[%s816_s6 + $0x70] ss:$8 sps:$4 sm:$0xff]   ;;  %v664_v44 = vld [vmem:[%s816_s6 + $0x84] ss:$8 sps:$4 sm:$0xff]   ;;  %v666_v45 = vld [vmem:[%s816_s6 + $0x80] ss:$8 sps:$4 sm:$0xff]  }
  0x2c   : > { %469 = vmatpush1.bf16.msra.mxu0 %v645_v31  ;;  %v667_v46 = vld [vmem:[%s816_s6 + $0x94] ss:$8 sps:$4 sm:$0xff]   ;;  %v669_v47 = vld [vmem:[%s816_s6 + $0x90] ss:$8 sps:$4 sm:$0xff]   ;;  %v670_v48 = vld [vmem:[%s816_s6 + $0xa4] ss:$8 sps:$4 sm:$0xff]  }
  0x2d   : > { %470 = vmatprep.subr.bf16.mxu0 %v646_v32  ;;  %v672_v49 = vld [vmem:[%s816_s6 + $0xa0] ss:$8 sps:$4 sm:$0xff]   ;;  %v673_v50 = vld [vmem:[%s816_s6 + $0xb4] ss:$8 sps:$4 sm:$0xff]   ;;  %v675_v51 = vld [vmem:[%s816_s6 + $0xb0] ss:$8 sps:$4 sm:$0xff]  }
  0x2e   : > { %s865_s7 = smov (!%p295_p8, %s581_s7), 3 }
  0x2f   : > { %s582_s8 = sshll.u32 %s865_s7, 2 }
  0x30   : > { %471 = vmatpush1.bf16.msra.mxu0 %v648_v33  ;;  %s298_s11 = scalar_lea.vmem %s860_s3, %s582_s8 }
  0x31   : > { %472 = vmatprep.subr.bf16.mxu0 %v649_v34 }
  0x34   : > { %473 = vmatpush1.bf16.msra.mxu0 %v651_v35 }
  0x35   : > { %474 = vmatprep.subr.bf16.mxu0 %v652_v36 }
  0x38   : > { %475 = vmatpush1.bf16.msra.mxu0 %v654_v37 }
  0x39   : > { %476 = vmatprep.subr.bf16.mxu0 %v655_v38 }
  0x3c   : > { %477 = vmatpush1.bf16.msra.mxu0 %v657_v39 }
  0x3d   : > { %478 = vmatprep.subr.bf16.mxu0 %v658_v40 }
  0x40   : > { %479 = vmatpush1.bf16.msra.mxu0 %v660_v41 }
  0x41   : > { %480 = vmatprep.subr.bf16.mxu0 %v661_v42 }
  0x44   : > { %481 = vmatpush1.bf16.msra.mxu0 %v663_v43 }
  0x45   : > { %482 = vmatprep.subr.bf16.mxu0 %v664_v44 }
  0x48   : > { %483 = vmatpush1.bf16.msra.mxu0 %v666_v45 }
  0x49   : > { %484 = vmatprep.subr.bf16.mxu0 %v667_v46 }
  0x4c   : > { %485 = vmatpush1.bf16.msra.mxu0 %v669_v47 }
  0x4d   : > { %486 = vmatprep.subr.bf16.mxu0 %v670_v48 }
  0x50   : > { %487 = vmatpush1.bf16.msra.mxu0 %v672_v49 }
  0x51   : > { %488 = vmatprep.subr.bf16.mxu0 %v673_v50 }
  0x54   : > { %489 = vmatpush1.bf16.msra.mxu0 %v675_v51 }
  0x57   : > { %499 = vmatmul.mubr.bf16.vlgmr.msra.gmra.mrb[0].mxu0 %v583_v24 }
  0xa3   : > { %v330_v52 = vpop.permute.xlu0 %329 }
 0x12a   : > { %v500_v53 = vpop.f32.mrb[0].mxu0 }
 0x12b   : > { %v501_v54 = vadd.f32 %v500_v53, %v330_v52  ;;  %v502_v55 = vpop.f32.mrb[1].mxu0 }
 0x12c   : > { %v503_v56 = vadd.f32 %v502_v55, %v330_v52  ;;  %v504_v57 = vpop.f32.mrb[2].mxu0 }
 0x12d   : > { %v505_v58 = vpop.f32.mrb[3].mxu0 }
 0x12e   : > { %v509_v59 = vcombine.low %v501_v54, %v503_v56 }
 0x130   : > { %511 = vst [vmem:[%s298_s11] sm:$0x77] %v509_v59 }
 0x131 PF: > { %p10_p9 = scmp.ge.s32.totalorder %s738_s16, 4   ;;  %s861_s12 = smov %s694_s13 }
 0x132   : > { %s862_s13 = smov %s747_s19  ;;  %s863_s14 = smov %s738_s16 }
 0x133   :  { %12 = sbr.rel (!%p10_p9) target bundleno = 2 (0x2), region = 105 }

</bundles_post_ra>
